<compile_context>
chip_gen: v5e
topology: v5e:2x2
jax: 0.10.0
libtpu: 0.0.40
codegen_flags: <defaults>
</compile_context>

<pallas_src>
import math

import jax
import jax.numpy as jnp
from jax import lax
from jax.experimental import pallas as pl
from jax.experimental.pallas import tpu as pltpu


def _make_kernel(b_blk, n_tokens, n_heads, d_head, n_ff_chunks, fused_qkv, eps=1e-5):
    D = n_heads * d_head
    M = b_blk * n_tokens
    inv_sqrt2 = 1.0 / math.sqrt(2.0)
    f32 = jnp.float32
    bf16 = jnp.bfloat16

    def gelu_exact(x):
        # torch.nn.functional.gelu default = exact (erf) gelu
        return 0.5 * x * (1.0 + lax.erf(x * inv_sqrt2))

    def kernel(x_ref, sc1_ref, sh1_ref, sc3_ref, sh3_ref,
               wpi_ref, wq_ref, wk_ref, wv_ref, wo_ref, bo_ref,
               wga_ref, bga_ref, wgb_ref, bgb_ref, wf_ref, bf_ref,
               wpo_ref, out_ref, osc_ref):
        # Fold batch into the matmul M dimension (leading-dim fold: layout no-op).
        x = x_ref[...].reshape(M, -1).astype(bf16)
        h = jnp.dot(x, wpi_ref[...], preferred_element_type=f32)            # (M, D) f32

        def ada_layer_norm(hh, scale, shift):
            # scale/shift are (b_blk, 1, D), precomputed outside from t.
            mu = jnp.mean(hh, axis=-1, keepdims=True)
            var = jnp.mean((hh - mu) ** 2, axis=-1, keepdims=True)
            hn = (hh - mu) * lax.rsqrt(var + eps)
            hn = hn.reshape(b_blk, n_tokens, D)
            return (hn * (1.0 + scale) + shift).reshape(M, D)

        # ----- self-attention branch: x = attn1(norm1(x, t)) + x -----
        y = ada_layer_norm(h, sc1_ref[...], sh1_ref[...]).astype(bf16)

        if fused_qkv:
            # d_head % 128 == 0: fused lane-dense QKV; per-head slices 128-aligned.
            q = jnp.dot(y, wq_ref[...], preferred_element_type=f32)
            k = jnp.dot(y, wk_ref[...], preferred_element_type=f32)
            v = jnp.dot(y, wv_ref[...], preferred_element_type=f32)

        # TODO(synk): flash-style KV tiling (online softmax) for large N.
        for hi in range(n_heads):                                            # static unroll
            lo = hi * d_head
            if fused_qkv:
                qh = q[:, lo:lo + d_head]
                kh = k[:, lo:lo + d_head]
                vh = v[:, lo:lo + d_head]
            else:
                # Head-major projection weights (H, D, dh): no lane-axis slicing
                # of activations at non-128 offsets. Softmax scale pre-folded into wq.
                qh = jnp.dot(y, wq_ref[hi], preferred_element_type=f32)
                kh = jnp.dot(y, wk_ref[hi], preferred_element_type=f32)
                vh = jnp.dot(y, wv_ref[hi], preferred_element_type=f32)
            qh = qh.astype(bf16).reshape(b_blk, n_tokens, d_head)
            kh = kh.astype(bf16).reshape(b_blk, n_tokens, d_head)
            vh = vh.astype(bf16).reshape(b_blk, n_tokens, d_head)
            # Batched contraction on the last dim: no explicit transpose needed.
            sim = jnp.einsum('bnd,bmd->bnm', qh, kh,
                             preferred_element_type=f32)                     # (b, N, N)
            sim = sim - jnp.max(sim, axis=-1, keepdims=True)
            p = jnp.exp(sim)
            p = p * pl.reciprocal(jnp.sum(p, axis=-1, keepdims=True), approx=True)
            oh = jnp.einsum('bnm,bmd->bnd', p.astype(bf16), vh,
                            preferred_element_type=f32)                      # (b, N, dh)
            # Assemble heads in VMEM scratch so the output projection runs as ONE
            # full-K (M,D)x(D,D) matmul instead of H matmuls with K=d_head.
            osc_ref[:, lo:lo + d_head] = oh.reshape(M, d_head)
        attn = jnp.dot(osc_ref[...].astype(bf16), wo_ref[...],
                       preferred_element_type=f32)
        h = h + attn + bo_ref[...]

        # ----- feed-forward (GEGLU) branch: x = ff(norm3(x, t)) + x -----
        y3 = ada_layer_norm(h, sc3_ref[...], sh3_ref[...]).astype(bf16)

        def ff_chunk_step(c, acc):
            # Weights are pre-chunked outside with a leading chunk axis, so the
            # kernel only does (dynamic) leading-axis ref indexing here.
            a = jnp.dot(y3, wga_ref[c], preferred_element_type=f32) + bga_ref[c]
            gate = jnp.dot(y3, wgb_ref[c], preferred_element_type=f32) + bgb_ref[c]
            g = (a * gelu_exact(gate)).astype(bf16)
            return acc + jnp.dot(g, wf_ref[c], preferred_element_type=f32)

        if n_ff_chunks == 1:
            ff = ff_chunk_step(0, jnp.zeros((M, D), f32))
        else:
            # fori_loop (not a python loop) so only one (M, ff_chunk) intermediate
            # set is live at a time.
            ff = lax.fori_loop(0, n_ff_chunks, ff_chunk_step, jnp.zeros((M, D), f32))
        h = h + ff + bf_ref[...]

        # ----- proj_out (zero_module'd linear, no bias; lane-padded output) -----
        out = jnp.dot(h.astype(bf16), wpo_ref[...], preferred_element_type=f32)
        out_ref[...] = out.reshape(b_blk, n_tokens, -1)

    return kernel


def fuse_transformer(x, t, params, n_heads, d_head, *, batch_block=None, ff_chunk=None):
    B, N, Cin = x.shape
    D = n_heads * d_head
    inner = 4 * D
    Cout = params["wpo"].shape[1]
    f32, bf16 = jnp.float32, jnp.bfloat16

    # Batch block: give the "parallel" batch grid axis >= 2 steps when possible
    # (v7x megacore; also re-enables input/output DMA pipelining). Keep N % 8 == 0
    # so the (bb*N, D) <-> (bb, N, D) folds stay layout no-ops.
    if batch_block is None:
        bb = B
        for cand in range(B // 2, 0, -1):
            if B % cand == 0:
                bb = cand
                break
    else:
        bb = batch_block
    assert B % bb == 0
    M = bb * N

    # ---- hoist all t-only computation (M=1 matmuls) out of the kernel ----
    temb = jnp.dot(t[:, 0, :].astype(f32), params["wt"]) + params["bt"]       # (B, D)
    # NOTE: AdaLayerNorm defines nn.SiLU() but never applies it in forward()
    # (verified against the PyTorch source) -- mirrored here.
    emb1 = jnp.dot(temb, params["wn1"]) + params["bn1"]                       # (B, 2D)
    emb3 = jnp.dot(temb, params["wn3"]) + params["bn3"]
    scale1, shift1 = emb1[:, None, :D], emb1[:, None, D:]
    scale3, shift3 = emb3[:, None, :D], emb3[:, None, D:]

    # ---- weight prep: bf16 casts + layouts that avoid in-kernel lane slicing ----
    attn_scale = d_head ** (-0.5)
    fused_qkv = (d_head % 128 == 0)
    wq_scaled = params["wq"] * attn_scale          # fold softmax scale into to_q (free)
    if fused_qkv:
        wq_k = wq_scaled.astype(bf16)
        wk_k = params["wk"].astype(bf16)
        wv_k = params["wv"].astype(bf16)
    else:
        # head-major (H, D, d_head): kernel indexes the leading head axis only.
        wq_k = wq_scaled.reshape(D, n_heads, d_head).transpose(1, 0, 2).astype(bf16)
        wk_k = params["wk"].reshape(D, n_heads, d_head).transpose(1, 0, 2).astype(bf16)
        wv_k = params["wv"].reshape(D, n_heads, d_head).transpose(1, 0, 2).astype(bf16)

    # GEGLU inner-dim chunking: bounds the live (M, inner) f32 intermediates.
    if ff_chunk is None:
        ff_chunk = inner
        for cand in range(min(512, inner), 127, -128):
            if inner % cand == 0:
                ff_chunk = cand
                break
    assert inner % ff_chunk == 0
    n_ff_chunks = inner // ff_chunk
    wga = params["wg"][:, :inner].reshape(D, n_ff_chunks, ff_chunk)
    wga = wga.transpose(1, 0, 2).astype(bf16)                                 # (C, D, fc)
    wgb = params["wg"][:, inner:].reshape(D, n_ff_chunks, ff_chunk)
    wgb = wgb.transpose(1, 0, 2).astype(bf16)
    bga = params["bg"][:, :inner].reshape(1, n_ff_chunks, ff_chunk).transpose(1, 0, 2)
    bgb = params["bg"][:, inner:].reshape(1, n_ff_chunks, ff_chunk).transpose(1, 0, 2)
    wf = params["wf"].reshape(n_ff_chunks, ff_chunk, D).astype(bf16)          # (C, fc, D)

    # Lane-dense output stores: pad Cout to a multiple of 128, strip after the call.
    Cout_pad = ((Cout + 127) // 128) * 128
    wpo = jnp.zeros((D, Cout_pad), f32).at[:, :Cout].set(params["wpo"]).astype(bf16)

    weights = [params["wpi"].astype(bf16), wq_k, wk_k, wv_k,
               params["wo"].astype(bf16), params["bo"],
               wga, bga, wgb, bgb, wf, params["bf"], wpo]

    # ---- advisory cost estimate + scoped-VMEM budget ----
    flops = (2 * B * N * (Cin * D + 4 * D * D + 2 * D * inner + inner * D + D * Cout_pad)
             + 4 * B * n_heads * N * N * d_head)
    transcendentals = B * N * (n_heads * N + inner) + 4 * B * N
    weight_bytes = sum(int(w.size) * w.dtype.itemsize for w in weights)
    bytes_accessed = (int(x.size) * 4 + 4 * B * D * 4 + weight_bytes
                      + B * N * Cout_pad * 4)
    act_bytes = 4 * (bb * N * Cin + 8 * M * D + bb * N * N
                     + 3 * M * ff_chunk + M * Cout_pad)
    # x2 for double-buffer headroom; clamp to [32 MiB, 64 MiB] (v7x physical min).
    vmem_limit = int(min(max(2 * weight_bytes + 2 * act_bytes, 32 << 20), 64 << 20))

    kernel = _make_kernel(bb, N, n_heads, d_head, n_ff_chunks, fused_qkv)

    def batched_spec(shape):
        nd = len(shape)
        return pl.BlockSpec((bb,) + tuple(shape[1:]),
                            lambda i, _nd=nd: (i,) + (0,) * (_nd - 1))

    def build(weight_mode):
        def const_spec(arr):
            nd = arr.ndim
            if weight_mode is None:
                return pl.BlockSpec(arr.shape, lambda i, _nd=nd: (0,) * _nd)
            return pl.BlockSpec(arr.shape, lambda i, _nd=nd: (0,) * _nd,
                                pipeline_mode=weight_mode)

        in_specs = ([batched_spec(x.shape)]
                    + [batched_spec(s.shape) for s in (scale1, shift1, scale3, shift3)]
                    + [const_spec(w) for w in weights])
        return pl.pallas_call(
            kernel,
            out_shape=jax.ShapeDtypeStruct((B, N, Cout_pad), f32),
            grid_spec=pltpu.PrefetchScalarGridSpec(
                num_scalar_prefetch=0,
                grid=(B // bb,),
                in_specs=in_specs,
                out_specs=pl.BlockSpec((bb, N, Cout_pad), lambda i: (i, 0, 0)),
                scratch_shapes=[pltpu.VMEM((M, D), f32)],
            ),
            compiler_params=pltpu.CompilerParams(
                dimension_semantics=("parallel",),
                vmem_limit_bytes=vmem_limit),
            cost_estimate=pl.CostEstimate(flops=int(flops),
                                          transcendentals=int(transcendentals),
                                          bytes_accessed=int(bytes_accessed)),
        )

    args = (x, scale1, shift1, scale3, shift3, *weights)
    try:
        # Grid-invariant weights: single-buffer them (halves weight VMEM residency).
        out = build(pl.Buffered(buffer_count=1))(*args)
    except Exception:
        # pipeline_mode / Buffered(1) not supported -> default double-buffered specs.
        out = build(None)(*args)
    return out[..., :Cout]


def fuse_transformer_reference(x, t, params, n_heads, d_head, eps=1e-5):
    """Pure-JAX float32 mirror of the PyTorch FuseTransformer forward."""
    D = n_heads * d_head
    inner = 4 * D
    B, N, _ = x.shape
    inv_sqrt2 = 1.0 / math.sqrt(2.0)

    temb = t[:, 0, :] @ params["wt"] + params["bt"]
    emb1 = temb @ params["wn1"] + params["bn1"]
    emb3 = temb @ params["wn3"] + params["bn3"]
    scale1, shift1 = emb1[:, None, :D], emb1[:, None, D:]
    scale3, shift3 = emb3[:, None, :D], emb3[:, None, D:]

    def adaln(h, scale, shift):
        mu = jnp.mean(h, axis=-1, keepdims=True)
        var = jnp.mean((h - mu) ** 2, axis=-1, keepdims=True)
        return (h - mu) / jnp.sqrt(var + eps) * (1.0 + scale) + shift

    h = x @ params["wpi"]

    y = adaln(h, scale1, shift1)
    q = (y @ params["wq"]).reshape(B, N, n_heads, d_head).transpose(0, 2, 1, 3)
    k = (y @ params["wk"]).reshape(B, N, n_heads, d_head).transpose(0, 2, 1, 3)
    v = (y @ params["wv"]).reshape(B, N, n_heads, d_head).transpose(0, 2, 1, 3)
    sim = jnp.einsum('bhnd,bhmd->bhnm', q, k) * d_head ** (-0.5)
    sim = sim - jnp.max(sim, axis=-1, keepdims=True)
    p = jnp.exp(sim)
    p = p / jnp.sum(p, axis=-1, keepdims=True)
    o = jnp.einsum('bhnm,bhmd->bhnd', p, v).transpose(0, 2, 1, 3).reshape(B, N, D)
    h = h + o @ params["wo"] + params["bo"]

    y3 = adaln(h, scale3, shift3)
    ag = y3 @ params["wg"] + params["bg"]
    a, gate = ag[..., :inner], ag[..., inner:]
    g = a * (0.5 * gate * (1.0 + lax.erf(gate * inv_sqrt2)))
    h = h + g @ params["wf"] + params["bf"]
    return h @ params["wpo"]


def init_params(key, in_channels, n_heads, d_head, out_channels=None):
    D = n_heads * d_head
    inner = 4 * D
    out_channels = in_channels if out_channels is None else out_channels
    ks = jax.random.split(key, 20)

    def w(k, shape, s=0.05):
        return (s * jax.random.normal(k, shape)).astype(jnp.float32)

    p = {}
    p["wpi"] = w(ks[0], (in_channels, D))          # proj_in (bias=False)
    p["wt"] = w(ks[1], (1280, D))                  # t_proj
    p["bt"] = w(ks[2], (1, D))
    p["wn1"] = w(ks[3], (D, 2 * D))                # norm1 AdaLayerNorm linear
    p["bn1"] = w(ks[4], (1, 2 * D))
    p["wq"] = w(ks[5], (D, D))                     # attn1 to_q (bias=False)
    p["wk"] = w(ks[6], (D, D))                     # attn1 to_k (bias=False)
    p["wv"] = w(ks[7], (D, D))                     # attn1 to_v (bias=False)
    p["wo"] = w(ks[8], (D, D))                     # attn1 to_out[0]
    p["bo"] = w(ks[9], (1, D))
    p["wn3"] = w(ks[10], (D, 2 * D))               # norm3 AdaLayerNorm linear
    p["bn3"] = w(ks[11], (1, 2 * D))
    p["wg"] = w(ks[12], (D, 2 * inner))            # GEGLU proj
    p["bg"] = w(ks[13], (1, 2 * inner))
    p["wf"] = w(ks[14], (inner, D))                # ff net[2]
    p["bf"] = w(ks[15], (1, D))
    p["wpo"] = jnp.zeros((D, out_channels), jnp.float32)   # zero_module(proj_out)
    return p


if __name__ == "__main__":
    in_channels = 16
    n_heads = 4
    d_head = 32            # D = 128 (one full lane tile), inner = 512
    B, N = 2, 8

    key = jax.random.PRNGKey(0)
    kx, kt, kp, kw = jax.random.split(key, 4)
    x = jax.random.normal(kx, (B, N, in_channels), dtype=jnp.float32)
    t = jax.random.normal(kt, (B, 1, 1280), dtype=jnp.float32)
    params = init_params(kp, in_channels, n_heads, d_head)

    # 1) module-faithful params: proj_out is zero_module'd, so output must be 0.
    out0 = fuse_transformer(x, t, params, n_heads, d_head, ff_chunk=128)
    out0 = jax.block_until_ready(out0)
    assert out0.shape == (B, N, in_channels), out0.shape
    assert bool(jnp.all(jnp.isfinite(out0)))
    assert bool(jnp.all(out0 == 0.0))

    # 2) non-trivial proj_out: compare against the pure-JAX f32 reference of the
    #    PyTorch forward (bf16 matmuls + approx reciprocal -> loose tolerance).
    params_chk = dict(params)
    params_chk["wpo"] = (0.05 * jax.random.normal(
        kw, (n_heads * d_head, in_channels))).astype(jnp.float32)
    out = fuse_transformer(x, t, params_chk, n_heads, d_head, ff_chunk=128)
    ref = fuse_transformer_reference(x, t, params_chk, n_heads, d_head)
    out, ref = jax.block_until_ready((out, ref))
    assert out.shape == ref.shape
    assert bool(jnp.all(jnp.isfinite(out)))
    err = float(jnp.max(jnp.abs(out - ref)))
    ref_scale = float(jnp.max(jnp.abs(ref))) + 1e-6
    assert err / ref_scale < 8e-2, (err, ref_scale)
    print("KERNEL_OK")
</pallas_src>

<mosaic_0001>
module attributes {stable_mosaic.version = 11 : i64} {
  func.func @kernel(%arg0: i32, %arg1: memref<1x8x16xf32, #tpu.memory_space<vmem>>, %arg2: memref<1x1x128xf32, #tpu.memory_space<vmem>>, %arg3: memref<1x1x128xf32, #tpu.memory_space<vmem>>, %arg4: memref<1x1x128xf32, #tpu.memory_space<vmem>>, %arg5: memref<1x1x128xf32, #tpu.memory_space<vmem>>, %arg6: memref<16x128xbf16, #tpu.memory_space<vmem>>, %arg7: memref<4x128x32xbf16, #tpu.memory_space<vmem>>, %arg8: memref<4x128x32xbf16, #tpu.memory_space<vmem>>, %arg9: memref<4x128x32xbf16, #tpu.memory_space<vmem>>, %arg10: memref<128x128xbf16, #tpu.memory_space<vmem>>, %arg11: memref<1x128xf32, #tpu.memory_space<vmem>>, %arg12: memref<4x128x128xbf16, #tpu.memory_space<vmem>>, %arg13: memref<4x1x128xf32, #tpu.memory_space<vmem>>, %arg14: memref<4x128x128xbf16, #tpu.memory_space<vmem>>, %arg15: memref<4x1x128xf32, #tpu.memory_space<vmem>>, %arg16: memref<4x128x128xbf16, #tpu.memory_space<vmem>>, %arg17: memref<1x128xf32, #tpu.memory_space<vmem>>, %arg18: memref<128x128xbf16, #tpu.memory_space<vmem>>, %arg19: memref<1x8x128xf32, #tpu.memory_space<vmem>>, %arg20: memref<8x128xf32, #tpu.memory_space<vmem>>) attributes {dimension_semantics = [#tpu.dimension_semantics<parallel>], iteration_bounds = array<i64: 2>, scalar_prefetch = 0 : i64, scratch_operands = 1 : i64, tpu.core_type = #tpu.core_type<tc>, window_params = [{transform_indices = @transform_0, window_bounds = array<i64: 1, 8, 16>}, {transform_indices = @transform_1, window_bounds = array<i64: 1, 1, 128>}, {transform_indices = @transform_2, window_bounds = array<i64: 1, 1, 128>}, {transform_indices = @transform_3, window_bounds = array<i64: 1, 1, 128>}, {transform_indices = @transform_4, window_bounds = array<i64: 1, 1, 128>}, {pipeline_mode = #tpu.pipeline_mode<synchronous>, transform_indices = @transform_5, window_bounds = array<i64: 16, 128>}, {pipeline_mode = #tpu.pipeline_mode<synchronous>, transform_indices = @transform_6, window_bounds = array<i64: 4, 128, 32>}, {pipeline_mode = #tpu.pipeline_mode<synchronous>, transform_indices = @transform_7, window_bounds = array<i64: 4, 128, 32>}, {pipeline_mode = #tpu.pipeline_mode<synchronous>, transform_indices = @transform_8, window_bounds = array<i64: 4, 128, 32>}, {pipeline_mode = #tpu.pipeline_mode<synchronous>, transform_indices = @transform_9, window_bounds = array<i64: 128, 128>}, {pipeline_mode = #tpu.pipeline_mode<synchronous>, transform_indices = @transform_10, window_bounds = array<i64: 1, 128>}, {pipeline_mode = #tpu.pipeline_mode<synchronous>, transform_indices = @transform_11, window_bounds = array<i64: 4, 128, 128>}, {pipeline_mode = #tpu.pipeline_mode<synchronous>, transform_indices = @transform_12, window_bounds = array<i64: 4, 1, 128>}, {pipeline_mode = #tpu.pipeline_mode<synchronous>, transform_indices = @transform_13, window_bounds = array<i64: 4, 128, 128>}, {pipeline_mode = #tpu.pipeline_mode<synchronous>, transform_indices = @transform_14, window_bounds = array<i64: 4, 1, 128>}, {pipeline_mode = #tpu.pipeline_mode<synchronous>, transform_indices = @transform_15, window_bounds = array<i64: 4, 128, 128>}, {pipeline_mode = #tpu.pipeline_mode<synchronous>, transform_indices = @transform_16, window_bounds = array<i64: 1, 128>}, {pipeline_mode = #tpu.pipeline_mode<synchronous>, transform_indices = @transform_17, window_bounds = array<i64: 128, 128>}, {transform_indices = @transform_18, window_bounds = array<i64: 1, 8, 128>}]} {
    %c0 = arith.constant 0 : index
    %c0_0 = arith.constant 0 : index
    %c0_1 = arith.constant 0 : index
    %0 = vector.load %arg1[%c0, %c0_0, %c0_1] : memref<1x8x16xf32, #tpu.memory_space<vmem>>, vector<1x8x16xf32>
    %1 = vector.shape_cast %0 : vector<1x8x16xf32> to vector<8x16xf32>
    %2 = arith.truncf %1 : vector<8x16xf32> to vector<8x16xbf16>
    %c0_2 = arith.constant 0 : index
    %c0_3 = arith.constant 0 : index
    %3 = vector.load %arg6[%c0_2, %c0_3] : memref<16x128xbf16, #tpu.memory_space<vmem>>, vector<16x128xbf16>
    %cst = arith.constant dense<0.000000e+00> : vector<8x128xf32>
    %4 = tpu.matmul %2, %3, %cst {dimension_numbers = #tpu.dot_dimension_numbers<[1], [0], [0], [1], [0, 0, 1, 1], [], []>} : vector<8x16xbf16>, vector<16x128xbf16>, vector<8x128xf32> -> vector<8x128xf32>
    %c0_4 = arith.constant 0 : index
    %c0_5 = arith.constant 0 : index
    %c0_6 = arith.constant 0 : index
    %5 = vector.load %arg2[%c0_4, %c0_5, %c0_6] : memref<1x1x128xf32, #tpu.memory_space<vmem>>, vector<1x1x128xf32>
    %c0_7 = arith.constant 0 : index
    %c0_8 = arith.constant 0 : index
    %c0_9 = arith.constant 0 : index
    %6 = vector.load %arg3[%c0_7, %c0_8, %c0_9] : memref<1x1x128xf32, #tpu.memory_space<vmem>>, vector<1x1x128xf32>
    %cst_10 = arith.constant dense<0.000000e+00> : vector<8xf32>
    %7 = vector.multi_reduction <add>, %4, %cst_10 [1] : vector<8x128xf32> to vector<8xf32>
    %8 = vector.shape_cast %7 : vector<8xf32> to vector<8x1xf32>
    %cst_11 = arith.constant 1.280000e+02 : f32
    %9 = vector.broadcast %cst_11 : f32 to vector<8x1xf32>
    %10 = arith.divf %8, %9 : vector<8x1xf32>
    %11 = vector.broadcast %10 : vector<8x1xf32> to vector<8x128xf32>
    %12 = arith.subf %4, %11 : vector<8x128xf32>
    %13 = arith.mulf %12, %12 : vector<8x128xf32>
    %cst_12 = arith.constant dense<0.000000e+00> : vector<8xf32>
    %14 = vector.multi_reduction <add>, %13, %cst_12 [1] : vector<8x128xf32> to vector<8xf32>
    %15 = vector.shape_cast %14 : vector<8xf32> to vector<8x1xf32>
    %cst_13 = arith.constant 1.280000e+02 : f32
    %16 = vector.broadcast %cst_13 : f32 to vector<8x1xf32>
    %17 = arith.divf %15, %16 : vector<8x1xf32>
    %18 = vector.broadcast %10 : vector<8x1xf32> to vector<8x128xf32>
    %19 = arith.subf %4, %18 : vector<8x128xf32>
    %cst_14 = arith.constant 9.99999974E-6 : f32
    %20 = vector.broadcast %cst_14 : f32 to vector<8x1xf32>
    %21 = arith.addf %17, %20 : vector<8x1xf32>
    %22 = math.rsqrt %21 : vector<8x1xf32>
    %23 = vector.broadcast %22 : vector<8x1xf32> to vector<8x128xf32>
    %24 = arith.mulf %19, %23 : vector<8x128xf32>
    %25 = vector.shape_cast %24 : vector<8x128xf32> to vector<1x8x128xf32>
    %cst_15 = arith.constant 1.000000e+00 : f32
    %26 = vector.broadcast %cst_15 : f32 to vector<1x1x128xf32>
    %27 = arith.addf %26, %5 : vector<1x1x128xf32>
    %28 = vector.broadcast %27 : vector<1x1x128xf32> to vector<1x8x128xf32>
    %29 = arith.mulf %25, %28 : vector<1x8x128xf32>
    %30 = vector.broadcast %6 : vector<1x1x128xf32> to vector<1x8x128xf32>
    %31 = arith.addf %29, %30 : vector<1x8x128xf32>
    %32 = vector.shape_cast %31 : vector<1x8x128xf32> to vector<8x128xf32>
    %33 = arith.truncf %32 : vector<8x128xf32> to vector<8x128xbf16>
    %c0_16 = arith.constant 0 : index
    %c0_17 = arith.constant 0 : index
    %c0_18 = arith.constant 0 : index
    %34 = vector.load %arg7[%c0_16, %c0_17, %c0_18] : memref<4x128x32xbf16, #tpu.memory_space<vmem>>, vector<1x128x32xbf16>
    %35 = vector.shape_cast %34 : vector<1x128x32xbf16> to vector<128x32xbf16>
    %cst_19 = arith.constant dense<0.000000e+00> : vector<8x32xf32>
    %36 = tpu.matmul %33, %35, %cst_19 {dimension_numbers = #tpu.dot_dimension_numbers<[1], [0], [0], [1], [0, 0, 1, 1], [], []>} : vector<8x128xbf16>, vector<128x32xbf16>, vector<8x32xf32> -> vector<8x32xf32>
    %c0_20 = arith.constant 0 : index
    %c0_21 = arith.constant 0 : index
    %c0_22 = arith.constant 0 : index
    %37 = vector.load %arg8[%c0_20, %c0_21, %c0_22] : memref<4x128x32xbf16, #tpu.memory_space<vmem>>, vector<1x128x32xbf16>
    %38 = vector.shape_cast %37 : vector<1x128x32xbf16> to vector<128x32xbf16>
    %cst_23 = arith.constant dense<0.000000e+00> : vector<8x32xf32>
    %39 = tpu.matmul %33, %38, %cst_23 {dimension_numbers = #tpu.dot_dimension_numbers<[1], [0], [0], [1], [0, 0, 1, 1], [], []>} : vector<8x128xbf16>, vector<128x32xbf16>, vector<8x32xf32> -> vector<8x32xf32>
    %c0_24 = arith.constant 0 : index
    %c0_25 = arith.constant 0 : index
    %c0_26 = arith.constant 0 : index
    %40 = vector.load %arg9[%c0_24, %c0_25, %c0_26] : memref<4x128x32xbf16, #tpu.memory_space<vmem>>, vector<1x128x32xbf16>
    %41 = vector.shape_cast %40 : vector<1x128x32xbf16> to vector<128x32xbf16>
    %cst_27 = arith.constant dense<0.000000e+00> : vector<8x32xf32>
    %42 = tpu.matmul %33, %41, %cst_27 {dimension_numbers = #tpu.dot_dimension_numbers<[1], [0], [0], [1], [0, 0, 1, 1], [], []>} : vector<8x128xbf16>, vector<128x32xbf16>, vector<8x32xf32> -> vector<8x32xf32>
    %43 = arith.truncf %36 : vector<8x32xf32> to vector<8x32xbf16>
    %44 = vector.shape_cast %43 : vector<8x32xbf16> to vector<1x8x32xbf16>
    %45 = arith.truncf %39 : vector<8x32xf32> to vector<8x32xbf16>
    %46 = vector.shape_cast %45 : vector<8x32xbf16> to vector<1x8x32xbf16>
    %47 = arith.truncf %42 : vector<8x32xf32> to vector<8x32xbf16>
    %48 = vector.shape_cast %47 : vector<8x32xbf16> to vector<1x8x32xbf16>
    "tpu.trace_start"() <{level = 10 : i32, message = "bnd,bmd->bnm"}> : () -> ()
    %cst_28 = arith.constant dense<0.000000e+00> : vector<1x8x8xf32>
    %49 = tpu.matmul %44, %46, %cst_28 {dimension_numbers = #tpu.dot_dimension_numbers<[2], [2], [1], [1], [0, 0, 0, 1, 1, 1], [0], [0]>} : vector<1x8x32xbf16>, vector<1x8x32xbf16>, vector<1x8x8xf32> -> vector<1x8x8xf32>
    "tpu.trace_stop"() : () -> ()
    %cst_29 = arith.constant dense<0xFF800000> : vector<1x8xf32>
    %50 = vector.multi_reduction <maximumf>, %49, %cst_29 [2] : vector<1x8x8xf32> to vector<1x8xf32>
    %51 = vector.shape_cast %50 : vector<1x8xf32> to vector<1x8x1xf32>
    %52 = vector.broadcast %51 : vector<1x8x1xf32> to vector<1x8x8xf32>
    %53 = arith.subf %49, %52 : vector<1x8x8xf32>
    %54 = math.exp %53 : vector<1x8x8xf32>
    %cst_30 = arith.constant dense<0.000000e+00> : vector<1x8xf32>
    %55 = vector.multi_reduction <add>, %54, %cst_30 [2] : vector<1x8x8xf32> to vector<1x8xf32>
    %56 = vector.shape_cast %55 : vector<1x8xf32> to vector<1x8x1xf32>
    %57 = tpu.reciprocal %56 {approx = true} : vector<1x8x1xf32> -> vector<1x8x1xf32>
    %58 = vector.broadcast %57 : vector<1x8x1xf32> to vector<1x8x8xf32>
    %59 = arith.mulf %54, %58 : vector<1x8x8xf32>
    %60 = arith.truncf %59 : vector<1x8x8xf32> to vector<1x8x8xbf16>
    "tpu.trace_start"() <{level = 10 : i32, message = "bnm,bmd->bnd"}> : () -> ()
    %cst_31 = arith.constant dense<0.000000e+00> : vector<1x8x32xf32>
    %61 = tpu.matmul %60, %48, %cst_31 {dimension_numbers = #tpu.dot_dimension_numbers<[2], [1], [1], [2], [0, 0, 0, 1, 1, 2], [0], [0]>} : vector<1x8x8xbf16>, vector<1x8x32xbf16>, vector<1x8x32xf32> -> vector<1x8x32xf32>
    "tpu.trace_stop"() : () -> ()
    %62 = vector.shape_cast %61 : vector<1x8x32xf32> to vector<8x32xf32>
    %c0_32 = arith.constant 0 : index
    %c0_33 = arith.constant 0 : index
    %63 = vector.load %arg20[%c0_32, %c0_33] : memref<8x128xf32, #tpu.memory_space<vmem>>, vector<8x32xf32>
    tpu.vector_store %arg20[%c0_32, %c0_33], %62 {strides = array<i32>} : memref<8x128xf32, #tpu.memory_space<vmem>>, vector<8x32xf32>,
    %c1 = arith.constant 1 : index
    %c0_34 = arith.constant 0 : index
    %c0_35 = arith.constant 0 : index
    %64 = vector.load %arg7[%c1, %c0_34, %c0_35] : memref<4x128x32xbf16, #tpu.memory_space<vmem>>, vector<1x128x32xbf16>
    %65 = vector.shape_cast %64 : vector<1x128x32xbf16> to vector<128x32xbf16>
    %cst_36 = arith.constant dense<0.000000e+00> : vector<8x32xf32>
    %66 = tpu.matmul %33, %65, %cst_36 {dimension_numbers = #tpu.dot_dimension_numbers<[1], [0], [0], [1], [0, 0, 1, 1], [], []>} : vector<8x128xbf16>, vector<128x32xbf16>, vector<8x32xf32> -> vector<8x32xf32>
    %c1_37 = arith.constant 1 : index
    %c0_38 = arith.constant 0 : index
    %c0_39 = arith.constant 0 : index
    %67 = vector.load %arg8[%c1_37, %c0_38, %c0_39] : memref<4x128x32xbf16, #tpu.memory_space<vmem>>, vector<1x128x32xbf16>
    %68 = vector.shape_cast %67 : vector<1x128x32xbf16> to vector<128x32xbf16>
    %cst_40 = arith.constant dense<0.000000e+00> : vector<8x32xf32>
    %69 = tpu.matmul %33, %68, %cst_40 {dimension_numbers = #tpu.dot_dimension_numbers<[1], [0], [0], [1], [0, 0, 1, 1], [], []>} : vector<8x128xbf16>, vector<128x32xbf16>, vector<8x32xf32> -> vector<8x32xf32>
    %c1_41 = arith.constant 1 : index
    %c0_42 = arith.constant 0 : index
    %c0_43 = arith.constant 0 : index
    %70 = vector.load %arg9[%c1_41, %c0_42, %c0_43] : memref<4x128x32xbf16, #tpu.memory_space<vmem>>, vector<1x128x32xbf16>
    %71 = vector.shape_cast %70 : vector<1x128x32xbf16> to vector<128x32xbf16>
    %cst_44 = arith.constant dense<0.000000e+00> : vector<8x32xf32>
    %72 = tpu.matmul %33, %71, %cst_44 {dimension_numbers = #tpu.dot_dimension_numbers<[1], [0], [0], [1], [0, 0, 1, 1], [], []>} : vector<8x128xbf16>, vector<128x32xbf16>, vector<8x32xf32> -> vector<8x32xf32>
    %73 = arith.truncf %66 : vector<8x32xf32> to vector<8x32xbf16>
    %74 = vector.shape_cast %73 : vector<8x32xbf16> to vector<1x8x32xbf16>
    %75 = arith.truncf %69 : vector<8x32xf32> to vector<8x32xbf16>
    %76 = vector.shape_cast %75 : vector<8x32xbf16> to vector<1x8x32xbf16>
    %77 = arith.truncf %72 : vector<8x32xf32> to vector<8x32xbf16>
    %78 = vector.shape_cast %77 : vector<8x32xbf16> to vector<1x8x32xbf16>
    "tpu.trace_start"() <{level = 10 : i32, message = "bnd,bmd->bnm"}> : () -> ()
    %cst_45 = arith.constant dense<0.000000e+00> : vector<1x8x8xf32>
    %79 = tpu.matmul %74, %76, %cst_45 {dimension_numbers = #tpu.dot_dimension_numbers<[2], [2], [1], [1], [0, 0, 0, 1, 1, 1], [0], [0]>} : vector<1x8x32xbf16>, vector<1x8x32xbf16>, vector<1x8x8xf32> -> vector<1x8x8xf32>
    "tpu.trace_stop"() : () -> ()
    %cst_46 = arith.constant dense<0xFF800000> : vector<1x8xf32>
    %80 = vector.multi_reduction <maximumf>, %79, %cst_46 [2] : vector<1x8x8xf32> to vector<1x8xf32>
    %81 = vector.shape_cast %80 : vector<1x8xf32> to vector<1x8x1xf32>
    %82 = vector.broadcast %81 : vector<1x8x1xf32> to vector<1x8x8xf32>
    %83 = arith.subf %79, %82 : vector<1x8x8xf32>
    %84 = math.exp %83 : vector<1x8x8xf32>
    %cst_47 = arith.constant dense<0.000000e+00> : vector<1x8xf32>
    %85 = vector.multi_reduction <add>, %84, %cst_47 [2] : vector<1x8x8xf32> to vector<1x8xf32>
    %86 = vector.shape_cast %85 : vector<1x8xf32> to vector<1x8x1xf32>
    %87 = tpu.reciprocal %86 {approx = true} : vector<1x8x1xf32> -> vector<1x8x1xf32>
    %88 = vector.broadcast %87 : vector<1x8x1xf32> to vector<1x8x8xf32>
    %89 = arith.mulf %84, %88 : vector<1x8x8xf32>
    %90 = arith.truncf %89 : vector<1x8x8xf32> to vector<1x8x8xbf16>
    "tpu.trace_start"() <{level = 10 : i32, message = "bnm,bmd->bnd"}> : () -> ()
    %cst_48 = arith.constant dense<0.000000e+00> : vector<1x8x32xf32>
    %91 = tpu.matmul %90, %78, %cst_48 {dimension_numbers = #tpu.dot_dimension_numbers<[2], [1], [1], [2], [0, 0, 0, 1, 1, 2], [0], [0]>} : vector<1x8x8xbf16>, vector<1x8x32xbf16>, vector<1x8x32xf32> -> vector<1x8x32xf32>
    "tpu.trace_stop"() : () -> ()
    %92 = vector.shape_cast %91 : vector<1x8x32xf32> to vector<8x32xf32>
    %c0_49 = arith.constant 0 : index
    %c32 = arith.constant 32 : index
    %93 = vector.load %arg20[%c0_49, %c32] : memref<8x128xf32, #tpu.memory_space<vmem>>, vector<8x32xf32>
    tpu.vector_store %arg20[%c0_49, %c32], %92 {strides = array<i32>} : memref<8x128xf32, #tpu.memory_space<vmem>>, vector<8x32xf32>,
    %c2 = arith.constant 2 : index
    %c0_50 = arith.constant 0 : index
    %c0_51 = arith.constant 0 : index
    %94 = vector.load %arg7[%c2, %c0_50, %c0_51] : memref<4x128x32xbf16, #tpu.memory_space<vmem>>, vector<1x128x32xbf16>
    %95 = vector.shape_cast %94 : vector<1x128x32xbf16> to vector<128x32xbf16>
    %cst_52 = arith.constant dense<0.000000e+00> : vector<8x32xf32>
    %96 = tpu.matmul %33, %95, %cst_52 {dimension_numbers = #tpu.dot_dimension_numbers<[1], [0], [0], [1], [0, 0, 1, 1], [], []>} : vector<8x128xbf16>, vector<128x32xbf16>, vector<8x32xf32> -> vector<8x32xf32>
    %c2_53 = arith.constant 2 : index
    %c0_54 = arith.constant 0 : index
    %c0_55 = arith.constant 0 : index
    %97 = vector.load %arg8[%c2_53, %c0_54, %c0_55] : memref<4x128x32xbf16, #tpu.memory_space<vmem>>, vector<1x128x32xbf16>
    %98 = vector.shape_cast %97 : vector<1x128x32xbf16> to vector<128x32xbf16>
    %cst_56 = arith.constant dense<0.000000e+00> : vector<8x32xf32>
    %99 = tpu.matmul %33, %98, %cst_56 {dimension_numbers = #tpu.dot_dimension_numbers<[1], [0], [0], [1], [0, 0, 1, 1], [], []>} : vector<8x128xbf16>, vector<128x32xbf16>, vector<8x32xf32> -> vector<8x32xf32>
    %c2_57 = arith.constant 2 : index
    %c0_58 = arith.constant 0 : index
    %c0_59 = arith.constant 0 : index
    %100 = vector.load %arg9[%c2_57, %c0_58, %c0_59] : memref<4x128x32xbf16, #tpu.memory_space<vmem>>, vector<1x128x32xbf16>
    %101 = vector.shape_cast %100 : vector<1x128x32xbf16> to vector<128x32xbf16>
    %cst_60 = arith.constant dense<0.000000e+00> : vector<8x32xf32>
    %102 = tpu.matmul %33, %101, %cst_60 {dimension_numbers = #tpu.dot_dimension_numbers<[1], [0], [0], [1], [0, 0, 1, 1], [], []>} : vector<8x128xbf16>, vector<128x32xbf16>, vector<8x32xf32> -> vector<8x32xf32>
    %103 = arith.truncf %96 : vector<8x32xf32> to vector<8x32xbf16>
    %104 = vector.shape_cast %103 : vector<8x32xbf16> to vector<1x8x32xbf16>
    %105 = arith.truncf %99 : vector<8x32xf32> to vector<8x32xbf16>
    %106 = vector.shape_cast %105 : vector<8x32xbf16> to vector<1x8x32xbf16>
    %107 = arith.truncf %102 : vector<8x32xf32> to vector<8x32xbf16>
    %108 = vector.shape_cast %107 : vector<8x32xbf16> to vector<1x8x32xbf16>
    "tpu.trace_start"() <{level = 10 : i32, message = "bnd,bmd->bnm"}> : () -> ()
    %cst_61 = arith.constant dense<0.000000e+00> : vector<1x8x8xf32>
    %109 = tpu.matmul %104, %106, %cst_61 {dimension_numbers = #tpu.dot_dimension_numbers<[2], [2], [1], [1], [0, 0, 0, 1, 1, 1], [0], [0]>} : vector<1x8x32xbf16>, vector<1x8x32xbf16>, vector<1x8x8xf32> -> vector<1x8x8xf32>
    "tpu.trace_stop"() : () -> ()
    %cst_62 = arith.constant dense<0xFF800000> : vector<1x8xf32>
    %110 = vector.multi_reduction <maximumf>, %109, %cst_62 [2] : vector<1x8x8xf32> to vector<1x8xf32>
    %111 = vector.shape_cast %110 : vector<1x8xf32> to vector<1x8x1xf32>
    %112 = vector.broadcast %111 : vector<1x8x1xf32> to vector<1x8x8xf32>
    %113 = arith.subf %109, %112 : vector<1x8x8xf32>
    %114 = math.exp %113 : vector<1x8x8xf32>
    %cst_63 = arith.constant dense<0.000000e+00> : vector<1x8xf32>
    %115 = vector.multi_reduction <add>, %114, %cst_63 [2] : vector<1x8x8xf32> to vector<1x8xf32>
    %116 = vector.shape_cast %115 : vector<1x8xf32> to vector<1x8x1xf32>
    %117 = tpu.reciprocal %116 {approx = true} : vector<1x8x1xf32> -> vector<1x8x1xf32>
    %118 = vector.broadcast %117 : vector<1x8x1xf32> to vector<1x8x8xf32>
    %119 = arith.mulf %114, %118 : vector<1x8x8xf32>
    %120 = arith.truncf %119 : vector<1x8x8xf32> to vector<1x8x8xbf16>
    "tpu.trace_start"() <{level = 10 : i32, message = "bnm,bmd->bnd"}> : () -> ()
    %cst_64 = arith.constant dense<0.000000e+00> : vector<1x8x32xf32>
    %121 = tpu.matmul %120, %108, %cst_64 {dimension_numbers = #tpu.dot_dimension_numbers<[2], [1], [1], [2], [0, 0, 0, 1, 1, 2], [0], [0]>} : vector<1x8x8xbf16>, vector<1x8x32xbf16>, vector<1x8x32xf32> -> vector<1x8x32xf32>
    "tpu.trace_stop"() : () -> ()
    %122 = vector.shape_cast %121 : vector<1x8x32xf32> to vector<8x32xf32>
    %c0_65 = arith.constant 0 : index
    %c64 = arith.constant 64 : index
    %123 = vector.load %arg20[%c0_65, %c64] : memref<8x128xf32, #tpu.memory_space<vmem>>, vector<8x32xf32>
    tpu.vector_store %arg20[%c0_65, %c64], %122 {strides = array<i32>} : memref<8x128xf32, #tpu.memory_space<vmem>>, vector<8x32xf32>,
    %c3 = arith.constant 3 : index
    %c0_66 = arith.constant 0 : index
    %c0_67 = arith.constant 0 : index
    %124 = vector.load %arg7[%c3, %c0_66, %c0_67] : memref<4x128x32xbf16, #tpu.memory_space<vmem>>, vector<1x128x32xbf16>
    %125 = vector.shape_cast %124 : vector<1x128x32xbf16> to vector<128x32xbf16>
    %cst_68 = arith.constant dense<0.000000e+00> : vector<8x32xf32>
    %126 = tpu.matmul %33, %125, %cst_68 {dimension_numbers = #tpu.dot_dimension_numbers<[1], [0], [0], [1], [0, 0, 1, 1], [], []>} : vector<8x128xbf16>, vector<128x32xbf16>, vector<8x32xf32> -> vector<8x32xf32>
    %c3_69 = arith.constant 3 : index
    %c0_70 = arith.constant 0 : index
    %c0_71 = arith.constant 0 : index
    %127 = vector.load %arg8[%c3_69, %c0_70, %c0_71] : memref<4x128x32xbf16, #tpu.memory_space<vmem>>, vector<1x128x32xbf16>
    %128 = vector.shape_cast %127 : vector<1x128x32xbf16> to vector<128x32xbf16>
    %cst_72 = arith.constant dense<0.000000e+00> : vector<8x32xf32>
    %129 = tpu.matmul %33, %128, %cst_72 {dimension_numbers = #tpu.dot_dimension_numbers<[1], [0], [0], [1], [0, 0, 1, 1], [], []>} : vector<8x128xbf16>, vector<128x32xbf16>, vector<8x32xf32> -> vector<8x32xf32>
    %c3_73 = arith.constant 3 : index
    %c0_74 = arith.constant 0 : index
    %c0_75 = arith.constant 0 : index
    %130 = vector.load %arg9[%c3_73, %c0_74, %c0_75] : memref<4x128x32xbf16, #tpu.memory_space<vmem>>, vector<1x128x32xbf16>
    %131 = vector.shape_cast %130 : vector<1x128x32xbf16> to vector<128x32xbf16>
    %cst_76 = arith.constant dense<0.000000e+00> : vector<8x32xf32>
    %132 = tpu.matmul %33, %131, %cst_76 {dimension_numbers = #tpu.dot_dimension_numbers<[1], [0], [0], [1], [0, 0, 1, 1], [], []>} : vector<8x128xbf16>, vector<128x32xbf16>, vector<8x32xf32> -> vector<8x32xf32>
    %133 = arith.truncf %126 : vector<8x32xf32> to vector<8x32xbf16>
    %134 = vector.shape_cast %133 : vector<8x32xbf16> to vector<1x8x32xbf16>
    %135 = arith.truncf %129 : vector<8x32xf32> to vector<8x32xbf16>
    %136 = vector.shape_cast %135 : vector<8x32xbf16> to vector<1x8x32xbf16>
    %137 = arith.truncf %132 : vector<8x32xf32> to vector<8x32xbf16>
    %138 = vector.shape_cast %137 : vector<8x32xbf16> to vector<1x8x32xbf16>
    "tpu.trace_start"() <{level = 10 : i32, message = "bnd,bmd->bnm"}> : () -> ()
    %cst_77 = arith.constant dense<0.000000e+00> : vector<1x8x8xf32>
    %139 = tpu.matmul %134, %136, %cst_77 {dimension_numbers = #tpu.dot_dimension_numbers<[2], [2], [1], [1], [0, 0, 0, 1, 1, 1], [0], [0]>} : vector<1x8x32xbf16>, vector<1x8x32xbf16>, vector<1x8x8xf32> -> vector<1x8x8xf32>
    "tpu.trace_stop"() : () -> ()
    %cst_78 = arith.constant dense<0xFF800000> : vector<1x8xf32>
    %140 = vector.multi_reduction <maximumf>, %139, %cst_78 [2] : vector<1x8x8xf32> to vector<1x8xf32>
    %141 = vector.shape_cast %140 : vector<1x8xf32> to vector<1x8x1xf32>
    %142 = vector.broadcast %141 : vector<1x8x1xf32> to vector<1x8x8xf32>
    %143 = arith.subf %139, %142 : vector<1x8x8xf32>
    %144 = math.exp %143 : vector<1x8x8xf32>
    %cst_79 = arith.constant dense<0.000000e+00> : vector<1x8xf32>
    %145 = vector.multi_reduction <add>, %144, %cst_79 [2] : vector<1x8x8xf32> to vector<1x8xf32>
    %146 = vector.shape_cast %145 : vector<1x8xf32> to vector<1x8x1xf32>
    %147 = tpu.reciprocal %146 {approx = true} : vector<1x8x1xf32> -> vector<1x8x1xf32>
    %148 = vector.broadcast %147 : vector<1x8x1xf32> to vector<1x8x8xf32>
    %149 = arith.mulf %144, %148 : vector<1x8x8xf32>
    %150 = arith.truncf %149 : vector<1x8x8xf32> to vector<1x8x8xbf16>
    "tpu.trace_start"() <{level = 10 : i32, message = "bnm,bmd->bnd"}> : () -> ()
    %cst_80 = arith.constant dense<0.000000e+00> : vector<1x8x32xf32>
    %151 = tpu.matmul %150, %138, %cst_80 {dimension_numbers = #tpu.dot_dimension_numbers<[2], [1], [1], [2], [0, 0, 0, 1, 1, 2], [0], [0]>} : vector<1x8x8xbf16>, vector<1x8x32xbf16>, vector<1x8x32xf32> -> vector<1x8x32xf32>
    "tpu.trace_stop"() : () -> ()
    %152 = vector.shape_cast %151 : vector<1x8x32xf32> to vector<8x32xf32>
    %c0_81 = arith.constant 0 : index
    %c96 = arith.constant 96 : index
    %153 = vector.load %arg20[%c0_81, %c96] : memref<8x128xf32, #tpu.memory_space<vmem>>, vector<8x32xf32>
    tpu.vector_store %arg20[%c0_81, %c96], %152 {strides = array<i32>} : memref<8x128xf32, #tpu.memory_space<vmem>>, vector<8x32xf32>,
    %c0_82 = arith.constant 0 : index
    %c0_83 = arith.constant 0 : index
    %154 = vector.load %arg20[%c0_82, %c0_83] : memref<8x128xf32, #tpu.memory_space<vmem>>, vector<8x128xf32>
    %155 = arith.truncf %154 : vector<8x128xf32> to vector<8x128xbf16>
    %c0_84 = arith.constant 0 : index
    %c0_85 = arith.constant 0 : index
    %156 = vector.load %arg10[%c0_84, %c0_85] : memref<128x128xbf16, #tpu.memory_space<vmem>>, vector<128x128xbf16>
    %cst_86 = arith.constant dense<0.000000e+00> : vector<8x128xf32>
    %157 = tpu.matmul %155, %156, %cst_86 {dimension_numbers = #tpu.dot_dimension_numbers<[1], [0], [0], [1], [0, 0, 1, 1], [], []>} : vector<8x128xbf16>, vector<128x128xbf16>, vector<8x128xf32> -> vector<8x128xf32>
    %158 = arith.addf %4, %157 : vector<8x128xf32>
    %c0_87 = arith.constant 0 : index
    %c0_88 = arith.constant 0 : index
    %159 = vector.load %arg11[%c0_87, %c0_88] : memref<1x128xf32, #tpu.memory_space<vmem>>, vector<1x128xf32>
    %160 = vector.broadcast %159 : vector<1x128xf32> to vector<8x128xf32>
    %161 = arith.addf %158, %160 : vector<8x128xf32>
    %c0_89 = arith.constant 0 : index
    %c0_90 = arith.constant 0 : index
    %c0_91 = arith.constant 0 : index
    %162 = vector.load %arg4[%c0_89, %c0_90, %c0_91] : memref<1x1x128xf32, #tpu.memory_space<vmem>>, vector<1x1x128xf32>
    %c0_92 = arith.constant 0 : index
    %c0_93 = arith.constant 0 : index
    %c0_94 = arith.constant 0 : index
    %163 = vector.load %arg5[%c0_92, %c0_93, %c0_94] : memref<1x1x128xf32, #tpu.memory_space<vmem>>, vector<1x1x128xf32>
    %cst_95 = arith.constant dense<0.000000e+00> : vector<8xf32>
    %164 = vector.multi_reduction <add>, %161, %cst_95 [1] : vector<8x128xf32> to vector<8xf32>
    %165 = vector.shape_cast %164 : vector<8xf32> to vector<8x1xf32>
    %cst_96 = arith.constant 1.280000e+02 : f32
    %166 = vector.broadcast %cst_96 : f32 to vector<8x1xf32>
    %167 = arith.divf %165, %166 : vector<8x1xf32>
    %168 = vector.broadcast %167 : vector<8x1xf32> to vector<8x128xf32>
    %169 = arith.subf %161, %168 : vector<8x128xf32>
    %170 = arith.mulf %169, %169 : vector<8x128xf32>
    %cst_97 = arith.constant dense<0.000000e+00> : vector<8xf32>
    %171 = vector.multi_reduction <add>, %170, %cst_97 [1] : vector<8x128xf32> to vector<8xf32>
    %172 = vector.shape_cast %171 : vector<8xf32> to vector<8x1xf32>
    %cst_98 = arith.constant 1.280000e+02 : f32
    %173 = vector.broadcast %cst_98 : f32 to vector<8x1xf32>
    %174 = arith.divf %172, %173 : vector<8x1xf32>
    %175 = vector.broadcast %167 : vector<8x1xf32> to vector<8x128xf32>
    %176 = arith.subf %161, %175 : vector<8x128xf32>
    %cst_99 = arith.constant 9.99999974E-6 : f32
    %177 = vector.broadcast %cst_99 : f32 to vector<8x1xf32>
    %178 = arith.addf %174, %177 : vector<8x1xf32>
    %179 = math.rsqrt %178 : vector<8x1xf32>
    %180 = vector.broadcast %179 : vector<8x1xf32> to vector<8x128xf32>
    %181 = arith.mulf %176, %180 : vector<8x128xf32>
    %182 = vector.shape_cast %181 : vector<8x128xf32> to vector<1x8x128xf32>
    %cst_100 = arith.constant 1.000000e+00 : f32
    %183 = vector.broadcast %cst_100 : f32 to vector<1x1x128xf32>
    %184 = arith.addf %183, %162 : vector<1x1x128xf32>
    %185 = vector.broadcast %184 : vector<1x1x128xf32> to vector<1x8x128xf32>
    %186 = arith.mulf %182, %185 : vector<1x8x128xf32>
    %187 = vector.broadcast %163 : vector<1x1x128xf32> to vector<1x8x128xf32>
    %188 = arith.addf %186, %187 : vector<1x8x128xf32>
    %189 = vector.shape_cast %188 : vector<1x8x128xf32> to vector<8x128xf32>
    %190 = arith.truncf %189 : vector<8x128xf32> to vector<8x128xbf16>
    %cst_101 = arith.constant 0.000000e+00 : f32
    %191 = vector.broadcast %cst_101 : f32 to vector<8x128xf32>
    %c0_i32 = arith.constant 0 : i32
    %c4_i32 = arith.constant 4 : i32
    %192 = arith.addi %c0_i32, %c4_i32 : i32
    %c1_i32 = arith.constant 1 : i32
    %193 = scf.for %arg21 = %c0_i32 to %192 step %c1_i32 iter_args(%arg22 = %191) -> (vector<8x128xf32>)  : i32 {
      %203 = arith.index_cast %arg21 : i32 to index
      %c0_111 = arith.constant 0 : index
      %c0_112 = arith.constant 0 : index
      %204 = vector.load %arg12[%203, %c0_111, %c0_112] : memref<4x128x128xbf16, #tpu.memory_space<vmem>>, vector<1x128x128xbf16>
      %205 = vector.shape_cast %204 : vector<1x128x128xbf16> to vector<128x128xbf16>
      %cst_113 = arith.constant dense<0.000000e+00> : vector<8x128xf32>
      %206 = tpu.matmul %190, %205, %cst_113 {dimension_numbers = #tpu.dot_dimension_numbers<[1], [0], [0], [1], [0, 0, 1, 1], [], []>} : vector<8x128xbf16>, vector<128x128xbf16>, vector<8x128xf32> -> vector<8x128xf32>
      %207 = arith.index_cast %arg21 : i32 to index
      %c0_114 = arith.constant 0 : index
      %c0_115 = arith.constant 0 : index
      %208 = vector.load %arg13[%207, %c0_114, %c0_115] : memref<4x1x128xf32, #tpu.memory_space<vmem>>, vector<1x1x128xf32>
      %209 = vector.shape_cast %208 : vector<1x1x128xf32> to vector<1x128xf32>
      %210 = vector.broadcast %209 : vector<1x128xf32> to vector<8x128xf32>
      %211 = arith.addf %206, %210 : vector<8x128xf32>
      %212 = arith.index_cast %arg21 : i32 to index
      %c0_116 = arith.constant 0 : index
      %c0_117 = arith.constant 0 : index
      %213 = vector.load %arg14[%212, %c0_116, %c0_117] : memref<4x128x128xbf16, #tpu.memory_space<vmem>>, vector<1x128x128xbf16>
      %214 = vector.shape_cast %213 : vector<1x128x128xbf16> to vector<128x128xbf16>
      %cst_118 = arith.constant dense<0.000000e+00> : vector<8x128xf32>
      %215 = tpu.matmul %190, %214, %cst_118 {dimension_numbers = #tpu.dot_dimension_numbers<[1], [0], [0], [1], [0, 0, 1, 1], [], []>} : vector<8x128xbf16>, vector<128x128xbf16>, vector<8x128xf32> -> vector<8x128xf32>
      %216 = arith.index_cast %arg21 : i32 to index
      %c0_119 = arith.constant 0 : index
      %c0_120 = arith.constant 0 : index
      %217 = vector.load %arg15[%216, %c0_119, %c0_120] : memref<4x1x128xf32, #tpu.memory_space<vmem>>, vector<1x1x128xf32>
      %218 = vector.shape_cast %217 : vector<1x1x128xf32> to vector<1x128xf32>
      %219 = vector.broadcast %218 : vector<1x128xf32> to vector<8x128xf32>
      %220 = arith.addf %215, %219 : vector<8x128xf32>
      %cst_121 = arith.constant 5.000000e-01 : f32
      %221 = vector.broadcast %cst_121 : f32 to vector<8x128xf32>
      %222 = arith.mulf %221, %220 : vector<8x128xf32>
      %cst_122 = arith.constant 0.707106769 : f32
      %223 = vector.broadcast %cst_122 : f32 to vector<8x128xf32>
      %224 = arith.mulf %220, %223 : vector<8x128xf32>
      %225 = math.erf %224 : vector<8x128xf32>
      %cst_123 = arith.constant 1.000000e+00 : f32
      %226 = vector.broadcast %cst_123 : f32 to vector<8x128xf32>
      %227 = arith.addf %226, %225 : vector<8x128xf32>
      %228 = arith.mulf %222, %227 : vector<8x128xf32>
      %229 = arith.mulf %211, %228 : vector<8x128xf32>
      %230 = arith.truncf %229 : vector<8x128xf32> to vector<8x128xbf16>
      %231 = arith.index_cast %arg21 : i32 to index
      %c0_124 = arith.constant 0 : index
      %c0_125 = arith.constant 0 : index
      %232 = vector.load %arg16[%231, %c0_124, %c0_125] : memref<4x128x128xbf16, #tpu.memory_space<vmem>>, vector<1x128x128xbf16>
      %233 = vector.shape_cast %232 : vector<1x128x128xbf16> to vector<128x128xbf16>
      %cst_126 = arith.constant dense<0.000000e+00> : vector<8x128xf32>
      %234 = tpu.matmul %230, %233, %cst_126 {dimension_numbers = #tpu.dot_dimension_numbers<[1], [0], [0], [1], [0, 0, 1, 1], [], []>} : vector<8x128xbf16>, vector<128x128xbf16>, vector<8x128xf32> -> vector<8x128xf32>
      %235 = arith.addf %arg22, %234 : vector<8x128xf32>
      scf.yield %235 : vector<8x128xf32>
    }
    %c4_i32_102 = arith.constant 4 : i32
    %194 = arith.addf %161, %193 : vector<8x128xf32>
    %c0_103 = arith.constant 0 : index
    %c0_104 = arith.constant 0 : index
    %195 = vector.load %arg17[%c0_103, %c0_104] : memref<1x128xf32, #tpu.memory_space<vmem>>, vector<1x128xf32>
    %196 = vector.broadcast %195 : vector<1x128xf32> to vector<8x128xf32>
    %197 = arith.addf %194, %196 : vector<8x128xf32>
    %198 = arith.truncf %197 : vector<8x128xf32> to vector<8x128xbf16>
    %c0_105 = arith.constant 0 : index
    %c0_106 = arith.constant 0 : index
    %199 = vector.load %arg18[%c0_105, %c0_106] : memref<128x128xbf16, #tpu.memory_space<vmem>>, vector<128x128xbf16>
    %cst_107 = arith.constant dense<0.000000e+00> : vector<8x128xf32>
    %200 = tpu.matmul %198, %199, %cst_107 {dimension_numbers = #tpu.dot_dimension_numbers<[1], [0], [0], [1], [0, 0, 1, 1], [], []>} : vector<8x128xbf16>, vector<128x128xbf16>, vector<8x128xf32> -> vector<8x128xf32>
    %201 = vector.shape_cast %200 : vector<8x128xf32> to vector<1x8x128xf32>
    %c0_108 = arith.constant 0 : index
    %c0_109 = arith.constant 0 : index
    %c0_110 = arith.constant 0 : index
    %202 = vector.load %arg19[%c0_108, %c0_109, %c0_110] : memref<1x8x128xf32, #tpu.memory_space<vmem>>, vector<1x8x128xf32>
    tpu.vector_store %arg19[%c0_108, %c0_109, %c0_110], %201 {strides = array<i32>} : memref<1x8x128xf32, #tpu.memory_space<vmem>>, vector<1x8x128xf32>,
    return
  }
  func.func @transform_0(%arg0: i32) -> (i32, i32, i32) {
    %c0_i32 = arith.constant 0 : i32
    %c0_i32_0 = arith.constant 0 : i32
    %c0_i32_1 = arith.constant 0 : i32
    return %arg0, %c0_i32, %c0_i32_0 : i32, i32, i32
  }
  func.func @transform_1(%arg0: i32) -> (i32, i32, i32) {
    %c0_i32 = arith.constant 0 : i32
    %c0_i32_0 = arith.constant 0 : i32
    %c0_i32_1 = arith.constant 0 : i32
    return %arg0, %c0_i32, %c0_i32_0 : i32, i32, i32
  }
  func.func @transform_2(%arg0: i32) -> (i32, i32, i32) {
    %c0_i32 = arith.constant 0 : i32
    %c0_i32_0 = arith.constant 0 : i32
    %c0_i32_1 = arith.constant 0 : i32
    return %arg0, %c0_i32, %c0_i32_0 : i32, i32, i32
  }
  func.func @transform_3(%arg0: i32) -> (i32, i32, i32) {
    %c0_i32 = arith.constant 0 : i32
    %c0_i32_0 = arith.constant 0 : i32
    %c0_i32_1 = arith.constant 0 : i32
    return %arg0, %c0_i32, %c0_i32_0 : i32, i32, i32
  }
  func.func @transform_4(%arg0: i32) -> (i32, i32, i32) {
    %c0_i32 = arith.constant 0 : i32
    %c0_i32_0 = arith.constant 0 : i32
    %c0_i32_1 = arith.constant 0 : i32
    return %arg0, %c0_i32, %c0_i32_0 : i32, i32, i32
  }
  func.func @transform_5(%arg0: i32) -> (i32, i32) {
    %c0_i32 = arith.constant 0 : i32
    %c0_i32_0 = arith.constant 0 : i32
    %c0_i32_1 = arith.constant 0 : i32
    return %c0_i32, %c0_i32_0 : i32, i32
  }
  func.func @transform_6(%arg0: i32) -> (i32, i32, i32) {
    %c0_i32 = arith.constant 0 : i32
    %c0_i32_0 = arith.constant 0 : i32
    %c0_i32_1 = arith.constant 0 : i32
    %c0_i32_2 = arith.constant 0 : i32
    return %c0_i32, %c0_i32_0, %c0_i32_1 : i32, i32, i32
  }
  func.func @transform_7(%arg0: i32) -> (i32, i32, i32) {
    %c0_i32 = arith.constant 0 : i32
    %c0_i32_0 = arith.constant 0 : i32
    %c0_i32_1 = arith.constant 0 : i32
    %c0_i32_2 = arith.constant 0 : i32
    return %c0_i32, %c0_i32_0, %c0_i32_1 : i32, i32, i32
  }
  func.func @transform_8(%arg0: i32) -> (i32, i32, i32) {
    %c0_i32 = arith.constant 0 : i32
    %c0_i32_0 = arith.constant 0 : i32
    %c0_i32_1 = arith.constant 0 : i32
    %c0_i32_2 = arith.constant 0 : i32
    return %c0_i32, %c0_i32_0, %c0_i32_1 : i32, i32, i32
  }
  func.func @transform_9(%arg0: i32) -> (i32, i32) {
    %c0_i32 = arith.constant 0 : i32
    %c0_i32_0 = arith.constant 0 : i32
    %c0_i32_1 = arith.constant 0 : i32
    return %c0_i32, %c0_i32_0 : i32, i32
  }
  func.func @transform_10(%arg0: i32) -> (i32, i32) {
    %c0_i32 = arith.constant 0 : i32
    %c0_i32_0 = arith.constant 0 : i32
    %c0_i32_1 = arith.constant 0 : i32
    return %c0_i32, %c0_i32_0 : i32, i32
  }
  func.func @transform_11(%arg0: i32) -> (i32, i32, i32) {
    %c0_i32 = arith.constant 0 : i32
    %c0_i32_0 = arith.constant 0 : i32
    %c0_i32_1 = arith.constant 0 : i32
    %c0_i32_2 = arith.constant 0 : i32
    return %c0_i32, %c0_i32_0, %c0_i32_1 : i32, i32, i32
  }
  func.func @transform_12(%arg0: i32) -> (i32, i32, i32) {
    %c0_i32 = arith.constant 0 : i32
    %c0_i32_0 = arith.constant 0 : i32
    %c0_i32_1 = arith.constant 0 : i32
    %c0_i32_2 = arith.constant 0 : i32
    return %c0_i32, %c0_i32_0, %c0_i32_1 : i32, i32, i32
  }
  func.func @transform_13(%arg0: i32) -> (i32, i32, i32) {
    %c0_i32 = arith.constant 0 : i32
    %c0_i32_0 = arith.constant 0 : i32
    %c0_i32_1 = arith.constant 0 : i32
    %c0_i32_2 = arith.constant 0 : i32
    return %c0_i32, %c0_i32_0, %c0_i32_1 : i32, i32, i32
  }
  func.func @transform_14(%arg0: i32) -> (i32, i32, i32) {
    %c0_i32 = arith.constant 0 : i32
    %c0_i32_0 = arith.constant 0 : i32
    %c0_i32_1 = arith.constant 0 : i32
    %c0_i32_2 = arith.constant 0 : i32
    return %c0_i32, %c0_i32_0, %c0_i32_1 : i32, i32, i32
  }
  func.func @transform_15(%arg0: i32) -> (i32, i32, i32) {
    %c0_i32 = arith.constant 0 : i32
    %c0_i32_0 = arith.constant 0 : i32
    %c0_i32_1 = arith.constant 0 : i32
    %c0_i32_2 = arith.constant 0 : i32
    return %c0_i32, %c0_i32_0, %c0_i32_1 : i32, i32, i32
  }
  func.func @transform_16(%arg0: i32) -> (i32, i32) {
    %c0_i32 = arith.constant 0 : i32
    %c0_i32_0 = arith.constant 0 : i32
    %c0_i32_1 = arith.constant 0 : i32
    return %c0_i32, %c0_i32_0 : i32, i32
  }
  func.func @transform_17(%arg0: i32) -> (i32, i32) {
    %c0_i32 = arith.constant 0 : i32
    %c0_i32_0 = arith.constant 0 : i32
    %c0_i32_1 = arith.constant 0 : i32
    return %c0_i32, %c0_i32_0 : i32, i32
  }
  func.func @transform_18(%arg0: i32) -> (i32, i32, i32) {
    %c0_i32 = arith.constant 0 : i32
    %c0_i32_0 = arith.constant 0 : i32
    %c0_i32_1 = arith.constant 0 : i32
    return %arg0, %c0_i32, %c0_i32_0 : i32, i32, i32
  }
}

module attributes {stable_mosaic.version = 11 : i64} {
  func.func @kernel(%arg0: i32, %arg1: memref<1x8x16xf32, #tpu.memory_space<vmem>>, %arg2: memref<1x1x128xf32, #tpu.memory_space<vmem>>, %arg3: memref<1x1x128xf32, #tpu.memory_space<vmem>>, %arg4: memref<1x1x128xf32, #tpu.memory_space<vmem>>, %arg5: memref<1x1x128xf32, #tpu.memory_space<vmem>>, %arg6: memref<16x128xbf16, #tpu.memory_space<vmem>>, %arg7: memref<4x128x32xbf16, #tpu.memory_space<vmem>>, %arg8: memref<4x128x32xbf16, #tpu.memory_space<vmem>>, %arg9: memref<4x128x32xbf16, #tpu.memory_space<vmem>>, %arg10: memref<128x128xbf16, #tpu.memory_space<vmem>>, %arg11: memref<1x128xf32, #tpu.memory_space<vmem>>, %arg12: memref<4x128x128xbf16, #tpu.memory_space<vmem>>, %arg13: memref<4x1x128xf32, #tpu.memory_space<vmem>>, %arg14: memref<4x128x128xbf16, #tpu.memory_space<vmem>>, %arg15: memref<4x1x128xf32, #tpu.memory_space<vmem>>, %arg16: memref<4x128x128xbf16, #tpu.memory_space<vmem>>, %arg17: memref<1x128xf32, #tpu.memory_space<vmem>>, %arg18: memref<128x128xbf16, #tpu.memory_space<vmem>>, %arg19: memref<1x8x128xf32, #tpu.memory_space<vmem>>, %arg20: memref<8x128xf32, #tpu.memory_space<vmem>>) attributes {dimension_semantics = [#tpu.dimension_semantics<parallel>], iteration_bounds = array<i64: 2>, scalar_prefetch = 0 : i64, scratch_operands = 1 : i64, tpu.core_type = #tpu.core_type<tc>, window_params = [{transform_indices = @transform_0, window_bounds = array<i64: 1, 8, 16>}, {transform_indices = @transform_1, window_bounds = array<i64: 1, 1, 128>}, {transform_indices = @transform_2, window_bounds = array<i64: 1, 1, 128>}, {transform_indices = @transform_3, window_bounds = array<i64: 1, 1, 128>}, {transform_indices = @transform_4, window_bounds = array<i64: 1, 1, 128>}, {pipeline_mode = #tpu.pipeline_mode<synchronous>, transform_indices = @transform_5, window_bounds = array<i64: 16, 128>}, {pipeline_mode = #tpu.pipeline_mode<synchronous>, transform_indices = @transform_6, window_bounds = array<i64: 4, 128, 32>}, {pipeline_mode = #tpu.pipeline_mode<synchronous>, transform_indices = @transform_7, window_bounds = array<i64: 4, 128, 32>}, {pipeline_mode = #tpu.pipeline_mode<synchronous>, transform_indices = @transform_8, window_bounds = array<i64: 4, 128, 32>}, {pipeline_mode = #tpu.pipeline_mode<synchronous>, transform_indices = @transform_9, window_bounds = array<i64: 128, 128>}, {pipeline_mode = #tpu.pipeline_mode<synchronous>, transform_indices = @transform_10, window_bounds = array<i64: 1, 128>}, {pipeline_mode = #tpu.pipeline_mode<synchronous>, transform_indices = @transform_11, window_bounds = array<i64: 4, 128, 128>}, {pipeline_mode = #tpu.pipeline_mode<synchronous>, transform_indices = @transform_12, window_bounds = array<i64: 4, 1, 128>}, {pipeline_mode = #tpu.pipeline_mode<synchronous>, transform_indices = @transform_13, window_bounds = array<i64: 4, 128, 128>}, {pipeline_mode = #tpu.pipeline_mode<synchronous>, transform_indices = @transform_14, window_bounds = array<i64: 4, 1, 128>}, {pipeline_mode = #tpu.pipeline_mode<synchronous>, transform_indices = @transform_15, window_bounds = array<i64: 4, 128, 128>}, {pipeline_mode = #tpu.pipeline_mode<synchronous>, transform_indices = @transform_16, window_bounds = array<i64: 1, 128>}, {pipeline_mode = #tpu.pipeline_mode<synchronous>, transform_indices = @transform_17, window_bounds = array<i64: 128, 128>}, {transform_indices = @transform_18, window_bounds = array<i64: 1, 8, 128>}]} {
    %c0 = arith.constant 0 : index
    %c0_0 = arith.constant 0 : index
    %c0_1 = arith.constant 0 : index
    %0 = vector.load %arg1[%c0, %c0_0, %c0_1] : memref<1x8x16xf32, #tpu.memory_space<vmem>>, vector<1x8x16xf32>
    %1 = vector.shape_cast %0 : vector<1x8x16xf32> to vector<8x16xf32>
    %2 = arith.truncf %1 : vector<8x16xf32> to vector<8x16xbf16>
    %c0_2 = arith.constant 0 : index
    %c0_3 = arith.constant 0 : index
    %3 = vector.load %arg6[%c0_2, %c0_3] : memref<16x128xbf16, #tpu.memory_space<vmem>>, vector<16x128xbf16>
    %cst = arith.constant dense<0.000000e+00> : vector<8x128xf32>
    %4 = tpu.matmul %2, %3, %cst {dimension_numbers = #tpu.dot_dimension_numbers<[1], [0], [0], [1], [0, 0, 1, 1], [], []>} : vector<8x16xbf16>, vector<16x128xbf16>, vector<8x128xf32> -> vector<8x128xf32>
    %c0_4 = arith.constant 0 : index
    %c0_5 = arith.constant 0 : index
    %c0_6 = arith.constant 0 : index
    %5 = vector.load %arg2[%c0_4, %c0_5, %c0_6] : memref<1x1x128xf32, #tpu.memory_space<vmem>>, vector<1x1x128xf32>
    %c0_7 = arith.constant 0 : index
    %c0_8 = arith.constant 0 : index
    %c0_9 = arith.constant 0 : index
    %6 = vector.load %arg3[%c0_7, %c0_8, %c0_9] : memref<1x1x128xf32, #tpu.memory_space<vmem>>, vector<1x1x128xf32>
    %cst_10 = arith.constant dense<0.000000e+00> : vector<8xf32>
    %7 = vector.multi_reduction <add>, %4, %cst_10 [1] : vector<8x128xf32> to vector<8xf32>
    %8 = vector.shape_cast %7 : vector<8xf32> to vector<8x1xf32>
    %cst_11 = arith.constant 1.280000e+02 : f32
    %9 = vector.broadcast %cst_11 : f32 to vector<8x1xf32>
    %10 = arith.divf %8, %9 : vector<8x1xf32>
    %11 = vector.broadcast %10 : vector<8x1xf32> to vector<8x128xf32>
    %12 = arith.subf %4, %11 : vector<8x128xf32>
    %13 = arith.mulf %12, %12 : vector<8x128xf32>
    %cst_12 = arith.constant dense<0.000000e+00> : vector<8xf32>
    %14 = vector.multi_reduction <add>, %13, %cst_12 [1] : vector<8x128xf32> to vector<8xf32>
    %15 = vector.shape_cast %14 : vector<8xf32> to vector<8x1xf32>
    %cst_13 = arith.constant 1.280000e+02 : f32
    %16 = vector.broadcast %cst_13 : f32 to vector<8x1xf32>
    %17 = arith.divf %15, %16 : vector<8x1xf32>
    %18 = vector.broadcast %10 : vector<8x1xf32> to vector<8x128xf32>
    %19 = arith.subf %4, %18 : vector<8x128xf32>
    %cst_14 = arith.constant 9.99999974E-6 : f32
    %20 = vector.broadcast %cst_14 : f32 to vector<8x1xf32>
    %21 = arith.addf %17, %20 : vector<8x1xf32>
    %22 = math.rsqrt %21 : vector<8x1xf32>
    %23 = vector.broadcast %22 : vector<8x1xf32> to vector<8x128xf32>
    %24 = arith.mulf %19, %23 : vector<8x128xf32>
    %25 = vector.shape_cast %24 : vector<8x128xf32> to vector<1x8x128xf32>
    %cst_15 = arith.constant 1.000000e+00 : f32
    %26 = vector.broadcast %cst_15 : f32 to vector<1x1x128xf32>
    %27 = arith.addf %26, %5 : vector<1x1x128xf32>
    %28 = vector.broadcast %27 : vector<1x1x128xf32> to vector<1x8x128xf32>
    %29 = arith.mulf %25, %28 : vector<1x8x128xf32>
    %30 = vector.broadcast %6 : vector<1x1x128xf32> to vector<1x8x128xf32>
    %31 = arith.addf %29, %30 : vector<1x8x128xf32>
    %32 = vector.shape_cast %31 : vector<1x8x128xf32> to vector<8x128xf32>
    %33 = arith.truncf %32 : vector<8x128xf32> to vector<8x128xbf16>
    %c0_16 = arith.constant 0 : index
    %c0_17 = arith.constant 0 : index
    %c0_18 = arith.constant 0 : index
    %34 = vector.load %arg7[%c0_16, %c0_17, %c0_18] : memref<4x128x32xbf16, #tpu.memory_space<vmem>>, vector<1x128x32xbf16>
    %35 = vector.shape_cast %34 : vector<1x128x32xbf16> to vector<128x32xbf16>
    %cst_19 = arith.constant dense<0.000000e+00> : vector<8x32xf32>
    %36 = tpu.matmul %33, %35, %cst_19 {dimension_numbers = #tpu.dot_dimension_numbers<[1], [0], [0], [1], [0, 0, 1, 1], [], []>} : vector<8x128xbf16>, vector<128x32xbf16>, vector<8x32xf32> -> vector<8x32xf32>
    %c0_20 = arith.constant 0 : index
    %c0_21 = arith.constant 0 : index
    %c0_22 = arith.constant 0 : index
    %37 = vector.load %arg8[%c0_20, %c0_21, %c0_22] : memref<4x128x32xbf16, #tpu.memory_space<vmem>>, vector<1x128x32xbf16>
    %38 = vector.shape_cast %37 : vector<1x128x32xbf16> to vector<128x32xbf16>
    %cst_23 = arith.constant dense<0.000000e+00> : vector<8x32xf32>
    %39 = tpu.matmul %33, %38, %cst_23 {dimension_numbers = #tpu.dot_dimension_numbers<[1], [0], [0], [1], [0, 0, 1, 1], [], []>} : vector<8x128xbf16>, vector<128x32xbf16>, vector<8x32xf32> -> vector<8x32xf32>
    %c0_24 = arith.constant 0 : index
    %c0_25 = arith.constant 0 : index
    %c0_26 = arith.constant 0 : index
    %40 = vector.load %arg9[%c0_24, %c0_25, %c0_26] : memref<4x128x32xbf16, #tpu.memory_space<vmem>>, vector<1x128x32xbf16>
    %41 = vector.shape_cast %40 : vector<1x128x32xbf16> to vector<128x32xbf16>
    %cst_27 = arith.constant dense<0.000000e+00> : vector<8x32xf32>
    %42 = tpu.matmul %33, %41, %cst_27 {dimension_numbers = #tpu.dot_dimension_numbers<[1], [0], [0], [1], [0, 0, 1, 1], [], []>} : vector<8x128xbf16>, vector<128x32xbf16>, vector<8x32xf32> -> vector<8x32xf32>
    %43 = arith.truncf %36 : vector<8x32xf32> to vector<8x32xbf16>
    %44 = vector.shape_cast %43 : vector<8x32xbf16> to vector<1x8x32xbf16>
    %45 = arith.truncf %39 : vector<8x32xf32> to vector<8x32xbf16>
    %46 = vector.shape_cast %45 : vector<8x32xbf16> to vector<1x8x32xbf16>
    %47 = arith.truncf %42 : vector<8x32xf32> to vector<8x32xbf16>
    %48 = vector.shape_cast %47 : vector<8x32xbf16> to vector<1x8x32xbf16>
    "tpu.trace_start"() <{level = 10 : i32, message = "bnd,bmd->bnm"}> : () -> ()
    %cst_28 = arith.constant dense<0.000000e+00> : vector<1x8x8xf32>
    %49 = tpu.matmul %44, %46, %cst_28 {dimension_numbers = #tpu.dot_dimension_numbers<[2], [2], [1], [1], [0, 0, 0, 1, 1, 1], [0], [0]>} : vector<1x8x32xbf16>, vector<1x8x32xbf16>, vector<1x8x8xf32> -> vector<1x8x8xf32>
    "tpu.trace_stop"() : () -> ()
    %cst_29 = arith.constant dense<0xFF800000> : vector<1x8xf32>
    %50 = vector.multi_reduction <maximumf>, %49, %cst_29 [2] : vector<1x8x8xf32> to vector<1x8xf32>
    %51 = vector.shape_cast %50 : vector<1x8xf32> to vector<1x8x1xf32>
    %52 = vector.broadcast %51 : vector<1x8x1xf32> to vector<1x8x8xf32>
    %53 = arith.subf %49, %52 : vector<1x8x8xf32>
    %54 = math.exp %53 : vector<1x8x8xf32>
    %cst_30 = arith.constant dense<0.000000e+00> : vector<1x8xf32>
    %55 = vector.multi_reduction <add>, %54, %cst_30 [2] : vector<1x8x8xf32> to vector<1x8xf32>
    %56 = vector.shape_cast %55 : vector<1x8xf32> to vector<1x8x1xf32>
    %57 = tpu.reciprocal %56 {approx = true} : vector<1x8x1xf32> -> vector<1x8x1xf32>
    %58 = vector.broadcast %57 : vector<1x8x1xf32> to vector<1x8x8xf32>
    %59 = arith.mulf %54, %58 : vector<1x8x8xf32>
    %60 = arith.truncf %59 : vector<1x8x8xf32> to vector<1x8x8xbf16>
    "tpu.trace_start"() <{level = 10 : i32, message = "bnm,bmd->bnd"}> : () -> ()
    %cst_31 = arith.constant dense<0.000000e+00> : vector<1x8x32xf32>
    %61 = tpu.matmul %60, %48, %cst_31 {dimension_numbers = #tpu.dot_dimension_numbers<[2], [1], [1], [2], [0, 0, 0, 1, 1, 2], [0], [0]>} : vector<1x8x8xbf16>, vector<1x8x32xbf16>, vector<1x8x32xf32> -> vector<1x8x32xf32>
    "tpu.trace_stop"() : () -> ()
    %62 = vector.shape_cast %61 : vector<1x8x32xf32> to vector<8x32xf32>
    %c0_32 = arith.constant 0 : index
    %c0_33 = arith.constant 0 : index
    %63 = vector.load %arg20[%c0_32, %c0_33] : memref<8x128xf32, #tpu.memory_space<vmem>>, vector<8x32xf32>
    tpu.vector_store %arg20[%c0_32, %c0_33], %62 {strides = array<i32>} : memref<8x128xf32, #tpu.memory_space<vmem>>, vector<8x32xf32>,
    %c1 = arith.constant 1 : index
    %c0_34 = arith.constant 0 : index
    %c0_35 = arith.constant 0 : index
    %64 = vector.load %arg7[%c1, %c0_34, %c0_35] : memref<4x128x32xbf16, #tpu.memory_space<vmem>>, vector<1x128x32xbf16>
    %65 = vector.shape_cast %64 : vector<1x128x32xbf16> to vector<128x32xbf16>
    %cst_36 = arith.constant dense<0.000000e+00> : vector<8x32xf32>
    %66 = tpu.matmul %33, %65, %cst_36 {dimension_numbers = #tpu.dot_dimension_numbers<[1], [0], [0], [1], [0, 0, 1, 1], [], []>} : vector<8x128xbf16>, vector<128x32xbf16>, vector<8x32xf32> -> vector<8x32xf32>
    %c1_37 = arith.constant 1 : index
    %c0_38 = arith.constant 0 : index
    %c0_39 = arith.constant 0 : index
    %67 = vector.load %arg8[%c1_37, %c0_38, %c0_39] : memref<4x128x32xbf16, #tpu.memory_space<vmem>>, vector<1x128x32xbf16>
    %68 = vector.shape_cast %67 : vector<1x128x32xbf16> to vector<128x32xbf16>
    %cst_40 = arith.constant dense<0.000000e+00> : vector<8x32xf32>
    %69 = tpu.matmul %33, %68, %cst_40 {dimension_numbers = #tpu.dot_dimension_numbers<[1], [0], [0], [1], [0, 0, 1, 1], [], []>} : vector<8x128xbf16>, vector<128x32xbf16>, vector<8x32xf32> -> vector<8x32xf32>
    %c1_41 = arith.constant 1 : index
    %c0_42 = arith.constant 0 : index
    %c0_43 = arith.constant 0 : index
    %70 = vector.load %arg9[%c1_41, %c0_42, %c0_43] : memref<4x128x32xbf16, #tpu.memory_space<vmem>>, vector<1x128x32xbf16>
    %71 = vector.shape_cast %70 : vector<1x128x32xbf16> to vector<128x32xbf16>
    %cst_44 = arith.constant dense<0.000000e+00> : vector<8x32xf32>
    %72 = tpu.matmul %33, %71, %cst_44 {dimension_numbers = #tpu.dot_dimension_numbers<[1], [0], [0], [1], [0, 0, 1, 1], [], []>} : vector<8x128xbf16>, vector<128x32xbf16>, vector<8x32xf32> -> vector<8x32xf32>
    %73 = arith.truncf %66 : vector<8x32xf32> to vector<8x32xbf16>
    %74 = vector.shape_cast %73 : vector<8x32xbf16> to vector<1x8x32xbf16>
    %75 = arith.truncf %69 : vector<8x32xf32> to vector<8x32xbf16>
    %76 = vector.shape_cast %75 : vector<8x32xbf16> to vector<1x8x32xbf16>
    %77 = arith.truncf %72 : vector<8x32xf32> to vector<8x32xbf16>
    %78 = vector.shape_cast %77 : vector<8x32xbf16> to vector<1x8x32xbf16>
    "tpu.trace_start"() <{level = 10 : i32, message = "bnd,bmd->bnm"}> : () -> ()
    %cst_45 = arith.constant dense<0.000000e+00> : vector<1x8x8xf32>
    %79 = tpu.matmul %74, %76, %cst_45 {dimension_numbers = #tpu.dot_dimension_numbers<[2], [2], [1], [1], [0, 0, 0, 1, 1, 1], [0], [0]>} : vector<1x8x32xbf16>, vector<1x8x32xbf16>, vector<1x8x8xf32> -> vector<1x8x8xf32>
    "tpu.trace_stop"() : () -> ()
    %cst_46 = arith.constant dense<0xFF800000> : vector<1x8xf32>
    %80 = vector.multi_reduction <maximumf>, %79, %cst_46 [2] : vector<1x8x8xf32> to vector<1x8xf32>
    %81 = vector.shape_cast %80 : vector<1x8xf32> to vector<1x8x1xf32>
    %82 = vector.broadcast %81 : vector<1x8x1xf32> to vector<1x8x8xf32>
    %83 = arith.subf %79, %82 : vector<1x8x8xf32>
    %84 = math.exp %83 : vector<1x8x8xf32>
    %cst_47 = arith.constant dense<0.000000e+00> : vector<1x8xf32>
    %85 = vector.multi_reduction <add>, %84, %cst_47 [2] : vector<1x8x8xf32> to vector<1x8xf32>
    %86 = vector.shape_cast %85 : vector<1x8xf32> to vector<1x8x1xf32>
    %87 = tpu.reciprocal %86 {approx = true} : vector<1x8x1xf32> -> vector<1x8x1xf32>
    %88 = vector.broadcast %87 : vector<1x8x1xf32> to vector<1x8x8xf32>
    %89 = arith.mulf %84, %88 : vector<1x8x8xf32>
    %90 = arith.truncf %89 : vector<1x8x8xf32> to vector<1x8x8xbf16>
    "tpu.trace_start"() <{level = 10 : i32, message = "bnm,bmd->bnd"}> : () -> ()
    %cst_48 = arith.constant dense<0.000000e+00> : vector<1x8x32xf32>
    %91 = tpu.matmul %90, %78, %cst_48 {dimension_numbers = #tpu.dot_dimension_numbers<[2], [1], [1], [2], [0, 0, 0, 1, 1, 2], [0], [0]>} : vector<1x8x8xbf16>, vector<1x8x32xbf16>, vector<1x8x32xf32> -> vector<1x8x32xf32>
    "tpu.trace_stop"() : () -> ()
    %92 = vector.shape_cast %91 : vector<1x8x32xf32> to vector<8x32xf32>
    %c0_49 = arith.constant 0 : index
    %c32 = arith.constant 32 : index
    %93 = vector.load %arg20[%c0_49, %c32] : memref<8x128xf32, #tpu.memory_space<vmem>>, vector<8x32xf32>
    tpu.vector_store %arg20[%c0_49, %c32], %92 {strides = array<i32>} : memref<8x128xf32, #tpu.memory_space<vmem>>, vector<8x32xf32>,
    %c2 = arith.constant 2 : index
    %c0_50 = arith.constant 0 : index
    %c0_51 = arith.constant 0 : index
    %94 = vector.load %arg7[%c2, %c0_50, %c0_51] : memref<4x128x32xbf16, #tpu.memory_space<vmem>>, vector<1x128x32xbf16>
    %95 = vector.shape_cast %94 : vector<1x128x32xbf16> to vector<128x32xbf16>
    %cst_52 = arith.constant dense<0.000000e+00> : vector<8x32xf32>
    %96 = tpu.matmul %33, %95, %cst_52 {dimension_numbers = #tpu.dot_dimension_numbers<[1], [0], [0], [1], [0, 0, 1, 1], [], []>} : vector<8x128xbf16>, vector<128x32xbf16>, vector<8x32xf32> -> vector<8x32xf32>
    %c2_53 = arith.constant 2 : index
    %c0_54 = arith.constant 0 : index
    %c0_55 = arith.constant 0 : index
    %97 = vector.load %arg8[%c2_53, %c0_54, %c0_55] : memref<4x128x32xbf16, #tpu.memory_space<vmem>>, vector<1x128x32xbf16>
    %98 = vector.shape_cast %97 : vector<1x128x32xbf16> to vector<128x32xbf16>
    %cst_56 = arith.constant dense<0.000000e+00> : vector<8x32xf32>
    %99 = tpu.matmul %33, %98, %cst_56 {dimension_numbers = #tpu.dot_dimension_numbers<[1], [0], [0], [1], [0, 0, 1, 1], [], []>} : vector<8x128xbf16>, vector<128x32xbf16>, vector<8x32xf32> -> vector<8x32xf32>
    %c2_57 = arith.constant 2 : index
    %c0_58 = arith.constant 0 : index
    %c0_59 = arith.constant 0 : index
    %100 = vector.load %arg9[%c2_57, %c0_58, %c0_59] : memref<4x128x32xbf16, #tpu.memory_space<vmem>>, vector<1x128x32xbf16>
    %101 = vector.shape_cast %100 : vector<1x128x32xbf16> to vector<128x32xbf16>
    %cst_60 = arith.constant dense<0.000000e+00> : vector<8x32xf32>
    %102 = tpu.matmul %33, %101, %cst_60 {dimension_numbers = #tpu.dot_dimension_numbers<[1], [0], [0], [1], [0, 0, 1, 1], [], []>} : vector<8x128xbf16>, vector<128x32xbf16>, vector<8x32xf32> -> vector<8x32xf32>
    %103 = arith.truncf %96 : vector<8x32xf32> to vector<8x32xbf16>
    %104 = vector.shape_cast %103 : vector<8x32xbf16> to vector<1x8x32xbf16>
    %105 = arith.truncf %99 : vector<8x32xf32> to vector<8x32xbf16>
    %106 = vector.shape_cast %105 : vector<8x32xbf16> to vector<1x8x32xbf16>
    %107 = arith.truncf %102 : vector<8x32xf32> to vector<8x32xbf16>
    %108 = vector.shape_cast %107 : vector<8x32xbf16> to vector<1x8x32xbf16>
    "tpu.trace_start"() <{level = 10 : i32, message = "bnd,bmd->bnm"}> : () -> ()
    %cst_61 = arith.constant dense<0.000000e+00> : vector<1x8x8xf32>
    %109 = tpu.matmul %104, %106, %cst_61 {dimension_numbers = #tpu.dot_dimension_numbers<[2], [2], [1], [1], [0, 0, 0, 1, 1, 1], [0], [0]>} : vector<1x8x32xbf16>, vector<1x8x32xbf16>, vector<1x8x8xf32> -> vector<1x8x8xf32>
    "tpu.trace_stop"() : () -> ()
    %cst_62 = arith.constant dense<0xFF800000> : vector<1x8xf32>
    %110 = vector.multi_reduction <maximumf>, %109, %cst_62 [2] : vector<1x8x8xf32> to vector<1x8xf32>
    %111 = vector.shape_cast %110 : vector<1x8xf32> to vector<1x8x1xf32>
    %112 = vector.broadcast %111 : vector<1x8x1xf32> to vector<1x8x8xf32>
    %113 = arith.subf %109, %112 : vector<1x8x8xf32>
    %114 = math.exp %113 : vector<1x8x8xf32>
    %cst_63 = arith.constant dense<0.000000e+00> : vector<1x8xf32>
    %115 = vector.multi_reduction <add>, %114, %cst_63 [2] : vector<1x8x8xf32> to vector<1x8xf32>
    %116 = vector.shape_cast %115 : vector<1x8xf32> to vector<1x8x1xf32>
    %117 = tpu.reciprocal %116 {approx = true} : vector<1x8x1xf32> -> vector<1x8x1xf32>
    %118 = vector.broadcast %117 : vector<1x8x1xf32> to vector<1x8x8xf32>
    %119 = arith.mulf %114, %118 : vector<1x8x8xf32>
    %120 = arith.truncf %119 : vector<1x8x8xf32> to vector<1x8x8xbf16>
    "tpu.trace_start"() <{level = 10 : i32, message = "bnm,bmd->bnd"}> : () -> ()
    %cst_64 = arith.constant dense<0.000000e+00> : vector<1x8x32xf32>
    %121 = tpu.matmul %120, %108, %cst_64 {dimension_numbers = #tpu.dot_dimension_numbers<[2], [1], [1], [2], [0, 0, 0, 1, 1, 2], [0], [0]>} : vector<1x8x8xbf16>, vector<1x8x32xbf16>, vector<1x8x32xf32> -> vector<1x8x32xf32>
    "tpu.trace_stop"() : () -> ()
    %122 = vector.shape_cast %121 : vector<1x8x32xf32> to vector<8x32xf32>
    %c0_65 = arith.constant 0 : index
    %c64 = arith.constant 64 : index
    %123 = vector.load %arg20[%c0_65, %c64] : memref<8x128xf32, #tpu.memory_space<vmem>>, vector<8x32xf32>
    tpu.vector_store %arg20[%c0_65, %c64], %122 {strides = array<i32>} : memref<8x128xf32, #tpu.memory_space<vmem>>, vector<8x32xf32>,
    %c3 = arith.constant 3 : index
    %c0_66 = arith.constant 0 : index
    %c0_67 = arith.constant 0 : index
    %124 = vector.load %arg7[%c3, %c0_66, %c0_67] : memref<4x128x32xbf16, #tpu.memory_space<vmem>>, vector<1x128x32xbf16>
    %125 = vector.shape_cast %124 : vector<1x128x32xbf16> to vector<128x32xbf16>
    %cst_68 = arith.constant dense<0.000000e+00> : vector<8x32xf32>
    %126 = tpu.matmul %33, %125, %cst_68 {dimension_numbers = #tpu.dot_dimension_numbers<[1], [0], [0], [1], [0, 0, 1, 1], [], []>} : vector<8x128xbf16>, vector<128x32xbf16>, vector<8x32xf32> -> vector<8x32xf32>
    %c3_69 = arith.constant 3 : index
    %c0_70 = arith.constant 0 : index
    %c0_71 = arith.constant 0 : index
    %127 = vector.load %arg8[%c3_69, %c0_70, %c0_71] : memref<4x128x32xbf16, #tpu.memory_space<vmem>>, vector<1x128x32xbf16>
    %128 = vector.shape_cast %127 : vector<1x128x32xbf16> to vector<128x32xbf16>
    %cst_72 = arith.constant dense<0.000000e+00> : vector<8x32xf32>
    %129 = tpu.matmul %33, %128, %cst_72 {dimension_numbers = #tpu.dot_dimension_numbers<[1], [0], [0], [1], [0, 0, 1, 1], [], []>} : vector<8x128xbf16>, vector<128x32xbf16>, vector<8x32xf32> -> vector<8x32xf32>
    %c3_73 = arith.constant 3 : index
    %c0_74 = arith.constant 0 : index
    %c0_75 = arith.constant 0 : index
    %130 = vector.load %arg9[%c3_73, %c0_74, %c0_75] : memref<4x128x32xbf16, #tpu.memory_space<vmem>>, vector<1x128x32xbf16>
    %131 = vector.shape_cast %130 : vector<1x128x32xbf16> to vector<128x32xbf16>
    %cst_76 = arith.constant dense<0.000000e+00> : vector<8x32xf32>
    %132 = tpu.matmul %33, %131, %cst_76 {dimension_numbers = #tpu.dot_dimension_numbers<[1], [0], [0], [1], [0, 0, 1, 1], [], []>} : vector<8x128xbf16>, vector<128x32xbf16>, vector<8x32xf32> -> vector<8x32xf32>
    %133 = arith.truncf %126 : vector<8x32xf32> to vector<8x32xbf16>
    %134 = vector.shape_cast %133 : vector<8x32xbf16> to vector<1x8x32xbf16>
    %135 = arith.truncf %129 : vector<8x32xf32> to vector<8x32xbf16>
    %136 = vector.shape_cast %135 : vector<8x32xbf16> to vector<1x8x32xbf16>
    %137 = arith.truncf %132 : vector<8x32xf32> to vector<8x32xbf16>
    %138 = vector.shape_cast %137 : vector<8x32xbf16> to vector<1x8x32xbf16>
    "tpu.trace_start"() <{level = 10 : i32, message = "bnd,bmd->bnm"}> : () -> ()
    %cst_77 = arith.constant dense<0.000000e+00> : vector<1x8x8xf32>
    %139 = tpu.matmul %134, %136, %cst_77 {dimension_numbers = #tpu.dot_dimension_numbers<[2], [2], [1], [1], [0, 0, 0, 1, 1, 1], [0], [0]>} : vector<1x8x32xbf16>, vector<1x8x32xbf16>, vector<1x8x8xf32> -> vector<1x8x8xf32>
    "tpu.trace_stop"() : () -> ()
    %cst_78 = arith.constant dense<0xFF800000> : vector<1x8xf32>
    %140 = vector.multi_reduction <maximumf>, %139, %cst_78 [2] : vector<1x8x8xf32> to vector<1x8xf32>
    %141 = vector.shape_cast %140 : vector<1x8xf32> to vector<1x8x1xf32>
    %142 = vector.broadcast %141 : vector<1x8x1xf32> to vector<1x8x8xf32>
    %143 = arith.subf %139, %142 : vector<1x8x8xf32>
    %144 = math.exp %143 : vector<1x8x8xf32>
    %cst_79 = arith.constant dense<0.000000e+00> : vector<1x8xf32>
    %145 = vector.multi_reduction <add>, %144, %cst_79 [2] : vector<1x8x8xf32> to vector<1x8xf32>
    %146 = vector.shape_cast %145 : vector<1x8xf32> to vector<1x8x1xf32>
    %147 = tpu.reciprocal %146 {approx = true} : vector<1x8x1xf32> -> vector<1x8x1xf32>
    %148 = vector.broadcast %147 : vector<1x8x1xf32> to vector<1x8x8xf32>
    %149 = arith.mulf %144, %148 : vector<1x8x8xf32>
    %150 = arith.truncf %149 : vector<1x8x8xf32> to vector<1x8x8xbf16>
    "tpu.trace_start"() <{level = 10 : i32, message = "bnm,bmd->bnd"}> : () -> ()
    %cst_80 = arith.constant dense<0.000000e+00> : vector<1x8x32xf32>
    %151 = tpu.matmul %150, %138, %cst_80 {dimension_numbers = #tpu.dot_dimension_numbers<[2], [1], [1], [2], [0, 0, 0, 1, 1, 2], [0], [0]>} : vector<1x8x8xbf16>, vector<1x8x32xbf16>, vector<1x8x32xf32> -> vector<1x8x32xf32>
    "tpu.trace_stop"() : () -> ()
    %152 = vector.shape_cast %151 : vector<1x8x32xf32> to vector<8x32xf32>
    %c0_81 = arith.constant 0 : index
    %c96 = arith.constant 96 : index
    %153 = vector.load %arg20[%c0_81, %c96] : memref<8x128xf32, #tpu.memory_space<vmem>>, vector<8x32xf32>
    tpu.vector_store %arg20[%c0_81, %c96], %152 {strides = array<i32>} : memref<8x128xf32, #tpu.memory_space<vmem>>, vector<8x32xf32>,
    %c0_82 = arith.constant 0 : index
    %c0_83 = arith.constant 0 : index
    %154 = vector.load %arg20[%c0_82, %c0_83] : memref<8x128xf32, #tpu.memory_space<vmem>>, vector<8x128xf32>
    %155 = arith.truncf %154 : vector<8x128xf32> to vector<8x128xbf16>
    %c0_84 = arith.constant 0 : index
    %c0_85 = arith.constant 0 : index
    %156 = vector.load %arg10[%c0_84, %c0_85] : memref<128x128xbf16, #tpu.memory_space<vmem>>, vector<128x128xbf16>
    %cst_86 = arith.constant dense<0.000000e+00> : vector<8x128xf32>
    %157 = tpu.matmul %155, %156, %cst_86 {dimension_numbers = #tpu.dot_dimension_numbers<[1], [0], [0], [1], [0, 0, 1, 1], [], []>} : vector<8x128xbf16>, vector<128x128xbf16>, vector<8x128xf32> -> vector<8x128xf32>
    %158 = arith.addf %4, %157 : vector<8x128xf32>
    %c0_87 = arith.constant 0 : index
    %c0_88 = arith.constant 0 : index
    %159 = vector.load %arg11[%c0_87, %c0_88] : memref<1x128xf32, #tpu.memory_space<vmem>>, vector<1x128xf32>
    %160 = vector.broadcast %159 : vector<1x128xf32> to vector<8x128xf32>
    %161 = arith.addf %158, %160 : vector<8x128xf32>
    %c0_89 = arith.constant 0 : index
    %c0_90 = arith.constant 0 : index
    %c0_91 = arith.constant 0 : index
    %162 = vector.load %arg4[%c0_89, %c0_90, %c0_91] : memref<1x1x128xf32, #tpu.memory_space<vmem>>, vector<1x1x128xf32>
    %c0_92 = arith.constant 0 : index
    %c0_93 = arith.constant 0 : index
    %c0_94 = arith.constant 0 : index
    %163 = vector.load %arg5[%c0_92, %c0_93, %c0_94] : memref<1x1x128xf32, #tpu.memory_space<vmem>>, vector<1x1x128xf32>
    %cst_95 = arith.constant dense<0.000000e+00> : vector<8xf32>
    %164 = vector.multi_reduction <add>, %161, %cst_95 [1] : vector<8x128xf32> to vector<8xf32>
    %165 = vector.shape_cast %164 : vector<8xf32> to vector<8x1xf32>
    %cst_96 = arith.constant 1.280000e+02 : f32
    %166 = vector.broadcast %cst_96 : f32 to vector<8x1xf32>
    %167 = arith.divf %165, %166 : vector<8x1xf32>
    %168 = vector.broadcast %167 : vector<8x1xf32> to vector<8x128xf32>
    %169 = arith.subf %161, %168 : vector<8x128xf32>
    %170 = arith.mulf %169, %169 : vector<8x128xf32>
    %cst_97 = arith.constant dense<0.000000e+00> : vector<8xf32>
    %171 = vector.multi_reduction <add>, %170, %cst_97 [1] : vector<8x128xf32> to vector<8xf32>
    %172 = vector.shape_cast %171 : vector<8xf32> to vector<8x1xf32>
    %cst_98 = arith.constant 1.280000e+02 : f32
    %173 = vector.broadcast %cst_98 : f32 to vector<8x1xf32>
    %174 = arith.divf %172, %173 : vector<8x1xf32>
    %175 = vector.broadcast %167 : vector<8x1xf32> to vector<8x128xf32>
    %176 = arith.subf %161, %175 : vector<8x128xf32>
    %cst_99 = arith.constant 9.99999974E-6 : f32
    %177 = vector.broadcast %cst_99 : f32 to vector<8x1xf32>
    %178 = arith.addf %174, %177 : vector<8x1xf32>
    %179 = math.rsqrt %178 : vector<8x1xf32>
    %180 = vector.broadcast %179 : vector<8x1xf32> to vector<8x128xf32>
    %181 = arith.mulf %176, %180 : vector<8x128xf32>
    %182 = vector.shape_cast %181 : vector<8x128xf32> to vector<1x8x128xf32>
    %cst_100 = arith.constant 1.000000e+00 : f32
    %183 = vector.broadcast %cst_100 : f32 to vector<1x1x128xf32>
    %184 = arith.addf %183, %162 : vector<1x1x128xf32>
    %185 = vector.broadcast %184 : vector<1x1x128xf32> to vector<1x8x128xf32>
    %186 = arith.mulf %182, %185 : vector<1x8x128xf32>
    %187 = vector.broadcast %163 : vector<1x1x128xf32> to vector<1x8x128xf32>
    %188 = arith.addf %186, %187 : vector<1x8x128xf32>
    %189 = vector.shape_cast %188 : vector<1x8x128xf32> to vector<8x128xf32>
    %190 = arith.truncf %189 : vector<8x128xf32> to vector<8x128xbf16>
    %cst_101 = arith.constant 0.000000e+00 : f32
    %191 = vector.broadcast %cst_101 : f32 to vector<8x128xf32>
    %c0_i32 = arith.constant 0 : i32
    %c4_i32 = arith.constant 4 : i32
    %192 = arith.addi %c0_i32, %c4_i32 : i32
    %c1_i32 = arith.constant 1 : i32
    %193 = scf.for %arg21 = %c0_i32 to %192 step %c1_i32 iter_args(%arg22 = %191) -> (vector<8x128xf32>)  : i32 {
      %203 = arith.index_cast %arg21 : i32 to index
      %c0_111 = arith.constant 0 : index
      %c0_112 = arith.constant 0 : index
      %204 = vector.load %arg12[%203, %c0_111, %c0_112] : memref<4x128x128xbf16, #tpu.memory_space<vmem>>, vector<1x128x128xbf16>
      %205 = vector.shape_cast %204 : vector<1x128x128xbf16> to vector<128x128xbf16>
      %cst_113 = arith.constant dense<0.000000e+00> : vector<8x128xf32>
      %206 = tpu.matmul %190, %205, %cst_113 {dimension_numbers = #tpu.dot_dimension_numbers<[1], [0], [0], [1], [0, 0, 1, 1], [], []>} : vector<8x128xbf16>, vector<128x128xbf16>, vector<8x128xf32> -> vector<8x128xf32>
      %207 = arith.index_cast %arg21 : i32 to index
      %c0_114 = arith.constant 0 : index
      %c0_115 = arith.constant 0 : index
      %208 = vector.load %arg13[%207, %c0_114, %c0_115] : memref<4x1x128xf32, #tpu.memory_space<vmem>>, vector<1x1x128xf32>
      %209 = vector.shape_cast %208 : vector<1x1x128xf32> to vector<1x128xf32>
      %210 = vector.broadcast %209 : vector<1x128xf32> to vector<8x128xf32>
      %211 = arith.addf %206, %210 : vector<8x128xf32>
      %212 = arith.index_cast %arg21 : i32 to index
      %c0_116 = arith.constant 0 : index
      %c0_117 = arith.constant 0 : index
      %213 = vector.load %arg14[%212, %c0_116, %c0_117] : memref<4x128x128xbf16, #tpu.memory_space<vmem>>, vector<1x128x128xbf16>
      %214 = vector.shape_cast %213 : vector<1x128x128xbf16> to vector<128x128xbf16>
      %cst_118 = arith.constant dense<0.000000e+00> : vector<8x128xf32>
      %215 = tpu.matmul %190, %214, %cst_118 {dimension_numbers = #tpu.dot_dimension_numbers<[1], [0], [0], [1], [0, 0, 1, 1], [], []>} : vector<8x128xbf16>, vector<128x128xbf16>, vector<8x128xf32> -> vector<8x128xf32>
      %216 = arith.index_cast %arg21 : i32 to index
      %c0_119 = arith.constant 0 : index
      %c0_120 = arith.constant 0 : index
      %217 = vector.load %arg15[%216, %c0_119, %c0_120] : memref<4x1x128xf32, #tpu.memory_space<vmem>>, vector<1x1x128xf32>
      %218 = vector.shape_cast %217 : vector<1x1x128xf32> to vector<1x128xf32>
      %219 = vector.broadcast %218 : vector<1x128xf32> to vector<8x128xf32>
      %220 = arith.addf %215, %219 : vector<8x128xf32>
      %cst_121 = arith.constant 5.000000e-01 : f32
      %221 = vector.broadcast %cst_121 : f32 to vector<8x128xf32>
      %222 = arith.mulf %221, %220 : vector<8x128xf32>
      %cst_122 = arith.constant 0.707106769 : f32
      %223 = vector.broadcast %cst_122 : f32 to vector<8x128xf32>
      %224 = arith.mulf %220, %223 : vector<8x128xf32>
      %225 = math.erf %224 : vector<8x128xf32>
      %cst_123 = arith.constant 1.000000e+00 : f32
      %226 = vector.broadcast %cst_123 : f32 to vector<8x128xf32>
      %227 = arith.addf %226, %225 : vector<8x128xf32>
      %228 = arith.mulf %222, %227 : vector<8x128xf32>
      %229 = arith.mulf %211, %228 : vector<8x128xf32>
      %230 = arith.truncf %229 : vector<8x128xf32> to vector<8x128xbf16>
      %231 = arith.index_cast %arg21 : i32 to index
      %c0_124 = arith.constant 0 : index
      %c0_125 = arith.constant 0 : index
      %232 = vector.load %arg16[%231, %c0_124, %c0_125] : memref<4x128x128xbf16, #tpu.memory_space<vmem>>, vector<1x128x128xbf16>
      %233 = vector.shape_cast %232 : vector<1x128x128xbf16> to vector<128x128xbf16>
      %cst_126 = arith.constant dense<0.000000e+00> : vector<8x128xf32>
      %234 = tpu.matmul %230, %233, %cst_126 {dimension_numbers = #tpu.dot_dimension_numbers<[1], [0], [0], [1], [0, 0, 1, 1], [], []>} : vector<8x128xbf16>, vector<128x128xbf16>, vector<8x128xf32> -> vector<8x128xf32>
      %235 = arith.addf %arg22, %234 : vector<8x128xf32>
      scf.yield %235 : vector<8x128xf32>
    }
    %c4_i32_102 = arith.constant 4 : i32
    %194 = arith.addf %161, %193 : vector<8x128xf32>
    %c0_103 = arith.constant 0 : index
    %c0_104 = arith.constant 0 : index
    %195 = vector.load %arg17[%c0_103, %c0_104] : memref<1x128xf32, #tpu.memory_space<vmem>>, vector<1x128xf32>
    %196 = vector.broadcast %195 : vector<1x128xf32> to vector<8x128xf32>
    %197 = arith.addf %194, %196 : vector<8x128xf32>
    %198 = arith.truncf %197 : vector<8x128xf32> to vector<8x128xbf16>
    %c0_105 = arith.constant 0 : index
    %c0_106 = arith.constant 0 : index
    %199 = vector.load %arg18[%c0_105, %c0_106] : memref<128x128xbf16, #tpu.memory_space<vmem>>, vector<128x128xbf16>
    %cst_107 = arith.constant dense<0.000000e+00> : vector<8x128xf32>
    %200 = tpu.matmul %198, %199, %cst_107 {dimension_numbers = #tpu.dot_dimension_numbers<[1], [0], [0], [1], [0, 0, 1, 1], [], []>} : vector<8x128xbf16>, vector<128x128xbf16>, vector<8x128xf32> -> vector<8x128xf32>
    %201 = vector.shape_cast %200 : vector<8x128xf32> to vector<1x8x128xf32>
    %c0_108 = arith.constant 0 : index
    %c0_109 = arith.constant 0 : index
    %c0_110 = arith.constant 0 : index
    %202 = vector.load %arg19[%c0_108, %c0_109, %c0_110] : memref<1x8x128xf32, #tpu.memory_space<vmem>>, vector<1x8x128xf32>
    tpu.vector_store %arg19[%c0_108, %c0_109, %c0_110], %201 {strides = array<i32>} : memref<1x8x128xf32, #tpu.memory_space<vmem>>, vector<1x8x128xf32>,
    return
  }
  func.func @transform_0(%arg0: i32) -> (i32, i32, i32) {
    %c0_i32 = arith.constant 0 : i32
    %c0_i32_0 = arith.constant 0 : i32
    %c0_i32_1 = arith.constant 0 : i32
    return %arg0, %c0_i32, %c0_i32_0 : i32, i32, i32
  }
  func.func @transform_1(%arg0: i32) -> (i32, i32, i32) {
    %c0_i32 = arith.constant 0 : i32
    %c0_i32_0 = arith.constant 0 : i32
    %c0_i32_1 = arith.constant 0 : i32
    return %arg0, %c0_i32, %c0_i32_0 : i32, i32, i32
  }
  func.func @transform_2(%arg0: i32) -> (i32, i32, i32) {
    %c0_i32 = arith.constant 0 : i32
    %c0_i32_0 = arith.constant 0 : i32
    %c0_i32_1 = arith.constant 0 : i32
    return %arg0, %c0_i32, %c0_i32_0 : i32, i32, i32
  }
  func.func @transform_3(%arg0: i32) -> (i32, i32, i32) {
    %c0_i32 = arith.constant 0 : i32
    %c0_i32_0 = arith.constant 0 : i32
    %c0_i32_1 = arith.constant 0 : i32
    return %arg0, %c0_i32, %c0_i32_0 : i32, i32, i32
  }
  func.func @transform_4(%arg0: i32) -> (i32, i32, i32) {
    %c0_i32 = arith.constant 0 : i32
    %c0_i32_0 = arith.constant 0 : i32
    %c0_i32_1 = arith.constant 0 : i32
    return %arg0, %c0_i32, %c0_i32_0 : i32, i32, i32
  }
  func.func @transform_5(%arg0: i32) -> (i32, i32) {
    %c0_i32 = arith.constant 0 : i32
    %c0_i32_0 = arith.constant 0 : i32
    %c0_i32_1 = arith.constant 0 : i32
    return %c0_i32, %c0_i32_0 : i32, i32
  }
  func.func @transform_6(%arg0: i32) -> (i32, i32, i32) {
    %c0_i32 = arith.constant 0 : i32
    %c0_i32_0 = arith.constant 0 : i32
    %c0_i32_1 = arith.constant 0 : i32
    %c0_i32_2 = arith.constant 0 : i32
    return %c0_i32, %c0_i32_0, %c0_i32_1 : i32, i32, i32
  }
  func.func @transform_7(%arg0: i32) -> (i32, i32, i32) {
    %c0_i32 = arith.constant 0 : i32
    %c0_i32_0 = arith.constant 0 : i32
    %c0_i32_1 = arith.constant 0 : i32
    %c0_i32_2 = arith.constant 0 : i32
    return %c0_i32, %c0_i32_0, %c0_i32_1 : i32, i32, i32
  }
  func.func @transform_8(%arg0: i32) -> (i32, i32, i32) {
    %c0_i32 = arith.constant 0 : i32
    %c0_i32_0 = arith.constant 0 : i32
    %c0_i32_1 = arith.constant 0 : i32
    %c0_i32_2 = arith.constant 0 : i32
    return %c0_i32, %c0_i32_0, %c0_i32_1 : i32, i32, i32
  }
  func.func @transform_9(%arg0: i32) -> (i32, i32) {
    %c0_i32 = arith.constant 0 : i32
    %c0_i32_0 = arith.constant 0 : i32
    %c0_i32_1 = arith.constant 0 : i32
    return %c0_i32, %c0_i32_0 : i32, i32
  }
  func.func @transform_10(%arg0: i32) -> (i32, i32) {
    %c0_i32 = arith.constant 0 : i32
    %c0_i32_0 = arith.constant 0 : i32
    %c0_i32_1 = arith.constant 0 : i32
    return %c0_i32, %c0_i32_0 : i32, i32
  }
  func.func @transform_11(%arg0: i32) -> (i32, i32, i32) {
    %c0_i32 = arith.constant 0 : i32
    %c0_i32_0 = arith.constant 0 : i32
    %c0_i32_1 = arith.constant 0 : i32
    %c0_i32_2 = arith.constant 0 : i32
    return %c0_i32, %c0_i32_0, %c0_i32_1 : i32, i32, i32
  }
  func.func @transform_12(%arg0: i32) -> (i32, i32, i32) {
    %c0_i32 = arith.constant 0 : i32
    %c0_i32_0 = arith.constant 0 : i32
    %c0_i32_1 = arith.constant 0 : i32
    %c0_i32_2 = arith.constant 0 : i32
    return %c0_i32, %c0_i32_0, %c0_i32_1 : i32, i32, i32
  }
  func.func @transform_13(%arg0: i32) -> (i32, i32, i32) {
    %c0_i32 = arith.constant 0 : i32
    %c0_i32_0 = arith.constant 0 : i32
    %c0_i32_1 = arith.constant 0 : i32
    %c0_i32_2 = arith.constant 0 : i32
    return %c0_i32, %c0_i32_0, %c0_i32_1 : i32, i32, i32
  }
  func.func @transform_14(%arg0: i32) -> (i32, i32, i32) {
    %c0_i32 = arith.constant 0 : i32
    %c0_i32_0 = arith.constant 0 : i32
    %c0_i32_1 = arith.constant 0 : i32
    %c0_i32_2 = arith.constant 0 : i32
    return %c0_i32, %c0_i32_0, %c0_i32_1 : i32, i32, i32
  }
  func.func @transform_15(%arg0: i32) -> (i32, i32, i32) {
    %c0_i32 = arith.constant 0 : i32
    %c0_i32_0 = arith.constant 0 : i32
    %c0_i32_1 = arith.constant 0 : i32
    %c0_i32_2 = arith.constant 0 : i32
    return %c0_i32, %c0_i32_0, %c0_i32_1 : i32, i32, i32
  }
  func.func @transform_16(%arg0: i32) -> (i32, i32) {
    %c0_i32 = arith.constant 0 : i32
    %c0_i32_0 = arith.constant 0 : i32
    %c0_i32_1 = arith.constant 0 : i32
    return %c0_i32, %c0_i32_0 : i32, i32
  }
  func.func @transform_17(%arg0: i32) -> (i32, i32) {
    %c0_i32 = arith.constant 0 : i32
    %c0_i32_0 = arith.constant 0 : i32
    %c0_i32_1 = arith.constant 0 : i32
    return %c0_i32, %c0_i32_0 : i32, i32
  }
  func.func @transform_18(%arg0: i32) -> (i32, i32, i32) {
    %c0_i32 = arith.constant 0 : i32
    %c0_i32_0 = arith.constant 0 : i32
    %c0_i32_1 = arith.constant 0 : i32
    return %arg0, %c0_i32, %c0_i32_0 : i32, i32, i32
  }
}

</mosaic_0001>

<bundles_post_ra>
// kernel: tpu_custom_call.1
= control target key start
LH: loop header
LB: loop body
LE: loop exit
PB: predicated region body
PF: predicated region fallthrough
CT: control target
= control target key end

     0   :  { %s4827_s0 = inlined_call_operand.hbm [shape: f32[2,8,16], index: 0, kind: input, shape index: {}]   ;;  %s4828_s1 = inlined_call_operand.hbm [shape: f32[2,1,128], index: 1, kind: input, shape index: {}]   ;;  %s4829_s2 = inlined_call_operand.hbm [shape: f32[2,1,128], index: 2, kind: input, shape index: {}]   ;;  %s4830_s3 = inlined_call_operand.hbm [shape: f32[2,1,128], index: 3, kind: input, shape index: {}]   ;;  %s4831_s4 = inlined_call_operand.hbm [shape: f32[2,1,128], index: 4, kind: input, shape index: {}]   ;;  %s4832_s5 = inlined_call_operand.hbm [shape: bf16[16,128], index: 5, kind: input, shape index: {}]   ;;  %s4833_s6 = inlined_call_operand.vmem [shape: bf16[4,128,32], index: 6, kind: input, shape index: {}]   ;;  %s4834_s7 = inlined_call_operand.vmem [shape: bf16[4,128,32], index: 7, kind: input, shape index: {}]   ;;  %s4835_s8 = inlined_call_operand.vmem [shape: bf16[4,128,32], index: 8, kind: input, shape index: {}]   ;;  %s4836_s9 = inlined_call_operand.vmem [shape: bf16[128,128], index: 9, kind: input, shape index: {}]   ;;  %s4837_s10 = inlined_call_operand.hbm [shape: f32[1,128], index: 10, kind: input, shape index: {}]   ;;  %s4838_s11 = inlined_call_operand.vmem [shape: bf16[4,128,128], index: 11, kind: input, shape index: {}]   ;;  %s4839_s12 = inlined_call_operand.vmem [shape: f32[4,1,128], index: 12, kind: input, shape index: {}]   ;;  %s4840_s13 = inlined_call_operand.vmem [shape: bf16[4,128,128], index: 13, kind: input, shape index: {}]   ;;  %s4841_s14 = inlined_call_operand.vmem [shape: f32[4,1,128], index: 14, kind: input, shape index: {}]   ;;  %s4842_s15 = inlined_call_operand.vmem [shape: bf16[4,128,128], index: 15, kind: input, shape index: {}]   ;;  %s4843_s16 = inlined_call_operand.vmem [shape: f32[1,128], index: 16, kind: input, shape index: {}]   ;;  %s4844_s17 = inlined_call_operand.vmem [shape: bf16[128,128], index: 17, kind: input, shape index: {}]   ;;  %s4845_s18 = inlined_call_operand.hbm [shape: f32[2,8,128], index: 18, kind: output, shape index: {}]  }
   0x1   :  { %4863 = sst [smem:[#allocation27_spill]] %s4827_s0 }
   0x2   :  { %4864 = sst [smem:[#allocation28_spill]] %s4828_s1 }
   0x3   :  { %4865 = sst [smem:[#allocation29_spill]] %s4829_s2 }
   0x4   :  { %4866 = sst [smem:[#allocation30_spill]] %s4830_s3 }
   0x5   :  { %4867 = sst [smem:[#allocation31_spill]] %s4832_s5 }
   0x6   :  { %4868 = sst [smem:[#allocation32_spill]] %s4836_s9 }
   0x7   :  { %4869 = sst [smem:[#allocation33_spill]] %s4837_s10 }
   0x8   :  { %4870 = sst [smem:[#allocation34_spill]] %s4838_s11 }
   0x9   :  { %4871 = sst [smem:[#allocation35_spill]] %s4839_s12 }
   0xa   :  { %4872 = sst [smem:[#allocation36_spill]] %s4840_s13 }
   0xb   :  { %4873 = sst [smem:[#allocation37_spill]] %s4841_s14 }
   0xc   :  { %4874 = sst [smem:[#allocation38_spill]] %s4842_s15 }
   0xd   :  { %4875 = sst [smem:[#allocation39_spill]] %s4843_s16 }
   0xe   :  { %4876 = sst [smem:[#allocation40_spill]] %s4844_s17 }
   0xf   :  { %4877 = sst [smem:[#allocation41_spill]] %s4845_s18 }
  0x10   :  { %23 = vsyncpa [#allocation4], 0 }
  0x11   :  { %25 = vsyncpa [#allocation4 + $0x1], 0 }
  0x12   :  { %26 = vsyncpa [#allocation7], 0 }
  0x13   :  { %28 = vsyncpa [#allocation7 + $0x1], 0 }
  0x14   :  { %29 = vsyncpa [#allocation10], 0 }
  0x15   :  { %31 = vsyncpa [#allocation10 + $0x1], 0 }
  0x16   :  { %32 = vsyncpa [#allocation13], 0 }
  0x17   :  { %33 = vsyncpa [#allocation5], 0 }
  0x18   :  { %35 = vsyncpa [#allocation5 + $0x1], 0  ;;  %s4097_s27 = smov 0   ;;  %s4099_s28 = smov 0  }
  0x19   :  { %s4101_s29 = smov 0   ;;  %s4103_s30 = smov 0  }
  0x1a LB: > { %4878 = sst [smem:[#allocation21_spill]] %s3972_s27  ;;  %s4118_s0 = sadd.s32 4294967295, %s3984_s30   ;;  %s3984_s30 = sphi %s4103_s30, %s4914_s30   ;;  %s3980_s29 = sphi %s4101_s29, %s4916_s29   ;;  %s3976_s28 = sphi %s4099_s28, %s4918_s28   ;;  %s3972_s27 = sphi %s4097_s27, %s4917_s27  }
  0x1b   : > { %4879 = sst [smem:[#allocation22_spill]] %s3980_s29  ;;  %s2687_s19 = sadd.s32 4294967294, %s3984_s30  }
  0x1c   : > { %p61_p0 = scmp.ne.s32.totalorder %s3976_s28, %s3972_s27  ;;  %p4859_p1 = scmp.eq.s32.totalorder %s4118_s0, 0 }
  0x1d   : > { %p462_p2 = scmp.eq.s32.totalorder %s4118_s0, 1  ;;  %p468_p3 = scmp.eq.s32.totalorder %s2687_s19, 1 }
  0x1e   : > { %p4127_p4 = por %p4859_p1, %p61_p0  ;;  %p2688_p5 = scmp.ge.s32.totalorder %s3984_s30, 1 }
  0x1f   : > { %p4132_p6 = por %p468_p3, %p61_p0  ;;  %p475_p7 = scmp.lt.s32.totalorder %s3984_s30, 3 }
  0x20   : > { %s4883_s5 = sld [smem:[#allocation31_spill]]  ;;  %s3994_s24 = smov [#allocation12]  }
  0x21   : > { %s4881_s20 = scalar_select %p4132_p6, 1, 0 }
  0x22   : > { %p4140_p8 = pnand %p2688_p5, %p475_p7  ;;  %s488_s25 = sshll.u32 %s3994_s24, 4  ;;  %s489_s25 = int_to_ptr.vmem [resolvable:$true] %s488_s25 }
  0x23   : > { %4882 = sst [smem:[#allocation23_spill]] %s4881_s20  ;;  %s4154_s19 = sadd.s32 1, %s3984_s30  }
  0x24   : > { %p3569_p9 = pneg %p4140_p8  ;;  %4886 = sst [smem:[#allocation24_spill]] %s4154_s19 }
  0x25   : > { %s3995_s21 = smov 64   ;;  %s3996_s22 = smov 4  }
  0x26   : > { %s486_s2 = sshll.u32 %s4883_s5, 4  ;;  %p4148_p10 = pnand %p3569_p9, %p4859_p1  ;;  %s487_s2 = int_to_ptr.hbm [resolvable:$true] %s486_s2 }
  0x27   : > { %s45_s24 = ssub.s32 %s3984_s30, %s4154_s19  ;;  %s48_s5 = sadd.s32 1, %s3980_s29 }
  0x28   : > { %3572 = dma.hbm_to_vmem [thread:$0]  (!%p4148_p10), %s487_s2, 128, %s489_s25, [#allocation13], %s3995_s21, %s3995_s21, %s3996_s22  }
  0x29   : > { %p46_p12 = scmp.eq.s32.totalorder %s45_s24, 0  ;;  %p55_p13 = scmp.ne.s32.totalorder %s3980_s29, %s3976_s28 }
  0x2a   : > { %p56_p0 = scmp.eq.s32.totalorder %s3984_s30, 0  ;;  %p3598_p3 = scmp.lt.s32.totalorder %s3984_s30, 2 }
  0x2b   : > { %s4166_s20 = scalar_select %p46_p12, %s3980_s29, %s48_s5  }
  0x2c   : > { %p57_p5 = por %p56_p0, %p55_p13  ;;  %p4170_p7 = por %p462_p2, %p55_p13 }
  0x2d   : > { %4887 = sst [smem:[#allocation25_spill]] %s4166_s20  ;;  %s4175_s18 = sand.u32 1, %s3980_s29  }
  0x2e   : > { %s4888_s27 = scalar_select %p4170_p7, 1, 0 }
  0x2f   : > { %s566_s16 = sand.u32 1, %s3984_s30   ;;  %p4178_p9 = pnand %p3598_p3, %p57_p5 }
  0x30   : > { %4889 = sst [smem:[#allocation26_spill]] %s4888_s27  ;;  %s569_s20 = scalar_lea.vmem [#allocation6], %s4175_s18 }
  0x31   : > { %s4891_s22 = sld [smem:[#allocation28_spill]]  ;;  %s576_s19 = sshll.u32 %s569_s20, 4  ;;  %s577_s19 = int_to_ptr.vmem [resolvable:$true] %s576_s19 }
  0x32   : > { %s4187_s17 = scalar_lea.sflag [#allocation7], %s566_s16  ;;  %p4191_p12 = pneg %p4178_p9 }
  0x37   : > { %s572_s5 = scalar_lea.hbm %s4891_s22, %s3984_s30  ;;  %s3725_s20 = scalar_lea.hbm %s4891_s22, 2 }
  0x38   : > { %s574_s24 = sshll.u32 %s572_s5, 4  ;;  %s575_s24 = int_to_ptr.hbm [resolvable:$true] %s574_s24 }
  0x39   : > { %s3718_s29 = sshra.s32 %s575_s24, 4  ;;  %s3719_s29 = int_to_ptr.hbm [resolvable:$true] %s3718_s29 }
  0x3a   : > { %s3720_s27 = scalar_lea.hbm %s3719_s29, 1  ;;  %p3726_p3 = scmp.lt.s32.totalorder %s3719_s29, %s4891_s22 }
  0x3b   : > { %p3721_p2 = scmp.ne.s32.totalorder %s3719_s29, %s3720_s27  ;;  %p3727_p5 = scmp.lt.s32.totalorder %s3725_s20, %s3720_s27 }
  0x3d   : > { %p3723_p13 = pnand %p4191_p12, %p3721_p2  ;;  %p3728_p11 = por %p3727_p5, %p3726_p3 }
  0x3f   : > { %p3724_p0 = pneg %p3723_p13 }
  0x41   : > { %p3729_p1 = pnand %p3728_p11, %p3724_p0 }
  0x43   : > { %3732 = shalt.err (!%p3729_p1)
}
  0x44   : > { %3582 = dma.hbm_to_vmem [thread:$0]  (!%p4178_p9), %s575_s24, 16, %s577_s19, %s4187_s17  }
  0x45   : > { %s4893_s3 = sld [smem:[#allocation30_spill]]  ;;  %s603_s14 = scalar_lea.vmem [#allocation9], %s4175_s18 }
  0x46   : > { %s610_s9 = sshll.u32 %s603_s14, 4  ;;  %s4211_s12 = scalar_lea.sflag [#allocation10], %s566_s16  ;;  %s611_s9 = int_to_ptr.vmem [resolvable:$true] %s610_s9 }
  0x4b   : > { %s606_s25 = scalar_lea.hbm %s4893_s3, %s3984_s30  ;;  %s3755_s24 = scalar_lea.hbm %s4893_s3, 2 }
  0x4c   : > { %s608_s21 = sshll.u32 %s606_s25, 4  ;;  %s609_s21 = int_to_ptr.hbm [resolvable:$true] %s608_s21 }
  0x4d   : > { %s3748_s27 = sshra.s32 %s609_s21, 4  ;;  %s3749_s27 = int_to_ptr.hbm [resolvable:$true] %s3748_s27 }
  0x4e   : > { %s3750_s29 = scalar_lea.hbm %s3749_s27, 1  ;;  %p3756_p13 = scmp.lt.s32.totalorder %s3749_s27, %s4893_s3 }
  0x4f   : > { %p3751_p1 = scmp.ne.s32.totalorder %s3749_s27, %s3750_s29  ;;  %p3757_p0 = scmp.lt.s32.totalorder %s3755_s24, %s3750_s29 }
  0x51   : > { %p3753_p11 = pnand %p3751_p1, %p4191_p12  ;;  %p3758_p3 = por %p3757_p0, %p3756_p13 }
  0x53   : > { %p3754_p2 = pneg %p3753_p11 }
  0x55   : > { %p3759_p5 = pnand %p3758_p3, %p3754_p2 }
  0x57   : > { %3762 = shalt.err (!%p3759_p5)
}
  0x58   : > { %3588 = dma.hbm_to_vmem [thread:$0]  (!%p4178_p9), %s609_s21, 16, %s611_s9, %s4211_s12  }
  0x59   : > { %s4894_s10 = sld [smem:[#allocation33_spill]]  ;;  %s3997_s25 = smov [#allocation14]  }
  0x5a   : > { %s515_s20 = sshll.u32 %s3997_s25, 4  ;;  %s2692_s27 = sshll.u32 %s4175_s18, 3  ;;  %s516_s20 = int_to_ptr.vmem [resolvable:$true] %s515_s20 }
  0x5b   : > { %s2693_s29 = sshll.u32 %s3984_s30, 3  ;;  %s4895_s11 = sld [smem:[#allocation27_spill]] }
  0x5c   : > { %s551_s22 = scalar_lea.vmem [#allocation3], %s2692_s27  ;;  %s548_s21 = scalar_lea.sflag [#allocation4], %s4175_s18 }
  0x5d   : > { %s559_s9 = sshll.u32 %s551_s22, 4  ;;  %s560_s9 = int_to_ptr.vmem [resolvable:$true] %s559_s9 }
  0x5f   : > { %s513_s5 = sshll.u32 %s4894_s10, 4  ;;  %s514_s5 = int_to_ptr.hbm [resolvable:$true] %s513_s5 }
  0x60   : > { %3575 = dma.hbm_to_vmem [thread:$0]  (!%p4148_p10), %s514_s5, 16, %s516_s20, [#allocation13]  }
  0x61   : > { %s555_s13 = scalar_lea.hbm %s4895_s11, %s2693_s29  ;;  %s3815_s25 = scalar_lea.hbm %s4895_s11, 16 }
  0x62   : > { %s557_s3 = sshll.u32 %s555_s13, 4  ;;  %s558_s3 = int_to_ptr.hbm [resolvable:$true] %s557_s3 }
  0x63   : > { %s3808_s14 = sshra.s32 %s558_s3, 4  ;;  %s3809_s14 = int_to_ptr.hbm [resolvable:$true] %s3808_s14 }
  0x64   : > { %s3810_s16 = scalar_lea.hbm %s3809_s14, 8  ;;  %p3816_p10 = scmp.lt.s32.totalorder %s3809_s14, %s4895_s11 }
  0x65   : > { %p3811_p1 = scmp.ne.s32.totalorder %s3809_s14, %s3810_s16  ;;  %p3817_p13 = scmp.lt.s32.totalorder %s3815_s25, %s3810_s16 }
  0x67   : > { %p3813_p11 = pnand %p3811_p1, %p4191_p12  ;;  %p3818_p0 = por %p3817_p13, %p3816_p10 }
  0x69   : > { %p3814_p2 = pneg %p3813_p11 }
  0x6b   : > { %p3819_p3 = pnand %p3818_p0, %p3814_p2 }
  0x6d   : > { %3822 = shalt.err (!%p3819_p3)
}
  0x6e   : > { %3579 = dma.hbm_to_vmem [thread:$0]  (!%p4178_p9), %s558_s3, 128, %s560_s9, %s548_s21  }
  0x6f   : > { %s4896_s29 = sld [smem:[#allocation29_spill]]  ;;  %s586_s5 = scalar_lea.vmem [#allocation8], %s4175_s18 }
  0x70   : > { %s593_s10 = sshll.u32 %s586_s5, 4  ;;  %s594_s10 = int_to_ptr.vmem [resolvable:$true] %s593_s10 }
  0x75   : > { %s4897_s24 = smov %s4896_s29  ;;  %s589_s13 = scalar_lea.hbm %s4896_s29, %s3984_s30 }
  0x76   : > { %s591_s26 = sshll.u32 %s589_s13, 4  ;;  %s3845_s3 = scalar_lea.hbm %s4897_s24, 2  ;;  %s592_s26 = int_to_ptr.hbm [resolvable:$true] %s591_s26 }
  0x77   : > { %s3838_s14 = sshra.s32 %s592_s26, 4  ;;  %s3839_s14 = int_to_ptr.hbm [resolvable:$true] %s3838_s14 }
  0x78   : > { %s3840_s16 = scalar_lea.hbm %s3839_s14, 1  ;;  %p3846_p2 = scmp.lt.s32.totalorder %s3839_s14, %s4897_s24 }
  0x79   : > { %p3841_p5 = scmp.ne.s32.totalorder %s3839_s14, %s3840_s16  ;;  %p3847_p10 = scmp.lt.s32.totalorder %s3845_s3, %s3840_s16 }
  0x7b   : > { %p3843_p1 = pnand %p3841_p5, %p4191_p12  ;;  %p3848_p13 = por %p3847_p10, %p3846_p2 }
  0x7d   : > { %p3844_p11 = pneg %p3843_p1 }
  0x7f   : > { %p3849_p0 = pnand %p3848_p13, %p3844_p11 }
  0x81   : > { %3852 = shalt.err (!%p3849_p0)
}
  0x82   : > { %3585 = dma.hbm_to_vmem [thread:$0]  (!%p4178_p9), %s592_s26, 16, %s594_s10, %s4187_s17  }
  0x83   : > { %s623_s27 = scalar_lea.hbm %s4831_s4, %s3984_s30  ;;  %s620_s13 = scalar_lea.vmem [#allocation11], %s4175_s18 }
  0x84   : > { %s625_s29 = sshll.u32 %s623_s27, 4  ;;  %s627_s5 = sshll.u32 %s620_s13, 4  ;;  %s626_s29 = int_to_ptr.hbm [resolvable:$true] %s625_s29  ;;  %s628_s5 = int_to_ptr.vmem [resolvable:$true] %s627_s5 }
  0x85   : > { %s3868_s14 = sshra.s32 %s626_s29, 4  ;;  %s3875_s10 = scalar_lea.hbm %s4831_s4, 2  ;;  %s3869_s14 = int_to_ptr.hbm [resolvable:$true] %s3868_s14 }
  0x86   : > { %s3870_s16 = scalar_lea.hbm %s3869_s14, 1  ;;  %p3876_p11 = scmp.lt.s32.totalorder %s3869_s14, %s4831_s4 }
  0x87   : > { %p3871_p3 = scmp.ne.s32.totalorder %s3869_s14, %s3870_s16  ;;  %p3877_p2 = scmp.lt.s32.totalorder %s3875_s10, %s3870_s16 }
  0x89   : > { %p3873_p5 = pnand %p3871_p3, %p4191_p12  ;;  %p3878_p10 = por %p3877_p2, %p3876_p11 }
  0x8b   : > { %p3874_p1 = pneg %p3873_p5 }
  0x8d   : > { %p3879_p13 = pnand %p3878_p10, %p3874_p1 }
  0x8f   : > { %3882 = shalt.err (!%p3879_p13)
}
  0x90   : > { %3591 = dma.hbm_to_vmem [thread:$0]  (!%p4178_p9), %s626_s29, 16, %s628_s5, %s4211_s12  }
  0x91   : > { %636 = sbr.rel (%p4140_p8) target bundleno = 3440 (0xd70), region = 92  ;;  %s4280_s15 = sand.u32 (!%p4140_p8), 1, %s3976_s28  }
  0x92   : > { %s2695_s18 = sshll.u32 (!%p4140_p8), %s4280_s15, 3  ;;  %s639_s3 = scalar_lea.sflag (!%p4140_p8), [#allocation4], %s4280_s15 }
  0x93   : > { %s642_s9 = scalar_lea.vmem (!%p4140_p8), [#allocation3], %s2695_s18 }
  0x96   : > { %3951 = dma.done.wait (%p4127_p4), %s639_s3, 128  }
  0x97   : > { %3953 = vsyncadd (%p4127_p4), %s639_s3, 4294967168  ;;  %s648_s23 = sand.u32 1, %s4118_s0   ;;  %s651_s12 = scalar_lea.vmem [#allocation6], %s4280_s15 }
  0x98   : > { %s649_s2 = scalar_lea.sflag [#allocation7], %s648_s23 }
  0x99   : > { %3955 = dma.done.wait (%p4127_p4), %s649_s2, 32  }
  0x9a   : > { %3957 = vsyncadd (%p4127_p4), %s649_s2, 4294967264  ;;  %s660_s21 = scalar_lea.vmem [#allocation8], %s4280_s15  ;;  %s667_s19 = scalar_lea.sflag [#allocation10], %s648_s23 }
  0x9b   : > { %s669_s22 = scalar_lea.vmem [#allocation9], %s4280_s15 }
  0x9c   : > { %3959 = dma.done.wait (%p4127_p4), %s667_s19, 32  }
  0x9d   : > { %3961 = vsyncadd (%p4127_p4), %s667_s19, 4294967264  ;;  %s678_s27 = scalar_lea.vmem [#allocation11], %s4280_s15  ;;  %p4898_p8 = scmp.eq.s32.totalorder %s4118_s0, 0 }
  0x9f   : > { %3963 = dma.done.wait (%p4898_p8), [#allocation13], 144   ;;  %p4899_p9 = pmov %p4898_p8 }
  0xa0   : > { %v3409_v0 = vld [vmem:[#allocation12] sm:$0xff]  ;;  %v759_v1 = vld [vmem:[%s642_s9] sm:$0xff]  ;;  %vm769_vm0 = vcmask 130048   ;;  %v3998_v5 = vmov 128.0   ;;  %v3417_v6 = vld [vmem:[%s4833_s6 + $0x38] sm:$0xff]  ;;  %vm1059_vm5 = vcmask 261120  }
  0xa1   : > { %3965 = vsyncadd (%p4899_p9), [#allocation13], 4294967152  ;;  %v760_v2 = vpack.c.bf16 %v759_v1, %v759_v1  ;;  %780 = vmatpush.bf16.msra.mxu0 %v3409_v0  ;;  %3661 = vrcp.f32 %v3998_v5  ;;  %v3425_v7 = vld [vmem:[%s4834_s7 + $0x38] sm:$0xff]  ;;  %889 = vmatpush.bf16.msra.mxu1 %v3417_v6  ;;  %v3416_v9 = vld [vmem:[%s4833_s6 + $0x30] sm:$0xff]  ;;  %vm1095_vm6 = vcmask 1043456   ;;  %vm1079_vm7 = vcmask 64512  }
  0xa2   : > { %v3433_v8 = vld [vmem:[%s4835_s8 + $0x38] sm:$0xff]  ;;  %966 = vmatpush.bf16.msra.mxu2 %v3425_v7  ;;  %v3424_v10 = vld [vmem:[%s4834_s7 + $0x30] sm:$0xff]  ;;  %v3415_v13 = vld [vmem:[%s4833_s6 + $0x28] sm:$0xff]  ;;  %vm1404_vm8 = vcmask 523520   ;;  %s4000_s16 = smov 64   ;;  %vm1697_vm9 = vcmask 785920  }
  0xa3   : > { %1043 = vmatpush.bf16.msra.mxu3 %v3433_v8  ;;  %v3432_v11 = vld [vmem:[%s4835_s8 + $0x30] sm:$0xff]  ;;  %v3423_v14 = vld [vmem:[%s4834_s7 + $0x28] sm:$0xff]  ;;  %v3414_v17 = vld [vmem:[%s4833_s6 + $0x20] sm:$0xff]  ;;  %s4900_s10 = sld [smem:[#allocation32_spill]]  ;;  %s4001_s13 = smov 96   ;;  %vm1990_vm10 = vcmask 1048320  }
  0xa4   : > { %2703 = vmatmul.msk.bf16.vlgmr.msra.gmra.mxu0 %vm769_vm0, %v760_v2  ;;  %v3431_v16 = vld [vmem:[%s4835_s8 + $0x28] sm:$0xff]  ;;  %v3422_v18 = vld [vmem:[%s4834_s7 + $0x20] sm:$0xff]  ;;  %v3413_v21 = vld [vmem:[%s4833_s6 + $0x18] sm:$0xff]  ;;  %s4705_s25 = smov 0  }
  0xa5   : > { %890 = vmatpush.bf16.msra.mxu1 %v3416_v9  ;;  %v3430_v20 = vld [vmem:[%s4835_s8 + $0x20] sm:$0xff]  ;;  %v3421_v22 = vld [vmem:[%s4834_s7 + $0x18] sm:$0xff]  ;;  %v3412_v25 = vld [vmem:[%s4833_s6 + $0x10] sm:$0xff] }
  0xa6   : > { %967 = vmatpush.bf16.msra.mxu2 %v3424_v10  ;;  %v3429_v24 = vld [vmem:[%s4835_s8 + $0x18] sm:$0xff]  ;;  %v3420_v26 = vld [vmem:[%s4834_s7 + $0x10] sm:$0xff]  ;;  %v3411_v29 = vld [vmem:[%s4833_s6 + $0x8] sm:$0xff] }
  0xa7   : > { %v3662_v12 = vpop.eup %3661  ;;  %1044 = vmatpush.bf16.msra.mxu3 %v3432_v11  ;;  %v3428_v28 = vld [vmem:[%s4835_s8 + $0x10] sm:$0xff]  ;;  %v3419_v30 = vld [vmem:[%s4834_s7 + $0x8] sm:$0xff]  ;;  %v3410_v37 = vld [vmem:[%s4833_s6] sm:$0xff] }
  0xa8   : > { %v791_v15 = vmul.f32 128.0, %v3662_v12  ;;  %vm795_vm1 = vweird.f32 %v3662_v12  ;;  %v3427_v32 = vld [vmem:[%s4835_s8 + $0x8] sm:$0xff]  ;;  %v3418_v38 = vld [vmem:[%s4834_s7] sm:$0xff]  ;;  %v3441_v40 = vld [vmem:[%s4833_s6 + $0x78] sm:$0xff] }
  0xa9   : > { %891 = vmatpush.bf16.msra.mxu1 %v3415_v13  ;;  %v3426_v39 = vld [vmem:[%s4835_s8] sm:$0xff]  ;;  %v3449_v41 = vld [vmem:[%s4834_s7 + $0x78] sm:$0xff]  ;;  %v3440_v43 = vld [vmem:[%s4833_s6 + $0x70] sm:$0xff] }
  0xaa   : > { %968 = vmatpush.bf16.msra.mxu2 %v3423_v14  ;;  %v792_v19 = vsub.f32 1.0, %v791_v15  ;;  %v3457_v42 = vld [vmem:[%s4835_s8 + $0x78] sm:$0xff]  ;;  %v3448_v44 = vld [vmem:[%s4834_s7 + $0x70] sm:$0xff]  ;;  %v3439_v46 = vld [vmem:[%s4833_s6 + $0x68] sm:$0xff] }
  0xab   : > { %1045 = vmatpush.bf16.msra.mxu3 %v3431_v16  ;;  %v3456_v45 = vld [vmem:[%s4835_s8 + $0x70] sm:$0xff]  ;;  %v3447_v47 = vld [vmem:[%s4834_s7 + $0x68] sm:$0xff]  ;;  %v3438_v49 = vld [vmem:[%s4833_s6 + $0x60] sm:$0xff] }
  0xac   : > { %v793_v23 = vmul.f32 %v3662_v12, %v792_v19  ;;  %v3455_v48 = vld [vmem:[%s4835_s8 + $0x68] sm:$0xff]  ;;  %v3446_v50 = vld [vmem:[%s4834_s7 + $0x60] sm:$0xff]  ;;  %v3437_v52 = vld [vmem:[%s4833_s6 + $0x58] sm:$0xff] }
  0xad   : > { %892 = vmatpush.bf16.msra.mxu1 %v3414_v17  ;;  %v3454_v51 = vld [vmem:[%s4835_s8 + $0x60] sm:$0xff]  ;;  %v3445_v53 = vld [vmem:[%s4834_s7 + $0x58] sm:$0xff]  ;;  %v3436_v55 = vld [vmem:[%s4833_s6 + $0x50] sm:$0xff] }
  0xae   : > { %969 = vmatpush.bf16.msra.mxu2 %v3422_v18  ;;  %v794_v27 = vadd.f32 %v3662_v12, %v793_v23  ;;  %v3453_v54 = vld [vmem:[%s4835_s8 + $0x58] sm:$0xff]  ;;  %v3444_v56 = vld [vmem:[%s4834_s7 + $0x50] sm:$0xff]  ;;  %v3435_v58 = vld [vmem:[%s4833_s6 + $0x48] sm:$0xff] }
  0xaf   : > { %1046 = vmatpush.bf16.msra.mxu3 %v3430_v20  ;;  %v3452_v57 = vld [vmem:[%s4835_s8 + $0x50] sm:$0xff]  ;;  %v3443_v59 = vld [vmem:[%s4834_s7 + $0x48] sm:$0xff]  ;;  %v3434_v61 = vld [vmem:[%s4833_s6 + $0x40] sm:$0xff] }
  0xb0   : > { %v4370_v31 = vsel %vm795_vm1, %v3662_v12, %v794_v27  ;;  %v3451_v60 = vld [vmem:[%s4835_s8 + $0x48] sm:$0xff]  ;;  %v3442_v62 = vld [vmem:[%s4834_s7 + $0x40] sm:$0xff]  ;;  %v3465_v18 = vld [vmem:[%s4833_s6 + $0xb8] sm:$0xff] }
  0xb1   : > { %893 = vmatpush.bf16.msra.mxu1 %v3413_v21  ;;  %v3450_v63 = vld [vmem:[%s4835_s8 + $0x40] sm:$0xff]  ;;  %v3473_v20 = vld [vmem:[%s4834_s7 + $0xb8] sm:$0xff]  ;;  %v3472_v23 = vld [vmem:[%s4834_s7 + $0xb0] sm:$0xff] }
  0xb2   : > { %970 = vmatpush.bf16.msra.mxu2 %v3421_v22  ;;  %v786_v6 = vld [vmem:[%s651_s12] sm:$0x1]  ;;  %v3481_v21 = vld [vmem:[%s4835_s8 + $0xb8] sm:$0xff]  ;;  %v3464_v22 = vld [vmem:[%s4833_s6 + $0xb0] sm:$0xff] }
  0xb3   : > { %1047 = vmatpush.bf16.msra.mxu3 %v3429_v24  ;;  %v815_v9 = vadd.f32 1.0, %v786_v6  ;;  %v3658_v14 = vld [vmem:[%s660_s21] ss:$0 sm:$0xff]  ;;  %v3480_v24 = vld [vmem:[%s4835_s8 + $0xb0] sm:$0xff]  ;;  %v3479_v27 = vld [vmem:[%s4835_s8 + $0xa8] sm:$0xff]  ;;  %s3999_s21 = smov 32  }
  0xb5   : > { %894 = vmatpush.bf16.msra.mxu1 %v3412_v25  ;;  %v817_v12 = vperm.slane %v815_v9, 0  ;;  %v3463_v25 = vld [vmem:[%s4833_s6 + $0xa8] sm:$0xff] }
  0xb6   : > { %971 = vmatpush.bf16.msra.mxu2 %v3420_v26  ;;  %v3471_v26 = vld [vmem:[%s4834_s7 + $0xa8] sm:$0xff] }
  0xb7   : > { %1048 = vmatpush.bf16.msra.mxu3 %v3428_v28  ;;  %v3462_v28 = vld [vmem:[%s4833_s6 + $0xa0] sm:$0xff] }
  0xb9   : > { %895 = vmatpush.bf16.msra.mxu1 %v3411_v29  ;;  %v3470_v29 = vld [vmem:[%s4834_s7 + $0xa0] sm:$0xff] }
  0xba   : > { %972 = vmatpush.bf16.msra.mxu2 %v3419_v30  ;;  %v3478_v30 = vld [vmem:[%s4835_s8 + $0xa0] sm:$0xff] }
  0xbb   : > { %1049 = vmatpush.bf16.msra.mxu3 %v3427_v32  ;;  %v3461_v32 = vld [vmem:[%s4833_s6 + $0x98] sm:$0xff] }
  0xbd   : > { %896 = vmatpush.bf16.msra.mxu1 %v3410_v37  ;;  %v3476_v37 = vld [vmem:[%s4835_s8 + $0x90] sm:$0xff] }
  0xbe   : > { %973 = vmatpush.bf16.msra.mxu2 %v3418_v38  ;;  %v3459_v38 = vld [vmem:[%s4833_s6 + $0x88] sm:$0xff] }
  0xbf   : > { %1050 = vmatpush.bf16.msra.mxu3 %v3426_v39  ;;  %v3467_v39 = vld [vmem:[%s4834_s7 + $0x88] sm:$0xff] }
  0xc1   : > { %1178 = vmatpush.bf16.msrb.mxu1 %v3441_v40  ;;  %v3475_v40 = vld [vmem:[%s4835_s8 + $0x88] sm:$0xff] }
  0xc2   : > { %1256 = vmatpush.bf16.msrb.mxu2 %v3449_v41  ;;  %v3458_v41 = vld [vmem:[%s4833_s6 + $0x80] sm:$0xff] }
  0xc3   : > { %1334 = vmatpush.bf16.msrb.mxu3 %v3457_v42  ;;  %v3466_v42 = vld [vmem:[%s4834_s7 + $0x80] sm:$0xff] }
  0xc5   : > { %1179 = vmatpush.bf16.msrb.mxu1 %v3440_v43  ;;  %v3474_v43 = vld [vmem:[%s4835_s8 + $0x80] sm:$0xff] }
  0xc6   : > { %1257 = vmatpush.bf16.msrb.mxu2 %v3448_v44  ;;  %v3489_v44 = vld [vmem:[%s4833_s6 + $0xf8] sm:$0xff] }
  0xc7   : > { %1335 = vmatpush.bf16.msrb.mxu3 %v3456_v45  ;;  %v3497_v45 = vld [vmem:[%s4834_s7 + $0xf8] sm:$0xff] }
  0xc9   : > { %1180 = vmatpush.bf16.msrb.mxu1 %v3439_v46  ;;  %v3505_v46 = vld [vmem:[%s4835_s8 + $0xf8] sm:$0xff] }
  0xca   : > { %1258 = vmatpush.bf16.msrb.mxu2 %v3447_v47  ;;  %v3488_v47 = vld [vmem:[%s4833_s6 + $0xf0] sm:$0xff] }
  0xcb   : > { %1336 = vmatpush.bf16.msrb.mxu3 %v3455_v48  ;;  %v3496_v48 = vld [vmem:[%s4834_s7 + $0xf0] sm:$0xff] }
  0xcd   : > { %1181 = vmatpush.bf16.msrb.mxu1 %v3438_v49  ;;  %v3504_v49 = vld [vmem:[%s4835_s8 + $0xf0] sm:$0xff] }
  0xce   : > { %1259 = vmatpush.bf16.msrb.mxu2 %v3446_v50  ;;  %v3487_v50 = vld [vmem:[%s4833_s6 + $0xe8] sm:$0xff] }
  0xcf   : > { %1337 = vmatpush.bf16.msrb.mxu3 %v3454_v51  ;;  %v3495_v51 = vld [vmem:[%s4834_s7 + $0xe8] sm:$0xff] }
  0xd1   : > { %1182 = vmatpush.bf16.msrb.mxu1 %v3437_v52  ;;  %v3503_v52 = vld [vmem:[%s4835_s8 + $0xe8] sm:$0xff] }
  0xd2   : > { %1260 = vmatpush.bf16.msrb.mxu2 %v3445_v53  ;;  %v3486_v53 = vld [vmem:[%s4833_s6 + $0xe0] sm:$0xff] }
  0xd3   : > { %1338 = vmatpush.bf16.msrb.mxu3 %v3453_v54  ;;  %v3494_v54 = vld [vmem:[%s4834_s7 + $0xe0] sm:$0xff] }
  0xd5   : > { %1183 = vmatpush.bf16.msrb.mxu1 %v3436_v55  ;;  %v3502_v55 = vld [vmem:[%s4835_s8 + $0xe0] sm:$0xff] }
  0xd6   : > { %1261 = vmatpush.bf16.msrb.mxu2 %v3444_v56  ;;  %v3485_v56 = vld [vmem:[%s4833_s6 + $0xd8] sm:$0xff] }
  0xd7   : > { %1339 = vmatpush.bf16.msrb.mxu3 %v3452_v57  ;;  %v3493_v57 = vld [vmem:[%s4834_s7 + $0xd8] sm:$0xff] }
  0xd9   : > { %1184 = vmatpush.bf16.msrb.mxu1 %v3435_v58  ;;  %v3501_v58 = vld [vmem:[%s4835_s8 + $0xd8] sm:$0xff] }
  0xda   : > { %1262 = vmatpush.bf16.msrb.mxu2 %v3443_v59  ;;  %v3484_v59 = vld [vmem:[%s4833_s6 + $0xd0] sm:$0xff] }
  0xdb   : > { %1340 = vmatpush.bf16.msrb.mxu3 %v3451_v60  ;;  %v3492_v60 = vld [vmem:[%s4834_s7 + $0xd0] sm:$0xff] }
  0xdd   : > { %1185 = vmatpush.bf16.msrb.mxu1 %v3434_v61  ;;  %v3500_v61 = vld [vmem:[%s4835_s8 + $0xd0] sm:$0xff] }
  0xde   : > { %1263 = vmatpush.bf16.msrb.mxu2 %v3442_v62  ;;  %v3483_v62 = vld [vmem:[%s4833_s6 + $0xc8] sm:$0xff] }
  0xdf   : > { %1341 = vmatpush.bf16.msrb.mxu3 %v3450_v63  ;;  %v3491_v63 = vld [vmem:[%s4834_s7 + $0xc8] sm:$0xff] }
 0x121   : > { %v4307_v3 = vpop.f32.mrf.mxu0 }
 0x122   : > { %788 = vadd.xlane.f32.xlu0 %v4307_v3 }
 0x129   : > { %v784_v4 = vpop.f32.mrf.mxu0 }
 0x195   : > { %v789_v33 = vpop.xlane.xlu0 %788 }
 0x196   : > { %v797_v34 = vmul.f32 %v4370_v31, %v789_v33  ;;  %v3469_v33 = vld [vmem:[%s4834_s7 + $0x98] sm:$0xff] }
 0x198   : > { %v4377_v35 = vsub.f32 %v4307_v3, %v797_v34  ;;  %v3477_v34 = vld [vmem:[%s4835_s8 + $0x98] sm:$0xff] }
 0x19a   : > { %v799_v36 = vmul.f32 %v4377_v35, %v4377_v35 }
 0x19c   : > { %800 = vadd.xlane.f32.xlu0 %v799_v36  ;;  %v3468_v36 = vld [vmem:[%s4834_s7 + $0x90] sm:$0xff] }
 0x20f   : > { %v801_v0 = vpop.xlane.xlu0 %800 }
 0x210   : > { %v802_v1 = vmul.f32 %v801_v0, %v4370_v31  ;;  %v3499_v0 = vld [vmem:[%s4835_s8 + $0xc8] sm:$0xff] }
 0x212   : > { %v803_v2 = vadd.f32 1e-05, %v802_v1  ;;  %v3482_v1 = vld [vmem:[%s4833_s6 + $0xc0] sm:$0xff] }
 0x214   : > { %3663 = vrsqrt.f32 %v803_v2  ;;  %vm810_vm3 = vweird.f32 %v803_v2 }
 0x21a   : > { %v3664_v4 = vpop.eup %3663 }
 0x21b   : > { %v805_v5 = vmul.f32 %v3664_v4, %v803_v2  ;;  %vm811_vm2 = vweird.f32 %v3664_v4  ;;  %v3490_v2 = vld [vmem:[%s4834_s7 + $0xc0] sm:$0xff] }
 0x21c   : > { %vm812_vm4 = vmor %vm810_vm3, %vm811_vm2 }
 0x21d   : > { %v806_v7 = vmul.f32 %v3664_v4, %v805_v5 }
 0x21f   : > { %v807_v8 = vmul.f32 0.5, %v806_v7 }
 0x221   : > { %v808_v10 = vsub.f32 1.5, %v807_v8 }
 0x223   : > { %v809_v11 = vmul.f32 %v3664_v4, %v808_v10 }
 0x225   : > { %v813_v13 = vsel %vm812_vm4, %v3664_v4, %v809_v11  ;;  %v3498_v4 = vld [vmem:[%s4835_s8 + $0xc0] sm:$0xff] }
 0x226   : > { %v814_v15 = vmul.f32 %v813_v13, %v4377_v35  ;;  %v3460_v35 = vld [vmem:[%s4833_s6 + $0x90] sm:$0xff] }
 0x228   : > { %v819_v16 = vmul.f32 %v817_v12, %v814_v15 }
 0x22a   : > { %v823_v17 = vadd.f32 %v3658_v14, %v819_v16 }
 0x22c   : > { %v4471_v19 = vpack.c.bf16 %v823_v17, %v823_v17 }
 0x22e   : > { %897 = vmatmul.bf16.vlgmr.msra.gmra.mxu1 %v4471_v19  ;;  %974 = vmatmul.bf16.vlgmr.msra.gmra.mxu2 %v4471_v19 }
 0x22f   : > { %1051 = vmatmul.bf16.vlgmr.msra.gmra.mxu3 %v4471_v19  ;;  %1471 = vmatpush.bf16.msra.mxu1 %v3465_v18 }
 0x230   : > { %1549 = vmatpush.bf16.msra.mxu2 %v3473_v20  ;;  %1627 = vmatpush.bf16.msra.mxu3 %v3481_v21 }
 0x233   : > { %1472 = vmatpush.bf16.msra.mxu1 %v3464_v22 }
 0x234   : > { %1550 = vmatpush.bf16.msra.mxu2 %v3472_v23  ;;  %1628 = vmatpush.bf16.msra.mxu3 %v3480_v24 }
 0x237   : > { %1473 = vmatpush.bf16.msra.mxu1 %v3463_v25 }
 0x238   : > { %1551 = vmatpush.bf16.msra.mxu2 %v3471_v26  ;;  %1629 = vmatpush.bf16.msra.mxu3 %v3479_v27 }
 0x23b   : > { %1474 = vmatpush.bf16.msra.mxu1 %v3462_v28 }
 0x23c   : > { %1552 = vmatpush.bf16.msra.mxu2 %v3470_v29  ;;  %1630 = vmatpush.bf16.msra.mxu3 %v3478_v30 }
 0x23e   : > { %1186 = vmatmul.bf16.vlgmr.msrb.gmra.mxu1 %v4471_v19  ;;  %1264 = vmatmul.bf16.vlgmr.msrb.gmra.mxu2 %v4471_v19 }
 0x23f   : > { %1342 = vmatmul.bf16.vlgmr.msrb.gmra.mxu3 %v4471_v19  ;;  %1475 = vmatpush.bf16.msra.mxu1 %v3461_v32 }
 0x240   : > { %1553 = vmatpush.bf16.msra.mxu2 %v3469_v33  ;;  %1631 = vmatpush.bf16.msra.mxu3 %v3477_v34 }
 0x243   : > { %1476 = vmatpush.bf16.msra.mxu1 %v3460_v35 }
 0x244   : > { %1554 = vmatpush.bf16.msra.mxu2 %v3468_v36  ;;  %1632 = vmatpush.bf16.msra.mxu3 %v3476_v37 }
 0x247   : > { %1477 = vmatpush.bf16.msra.mxu1 %v3459_v38 }
 0x248   : > { %1555 = vmatpush.bf16.msra.mxu2 %v3467_v39  ;;  %1633 = vmatpush.bf16.msra.mxu3 %v3475_v40 }
 0x24b   : > { %1478 = vmatpush.bf16.msra.mxu1 %v3458_v41 }
 0x24c   : > { %1556 = vmatpush.bf16.msra.mxu2 %v3466_v42  ;;  %1634 = vmatpush.bf16.msra.mxu3 %v3474_v43 }
 0x24e   : > { %1479 = vmatmul.bf16.vlgmr.msra.gmra.mxu1 %v4471_v19 }
 0x24f   : > { %1764 = vmatpush.bf16.msrb.mxu1 %v3489_v44  ;;  %1557 = vmatmul.bf16.vlgmr.msra.gmra.mxu2 %v4471_v19 }
 0x250   : > { %1842 = vmatpush.bf16.msrb.mxu2 %v3497_v45  ;;  %1920 = vmatpush.bf16.msrb.mxu3 %v3505_v46 }
 0x251   : > { %1635 = vmatmul.bf16.vlgmr.msra.gmra.mxu3 %v4471_v19 }
 0x253   : > { %1765 = vmatpush.bf16.msrb.mxu1 %v3488_v47 }
 0x254   : > { %1843 = vmatpush.bf16.msrb.mxu2 %v3496_v48  ;;  %1921 = vmatpush.bf16.msrb.mxu3 %v3504_v49 }
 0x257   : > { %1766 = vmatpush.bf16.msrb.mxu1 %v3487_v50 }
 0x258   : > { %1844 = vmatpush.bf16.msrb.mxu2 %v3495_v51  ;;  %1922 = vmatpush.bf16.msrb.mxu3 %v3503_v52 }
 0x25b   : > { %1767 = vmatpush.bf16.msrb.mxu1 %v3486_v53 }
 0x25c   : > { %1845 = vmatpush.bf16.msrb.mxu2 %v3494_v54  ;;  %1923 = vmatpush.bf16.msrb.mxu3 %v3502_v55 }
 0x25f   : > { %1768 = vmatpush.bf16.msrb.mxu1 %v3485_v56 }
 0x260   : > { %1846 = vmatpush.bf16.msrb.mxu2 %v3493_v57  ;;  %1924 = vmatpush.bf16.msrb.mxu3 %v3501_v58 }
 0x263   : > { %1769 = vmatpush.bf16.msrb.mxu1 %v3484_v59 }
 0x264   : > { %1847 = vmatpush.bf16.msrb.mxu2 %v3492_v60  ;;  %1925 = vmatpush.bf16.msrb.mxu3 %v3500_v61 }
 0x267   : > { %1770 = vmatpush.bf16.msrb.mxu1 %v3483_v62 }
 0x268   : > { %1848 = vmatpush.bf16.msrb.mxu2 %v3491_v63  ;;  %1926 = vmatpush.bf16.msrb.mxu3 %v3499_v0 }
 0x26b   : > { %1771 = vmatpush.bf16.msrb.mxu1 %v3482_v1 }
 0x26c   : > { %1849 = vmatpush.bf16.msrb.mxu2 %v3490_v2  ;;  %1927 = vmatpush.bf16.msrb.mxu3 %v3498_v4 }
 0x26e   : > { %1772 = vmatmul.bf16.vlgmr.msrb.gmra.mxu1 %v4471_v19 }
 0x26f   : > { %1850 = vmatmul.bf16.vlgmr.msrb.gmra.mxu2 %v4471_v19  ;;  %1928 = vmatmul.bf16.vlgmr.msrb.gmra.mxu3 %v4471_v19 }
 0x2ab   : > { %v898_v5 = vpop.f32.mrf.mxu1 }
 0x2ac   : > { %v1056_v14 = vpack.c.bf16 %v898_v5, %v898_v5 }
 0x2b1   : > { %v975_v6 = vpop.f32.mrf.mxu2 }
 0x2b2   : > { %v1057_v7 = vpack.c.bf16 %v975_v6, %v975_v6  ;;  %v1052_v8 = vpop.f32.mrf.mxu3 }
 0x2b3   : > { %v1058_v9 = vpack.c.bf16 %v1052_v8, %v1052_v8  ;;  %v900_v10 = vpop.f32.mrf.mxu1 }
 0x2b4   : > { %v1064_v11 = vsel %vm1059_vm5, %v1057_v7, 0 }
 0x2b5   : > { %v1097_v12 = vsel %vm1095_vm6, %v1058_v9, 0  ;;  %1073 = vmatpush.bf16.xpose.msrb.mxu0 %v1064_v11 }
 0x2b9   : > { %v977_v13 = vpop.f32.mrf.mxu2 }
 0x2ba   : > { %v1054_v15 = vpop.f32.mrf.mxu3 }
 0x2bb   : > { %v1187_v16 = vpop.f32.mrf.mxu1 }
 0x2bc   : > { %2800 = vmatmul.msk.bf16.vlgmr.msrb.gmra.mxu0 %vm1059_vm5, %v1056_v14  ;;  %v1347_v56 = vpack.c.bf16 %v1187_v16, %v1187_v16 }
 0x2bd   : > { %1106 = vmatpush.bf16.msra.mxu0 %v1097_v12 }
 0x2c1   : > { %v1265_v17 = vpop.f32.mrf.mxu2 }
 0x2c2   : > { %v1348_v18 = vpack.c.bf16 %v1265_v17, %v1265_v17  ;;  %v1343_v19 = vpop.f32.mrf.mxu3 }
 0x2c3   : > { %v1349_v20 = vpack.c.bf16 %v1343_v19, %v1343_v19  ;;  %v1189_v21 = vpop.f32.mrf.mxu1 }
 0x2c4   : > { %v1354_v22 = vsel %vm1059_vm5, %v1348_v18, 0 }
 0x2c5   : > { %v1385_v23 = vsel %vm1095_vm6, %v1349_v20, 0  ;;  %1363 = vmatpush.bf16.xpose.msrb.mxu0 %v1354_v22 }
 0x2c9   : > { %v1267_v24 = vpop.f32.mrf.mxu2 }
 0x2ca   : > { %v1345_v25 = vpop.f32.mrf.mxu3 }
 0x2cb   : > { %v4631_v26 = vpop.f32.mrf.mxu1 }
 0x2cc   : > { %v1640_v10 = vpack.c.bf16 %v4631_v26, %v4631_v26 }
 0x2d2   : > { %v1558_v27 = vpop.f32.mrf.mxu2 }
 0x2d3   : > { %v1482_v30 = vpop.f32.mrf.mxu1  ;;  %v1641_v55 = vpack.c.bf16 %v1558_v27, %v1558_v27 }
 0x2d4   : > { %v1636_v28 = vpop.f32.mrf.mxu3 }
 0x2d5   : > { %v1642_v29 = vpack.c.bf16 %v1636_v28, %v1636_v28  ;;  %v1647_v57 = vsel %vm1059_vm5, %v1641_v55, 0 }
 0x2d7   : > { %v1678_v32 = vsel %vm1095_vm6, %v1642_v29, 0 }
 0x2da   : > { %v1560_v33 = vpop.f32.mrf.mxu2 }
 0x2dc   : > { %v1638_v34 = vpop.f32.mrf.mxu3 }
 0x2eb   : > { %v4634_v35 = vpop.f32.mrf.mxu1 }
 0x2ec   : > { %v1933_v27 = vpack.c.bf16 %v4634_v35, %v4634_v35 }
 0x2f2   : > { %v1851_v36 = vpop.f32.mrf.mxu2  ;;  %v1929_v37 = vpop.f32.mrf.mxu3 }
 0x2f3   : > { %v1935_v38 = vpack.c.bf16 %v1929_v37, %v1929_v37  ;;  %v1775_v39 = vpop.f32.mrf.mxu1  ;;  %v1934_v9 = vpack.c.bf16 %v1851_v36, %v1851_v36 }
 0x2f5   : > { %v4637_v40 = vsel %vm1095_vm6, %v1935_v38, 0  ;;  %v1940_v11 = vsel %vm1059_vm5, %v1934_v9, 0 }
 0x2fa   : > { %v1853_v41 = vpop.f32.mrf.mxu2  ;;  %v1931_v42 = vpop.f32.mrf.mxu3 }
 0x339   : > { %v1075_v43 = vpop.f32.mrf.mxu0 }
 0x33a   : > { %v1080_v44 = vsel %vm1079_vm7, %v1075_v43, -inf }
 0x33b   : > { %1081 = vmax.xlane.f32.xlu1 %v1080_v44  ;;  %v3513_v44 = vld [vmem:[%s4900_s10 + $0x38] sm:$0xff] }
 0x33c   : > { %2058 = vmatpush.bf16.msra.mxu1 %v3513_v44 }
 0x341   : > { %v1077_v45 = vpop.f32.mrf.mxu0 }
 0x342   : > { %v3512_v45 = vld [vmem:[%s4900_s10 + $0x30] sm:$0xff] }
 0x343   : > { %2059 = vmatpush.bf16.msra.mxu1 %v3512_v45 }
 0x3ae   : > { %v1082_v46 = vpop.xlane.xlu1 %1081 }
 0x3af   : > { %v1083_v47 = vsub.f32 %v1075_v43, %v1082_v46  ;;  %v3511_v46 = vld [vmem:[%s4900_s10 + $0x28] sm:$0xff] }
 0x3b0   : > { %2060 = vmatpush.bf16.msra.mxu1 %v3511_v46 }
 0x3b1   : > { %v1084_v48 = vmul.f32 1.442695, %v1083_v47  ;;  %v3510_v47 = vld [vmem:[%s4900_s10 + $0x20] sm:$0xff] }
 0x3b3   : > { %3665 = vpow2.f32 %v1084_v48  ;;  %v3509_v48 = vld [vmem:[%s4900_s10 + $0x18] sm:$0xff] }
 0x3b4   : > { %2061 = vmatpush.bf16.msra.mxu1 %v3510_v47 }
 0x3b8   : > { %2062 = vmatpush.bf16.msra.mxu1 %v3509_v48 }
 0x3b9   : > { %v3666_v49 = vpop.eup %3665 }
 0x3ba   : > { %v1086_v50 = vsel %vm1079_vm7, %v3666_v49, 0.0 }
 0x3bb   : > { %1087 = vadd.xlane.f32.xlu1 %v1086_v50 }
 0x42e   : > { %v1088_v51 = vpop.xlane.xlu1 %1087 }
 0x42f   : > { %3667 = vrcp.f32 %v1088_v51 }
 0x435   : > { %v3668_v52 = vpop.eup %3667 }
 0x436   : > { %v1090_v53 = vmul.f32 %v3668_v52, %v3666_v49  ;;  %v3508_v49 = vld [vmem:[%s4900_s10 + $0x10] sm:$0xff]  ;;  %v3507_v52 = vld [vmem:[%s4900_s10 + $0x8] sm:$0xff] }
 0x437   : > { %2063 = vmatpush.bf16.msra.mxu1 %v3508_v49 }
 0x438   : > { %v1091_v54 = vpack.c.bf16 %v1090_v53, %v1090_v53  ;;  %v3506_v53 = vld [vmem:[%s4900_s10] sm:$0xff] }
 0x43a   : > { %2801 = vmatmul.msk.bf16.vlgmr.msra.gmra.mxu0 %vm1079_vm7, %v1091_v54 }
 0x43b   : > { %1394 = vmatpush.bf16.msra.mxu0 %v1385_v23  ;;  %2064 = vmatpush.bf16.msra.mxu1 %v3507_v52 }
 0x43f   : > { %2065 = vmatpush.bf16.msra.mxu1 %v3506_v53 }
 0x44a   : > { %2946 = vmatmul.msk.bf16.vlgmr.msrb.gmra.mxu0 %vm1059_vm5, %v1347_v56 }
 0x44b   : > { %1656 = vmatpush.bf16.xpose.msrb.mxu0 %v1647_v57  ;;  %v3659_v57 = vld [vmem:[#allocation14] ss:$0 sm:$0xff] }
 0x4b7   : > { %v1108_v58 = vpop.f32.mrf.mxu0 }
 0x4b8   : > { %1112 = vst.msk [vmem:[#allocation2] sm:$0xff] %vm1059_vm5, %v1108_v58 }
 0x4bf   : > { %v1110_v59 = vpop.f32.mrf.mxu0 }
 0x4c7   : > { %v1365_v60 = vpop.f32.mrf.mxu0 }
 0x4c8   : > { %v1369_v61 = vsel %vm1079_vm7, %v1365_v60, -inf }
 0x4c9   : > { %1370 = vmax.xlane.f32.xlu2 %v1369_v61 }
 0x4cf   : > { %v1367_v62 = vpop.f32.mrf.mxu0 }
 0x53c   : > { %v1371_v63 = vpop.xlane.xlu2 %1370 }
 0x53d   : > { %v1372_v0 = vsub.f32 %v1365_v60, %v1371_v63 }
 0x53f   : > { %v1373_v1 = vmul.f32 1.442695, %v1372_v0 }
 0x541   : > { %3669 = vpow2.f32 %v1373_v1 }
 0x547   : > { %v3670_v2 = vpop.eup %3669 }
 0x548   : > { %v1375_v4 = vsel %vm1079_vm7, %v3670_v2, 0.0 }
 0x549   : > { %1376 = vadd.xlane.f32.xlu2 %v1375_v4 }
 0x5bc   : > { %v1377_v5 = vpop.xlane.xlu2 %1376 }
 0x5bd   : > { %3671 = vrcp.f32 %v1377_v5 }
 0x5c3   : > { %v3672_v6 = vpop.eup %3671 }
 0x5c4   : > { %v1379_v7 = vmul.f32 %v3672_v6, %v3670_v2 }
 0x5c6   : > { %v1380_v8 = vpack.c.bf16 %v1379_v7, %v1379_v7  ;;  %v2077_v7 = vld [vmem:[%s669_s22] sm:$0x1]  ;;  %s4701_s22 = scalar_lea.vmem [#allocation15], %s2695_s18 }
 0x5c8   : > { %2947 = vmatmul.msk.bf16.vlgmr.msra.gmra.mxu0 %vm1079_vm7, %v1380_v8 }
 0x5c9   : > { %1687 = vmatpush.bf16.msra.mxu0 %v1678_v32 }
 0x5d8   : > { %3092 = vmatmul.msk.bf16.vlgmr.msrb.gmra.mxu0 %vm1059_vm5, %v1640_v10  ;;  %v2099_v10 = vadd.f32 1.0, %v2077_v7 }
 0x5d9   : > { %1949 = vmatpush.bf16.xpose.msrb.mxu0 %v1940_v11 }
 0x645   : > { %v1396_v12 = vpop.f32.mrf.mxu0 }
 0x64d   : > { %v1398_v13 = vpop.f32.mrf.mxu0 }
 0x64e   : > { %v2101_v13 = vperm.slane %v2099_v10, 0 }
 0x655   : > { %v1658_v14 = vpop.f32.mrf.mxu0 }
 0x656   : > { %v1662_v15 = vsel %vm1079_vm7, %v1658_v14, -inf }
 0x657   : > { %1663 = vmax.xlane.f32.xlu0 %v1662_v15 }
 0x65d   : > { %v1660_v16 = vpop.f32.mrf.mxu0 }
 0x6ca   : > { %v1664_v17 = vpop.xlane.xlu0 %1663 }
 0x6cb   : > { %v1665_v18 = vsub.f32 %v1658_v14, %v1664_v17 }
 0x6cd   : > { %v1666_v19 = vmul.f32 1.442695, %v1665_v18 }
 0x6cf   : > { %3673 = vpow2.f32 %v1666_v19  ;;  %v4703_v19 = vmov 0.0  }
 0x6d5   : > { %v3674_v20 = vpop.eup %3673 }
 0x6d6   : > { %v1668_v21 = vsel %vm1079_vm7, %v3674_v20, 0.0 }
 0x6d7   : > { %1669 = vadd.xlane.f32.xlu1 %v1668_v21 }
 0x6f0   : > { %1401 = vrot.lane.b32.xlu1 %v1396_v12, %s3999_s21 }
 0x74a   : > { %v1670_v22 = vpop.xlane.xlu1 %1669 }
 0x74b   : > { %3675 = vrcp.f32 %v1670_v22 }
 0x751   : > { %v3676_v23 = vpop.eup %3675 }
 0x752   : > { %v1672_v24 = vmul.f32 %v3676_v23, %v3674_v20 }
 0x754   : > { %v1673_v25 = vpack.c.bf16 %v1672_v24, %v1672_v24 }
 0x756   : > { %3093 = vmatmul.msk.bf16.vlgmr.msra.gmra.mxu0 %vm1079_vm7, %v1673_v25 }
 0x757   : > { %1980 = vmatpush.bf16.msra.mxu0 %v4637_v40 }
 0x762   : > { %v1402_v26 = vpop.permute.xlu1 %1401 }
 0x763   : > { %1405 = vst.msk [vmem:[#allocation2] sm:$0xff] %vm1404_vm8, %v1402_v26 }
 0x766   : > { %3238 = vmatmul.msk.bf16.vlgmr.msrb.gmra.mxu0 %vm1059_vm5, %v1933_v27 }
 0x7d3   : > { %v1689_v28 = vpop.f32.mrf.mxu0 }
 0x7db   : > { %v1691_v29 = vpop.f32.mrf.mxu0 }
 0x7e3   : > { %v1951_v30 = vpop.f32.mrf.mxu0 }
 0x7e4   : > { %v1955_v32 = vsel %vm1079_vm7, %v1951_v30, -inf }
 0x7e5   : > { %1956 = vmax.xlane.f32.xlu2 %v1955_v32 }
 0x7eb   : > { %v1953_v33 = vpop.f32.mrf.mxu0 }
 0x7fd   : > { %1694 = vrot.lane.b32.xlu2 %v1689_v28, %s4000_s16 }
 0x858   : > { %v1957_v34 = vpop.xlane.xlu2 %1956 }
 0x859   : > { %v1958_v36 = vsub.f32 %v1951_v30, %v1957_v34 }
 0x85b   : > { %v1959_v37 = vmul.f32 1.442695, %v1958_v36 }
 0x85d   : > { %3677 = vpow2.f32 %v1959_v37 }
 0x860   : > { %v1695_v38 = vpop.permute.xlu2 %1694 }
 0x861   : > { %1698 = vst.msk [vmem:[#allocation2] sm:$0xff] %vm1697_vm9, %v1695_v38 }
 0x863   : > { %v3678_v39 = vpop.eup %3677 }
 0x864   : > { %v1961_v35 = vsel %vm1079_vm7, %v3678_v39, 0.0 }
 0x865   : > { %1962 = vadd.xlane.f32.xlu0 %v1961_v35 }
 0x8d8   : > { %v1963_v40 = vpop.xlane.xlu0 %1962 }
 0x8d9   : > { %3679 = vrcp.f32 %v1963_v40 }
 0x8df   : > { %v3680_v41 = vpop.eup %3679 }
 0x8e0   : > { %v1965_v42 = vmul.f32 %v3680_v41, %v3678_v39 }
 0x8e2   : > { %v1966_v43 = vpack.c.bf16 %v1965_v42, %v1965_v42 }
 0x8e4   : > { %3239 = vmatmul.msk.bf16.vlgmr.msra.gmra.mxu0 %vm1079_vm7, %v1966_v43 }
 0x961   : > { %v1982_v50 = vpop.f32.mrf.mxu0 }
 0x962   : > { %1987 = vrot.lane.b32.xlu0 %v1982_v50, %s4001_s13 }
 0x969   : > { %v1984_v51 = vpop.f32.mrf.mxu0 }
 0x9d4   : > { %v1988_v54 = vpop.permute.xlu0 %1987 }
 0x9d5   : > { %1991 = vst.msk [vmem:[#allocation2] sm:$0xff] %vm1990_vm10, %v1988_v54 }
 0x9dc   : > { %v1992_v55 = vld [vmem:[#allocation2] sm:$0xff] }
 0x9dd   : > { %v1993_v56 = vpack.c.bf16 %v1992_v55, %v1992_v55 }
 0x9df   : > { %2066 = vmatmul.bf16.vlgmr.msra.gmra.mxu1 %v1993_v56 }
 0xa5c   : > { %v2067_v58 = vpop.f32.mrf.mxu1 }
 0xa5d   : > { %v2071_v59 = vadd.f32 %v2067_v58, %v4307_v3 }
 0xa5f   : > { %v4687_v60 = vadd.f32 %v3659_v57, %v2071_v59 }
 0xa61   : > { %2079 = vadd.xlane.f32.xlu2 %v4687_v60 }
 0xa64   : > { %v2069_v61 = vpop.f32.mrf.mxu1 }
 0xad4   : > { %v2080_v62 = vpop.xlane.xlu2 %2079 }
 0xad5   : > { %v2081_v63 = vmul.f32 %v2080_v62, %v4370_v31 }
 0xad7   : > { %v2082_v0 = vsub.f32 %v4687_v60, %v2081_v63 }
 0xad9   : > { %v2083_v1 = vmul.f32 %v2082_v0, %v2082_v0 }
 0xadb   : > { %2084 = vadd.xlane.f32.xlu1 %v2083_v1 }
 0xb4e   : > { %v2085_v2 = vpop.xlane.xlu1 %2084 }
 0xb4f   : > { %v2086_v4 = vmul.f32 %v2085_v2, %v4370_v31  ;;  %v3660_v31 = vld [vmem:[%s678_s27] ss:$0 sm:$0xff] }
 0xb51   : > { %v2087_v5 = vadd.f32 1e-05, %v2086_v4 }
 0xb53   : > { %3681 = vrsqrt.f32 %v2087_v5  ;;  %vm2094_vm12 = vweird.f32 %v2087_v5 }
 0xb59   : > { %v3682_v6 = vpop.eup %3681 }
 0xb5a   : > { %v2089_v3 = vmul.f32 %v3682_v6, %v2087_v5  ;;  %vm2095_vm11 = vweird.f32 %v3682_v6 }
 0xb5b   : > { %vm2096_vm13 = vmor %vm2094_vm12, %vm2095_vm11 }
 0xb5c   : > { %v2090_v8 = vmul.f32 %v3682_v6, %v2089_v3 }
 0xb5e   : > { %v2091_v9 = vmul.f32 0.5, %v2090_v8 }
 0xb60   : > { %v2092_v11 = vsub.f32 1.5, %v2091_v9 }
 0xb62   : > { %v2093_v12 = vmul.f32 %v3682_v6, %v2092_v11 }
 0xb64   : > { %v2097_v14 = vsel %vm2096_vm13, %v3682_v6, %v2093_v12 }
 0xb65   : > { %v2098_v15 = vmul.f32 %v2097_v14, %v2082_v0 }
 0xb67   : > { %v2103_v16 = vmul.f32 %v2101_v13, %v2098_v15 }
 0xb69   : > { %v2107_v17 = vadd.f32 %v3660_v31, %v2103_v16 }
 0xb6b   : > { %v4697_v18 = vpack.c.bf16 %v2107_v17, %v2107_v17 }
 0xb6c LB: >> { %s4714_s27 = sshll.u32 %s3992_s25, 6  ;;  %s4901_s18 = sld [smem:[#allocation37_spill]]  ;;  %s3992_s25 = sphi %s4705_s25, %s2114_s25   ;;  %v3988_v19 = vphi %v4703_v19, %v4906_v19  }
 0xb6d   : >> { %s4902_s23 = sld [smem:[#allocation36_spill]] }
 0xb6e   : >> { %s4903_s29 = sld [smem:[#allocation34_spill]] }
 0xb6f   : >> { %s4904_s14 = sld [smem:[#allocation35_spill]] }
 0xb70   : >> { %s4905_s17 = sld [smem:[#allocation38_spill]] }
 0xb72   : >> { %s2219_s26 = scalar_lea.vmem %s4901_s18, %s3992_s25 }
 0xb73   : >> { %s2202_s2 = scalar_lea.vmem %s4902_s23, %s4714_s27  ;;  %v3683_v39 = vld [vmem:[%s2219_s26] ss:$0 sm:$0xff] }
 0xb74   : >> { %s2118_s12 = scalar_lea.vmem %s4903_s29, %s4714_s27  ;;  %v3531_v20 = vld [vmem:[%s2202_s2 + $0x38] sm:$0xff]  ;;  %v3530_v21 = vld [vmem:[%s2202_s2 + $0x30] sm:$0xff]  ;;  %v3529_v24 = vld [vmem:[%s2202_s2 + $0x28] sm:$0xff] }
 0xb75   : >> { %2272 = vmatpush.bf16.msra.mxu1 %v3531_v20  ;;  %v3522_v22 = vld [vmem:[%s2118_s12 + $0x38] sm:$0xff]  ;;  %v3521_v23 = vld [vmem:[%s2118_s12 + $0x30] sm:$0xff]  ;;  %v3520_v25 = vld [vmem:[%s2118_s12 + $0x28] sm:$0xff]  ;;  %s2135_s21 = scalar_lea.vmem %s4904_s14, %s3992_s25  ;;  %s2114_s25 = sadd.s32 1, %s3992_s25  }
 0xb76   : >> { %2188 = vmatpush.bf16.msra.mxu0 %v3522_v22  ;;  %v3528_v26 = vld [vmem:[%s2202_s2 + $0x20] sm:$0xff]  ;;  %v3527_v28 = vld [vmem:[%s2202_s2 + $0x18] sm:$0xff]  ;;  %v3526_v30 = vld [vmem:[%s2202_s2 + $0x10] sm:$0xff]  ;;  %s4738_s3 = scalar_lea.vmem %s4905_s17, %s4714_s27  ;;  %p2111_p4 = scmp.ge.s32.totalorder %s2114_s25, 4  }
 0xb77   : >> { %v3519_v27 = vld [vmem:[%s2118_s12 + $0x20] sm:$0xff]  ;;  %v3518_v29 = vld [vmem:[%s2118_s12 + $0x18] sm:$0xff]  ;;  %v3517_v32 = vld [vmem:[%s2118_s12 + $0x10] sm:$0xff]  ;;  %s4907_s1 = sld [smem:[#allocation40_spill]] (%p2111_p4)  ;;  %s3406_s13 = sshll.u32 (%p2111_p4), %s4118_s0, 3 }
 0xb78   : >> { %v3525_v33 = vld [vmem:[%s2202_s2 + $0x8] sm:$0xff]  ;;  %v3524_v36 = vld [vmem:[%s2202_s2] sm:$0xff]  ;;  %v3540_v38 = vld [vmem:[%s4738_s3 + $0x38] sm:$0xff]  ;;  %s4908_s27 = sld [smem:[#allocation39_spill]] (%p2111_p4)  ;;  %s2509_s20 = sshll.u32 (%p2111_p4), %s4701_s22, 4  ;;  %s2510_s20 = int_to_ptr.vmem [resolvable:$true] %s2509_s20 }
 0xb79   : >> { %2273 = vmatpush.bf16.msra.mxu1 %v3530_v21  ;;  %v3516_v34 = vld [vmem:[%s2118_s12 + $0x8] sm:$0xff]  ;;  %v3515_v37 = vld [vmem:[%s2118_s12] sm:$0xff]  ;;  %2397 = vmatpush.bf16.msra.mxu2 %v3540_v38  ;;  %v3539_v35 = vld [vmem:[%s4738_s3 + $0x30] sm:$0xff]  ;;  %s4910_s16 = sld [smem:[#allocation41_spill]] (%p2111_p4) }
 0xb7a   : >> { %2189 = vmatpush.bf16.msra.mxu0 %v3521_v23  ;;  %v3538_v42 = vld [vmem:[%s4738_s3 + $0x28] sm:$0xff]  ;;  %v3537_v45 = vld [vmem:[%s4738_s3 + $0x20] sm:$0xff]  ;;  %v3536_v50 = vld [vmem:[%s4738_s3 + $0x18] sm:$0xff] }
 0xb7b   : >> { %v3535_v56 = vld [vmem:[%s4738_s3 + $0x10] sm:$0xff]  ;;  %v3534_v59 = vld [vmem:[%s4738_s3 + $0x8] sm:$0xff]  ;;  %v3533_v1 = vld [vmem:[%s4738_s3] sm:$0xff]  ;;  %s2497_s3 = scalar_lea.sflag (%p2111_p4), [#allocation5], %s4280_s15 }
 0xb7d   : >> { %2274 = vmatpush.bf16.msra.mxu1 %v3529_v24  ;;  %2398 = vmatpush.bf16.msra.mxu2 %v3539_v35  ;;  %v3684_v24 = vld [vmem:[%s2135_s21] ss:$0 sm:$0xff]  ;;  %v3547_v38 = vld [vmem:[%s4907_s1 + $0x30] sm:$0xff] (%p2111_p4) }
 0xb7e   : >> { %2190 = vmatpush.bf16.msra.mxu0 %v3520_v25  ;;  %v3543_v35 = vld [vmem:[%s4907_s1 + $0x10] sm:$0xff] (%p2111_p4) }
 0xb7f   : > { %s2507_s25 = scalar_lea.hbm (%p2111_p4), %s4910_s16, %s3406_s13  ;;  %s3918_s26 = scalar_lea.hbm (%p2111_p4), %s4910_s16, 16 }
 0xb80   : > { %s2511_s17 = sshll.u32 (%p2111_p4), %s2507_s25, 4  ;;  %s2512_s17 = int_to_ptr.hbm [resolvable:$true] %s2511_s17 }
 0xb81   : >> { %2275 = vmatpush.bf16.msra.mxu1 %v3528_v26  ;;  %2399 = vmatpush.bf16.msra.mxu2 %v3538_v42  ;;  %v3542_v42 = vld [vmem:[%s4907_s1 + $0x8] sm:$0xff] (%p2111_p4)  ;;  %s3912_s9 = sshra.s32 (%p2111_p4), %s2512_s17, 4  ;;  %s3913_s9 = int_to_ptr.hbm [resolvable:$true] %s3912_s9 }
 0xb82   : >> { %2191 = vmatpush.bf16.msra.mxu0 %v3519_v27  ;;  %s3914_s23 = scalar_lea.hbm (%p2111_p4), %s3913_s9, 8  ;;  %p3919_p5 = scmp.lt.s32.totalorder (%p2111_p4), %s3913_s9, %s4910_s16 }
 0xb83   : > { %p3915_p12 = scmp.ne.s32.totalorder (%p2111_p4), %s3913_s9, %s3914_s23  ;;  %p3920_p1 = scmp.lt.s32.totalorder (%p2111_p4), %s3918_s26, %s3914_s23 }
 0xb85   : >> { %2276 = vmatpush.bf16.msra.mxu1 %v3527_v28  ;;  %2400 = vmatpush.bf16.msra.mxu2 %v3537_v45  ;;  %p3916_p0 = pnand (%p2111_p4), %p3915_p12, %p4170_p7  ;;  %p3921_p11 = por (%p2111_p4), %p3920_p1, %p3919_p5 }
 0xb86   : >> { %2192 = vmatpush.bf16.msra.mxu0 %v3518_v29 }
 0xb87   : > { %p3917_p3 = pneg (%p2111_p4), %p3916_p0 }
 0xb89   : >> { %2277 = vmatpush.bf16.msra.mxu1 %v3526_v30  ;;  %2401 = vmatpush.bf16.msra.mxu2 %v3536_v50  ;;  %p3922_p2 = pnand (%p2111_p4), %p3921_p11, %p3917_p3 }
 0xb8a   : >> { %2193 = vmatpush.bf16.msra.mxu0 %v3517_v32 }
 0xb8d   : >> { %2278 = vmatpush.bf16.msra.mxu1 %v3525_v33  ;;  %2402 = vmatpush.bf16.msra.mxu2 %v3535_v56 }
 0xb8e   : >> { %2194 = vmatpush.bf16.msra.mxu0 %v3516_v34 }
 0xb91   : >> { %2279 = vmatpush.bf16.msra.mxu1 %v3524_v36  ;;  %2403 = vmatpush.bf16.msra.mxu2 %v3534_v59 }
 0xb92   : >> { %2195 = vmatpush.bf16.msra.mxu0 %v3515_v37  ;;  %v3548_v37 = vld [vmem:[%s4907_s1 + $0x38] sm:$0xff] (%p2111_p4) }
 0xb94   : >> { %2280 = vmatmul.bf16.vlgmr.msra.gmra.mxu1 %v4697_v18 }
 0xb95   : >> { %2196 = vmatmul.bf16.vlgmr.msra.gmra.mxu0 %v4697_v18  ;;  %2404 = vmatpush.bf16.msra.mxu2 %v3533_v1  ;;  %v3544_v18 = vld [vmem:[%s4907_s1 + $0x18] sm:$0xff] (%p2111_p4) }
 0xb96   : > { %2482 = vmatpush.bf16.msra.mxu0 (%p2111_p4), %v3548_v37 }
 0xb9a   : > { %2483 = vmatpush.bf16.msra.mxu0 (%p2111_p4), %v3547_v38 }
 0xc11   : >> { %v2281_v40 = vpop.f32.mrf.mxu1 }
 0xc12   : >> { %v2282_v41 = vadd.f32 %v3683_v39, %v2281_v40  ;;  %v2197_v53 = vpop.f32.mrf.mxu0  ;;  %v3545_v39 = vld [vmem:[%s4907_s1 + $0x20] sm:$0xff] (%p2111_p4) }
 0xc13   : >> { %v2198_v27 = vadd.f32 %v3684_v24, %v2197_v53 }
 0xc14   : >> { %v2286_v43 = vmul.f32 0.70710677, %v2282_v41  ;;  %v2285_v26 = vmul.f32 0.5, %v2282_v41  ;;  %v3687_v41 = vld [vmem:[%s4908_s27] ss:$0 sm:$0xff] (%p2111_p4) }
 0xc16   : >> { %v2287_v44 = vmul.f32 %v2286_v43, %v2286_v43 }
 0xc18   : >> { %v2288_v46 = vmin.f32 %v2287_v44, 16.0  ;;  %v3541_v44 = vld [vmem:[%s4907_s1] sm:$0xff] (%p2111_p4) }
 0xc19   : >> { %v2283_v47 = vpop.f32.mrf.mxu1 }
 0xc1a   : >> { %v2289_v48 = vmul.f32 2.1237322e-06, %v2288_v46  ;;  %v2300_v49 = vmul.f32 3.8918573e-05, %v2288_v46  ;;  %v2199_v0 = vpop.f32.mrf.mxu0 }
 0xc1c   : >> { %v2290_v51 = vadd.f32 0.00028619796, %v2289_v48  ;;  %v2301_v52 = vadd.f32 0.001143296, %v2300_v49 }
 0xc1e   : >> { %v2291_v54 = vmul.f32 %v2290_v51, %v2288_v46  ;;  %v2302_v55 = vmul.f32 %v2301_v52, %v2288_v46 }
 0xc20   : >> { %v2303_v57 = vadd.f32 0.014752088, %v2302_v55  ;;  %v2292_v58 = vadd.f32 0.0036580483, %v2291_v54 }
 0xc22   : >> { %v2304_v61 = vmul.f32 %v2303_v57, %v2288_v46  ;;  %v2293_v63 = vmul.f32 %v2292_v58, %v2288_v46 }
 0xc24   : >> { %v2305_v62 = vadd.f32 0.112945676, %v2304_v61  ;;  %v2294_v5 = vadd.f32 0.05243302, %v2293_v63 }
 0xc26   : >> { %v2306_v2 = vmul.f32 %v2305_v62, %v2288_v46  ;;  %v2295_v7 = vmul.f32 %v2294_v5, %v2288_v46 }
 0xc28   : >> { %v2307_v4 = vadd.f32 0.4994258, %v2306_v2  ;;  %v2296_v8 = vadd.f32 0.18741608, %v2295_v7 }
 0xc2a   : >> { %v2308_v6 = vmul.f32 %v2307_v4, %v2288_v46  ;;  %v2297_v10 = vmul.f32 %v2296_v8, %v2288_v46 }
 0xc2c   : >> { %v2309_v3 = vadd.f32 1.0, %v2308_v6  ;;  %v2298_v14 = vadd.f32 1.1283791, %v2297_v10 }
 0xc2e   : >> { %3685 = vrcp.f32 %v2309_v3  ;;  %v2321_v13 = vand.u32 2147483648, %v2309_v3  ;;  %v2319_v15 = vand.u32 2147483647, %v2309_v3  ;;  %vm2315_vm15 = vweird.f32 %v2309_v3 }
 0xc2f   : >> { %v2299_v20 = vmul.f32 %v2298_v14, %v2286_v43 }
 0xc30   : >> { %v2322_v17 = vor.u32 1.1754944e-38, %v2321_v13  ;;  %vm2320_vm1 = vcmp.eq.f32.partialorder %v2319_v15, 8.507059e+37 }
 0xc34   : >> { %v3686_v9 = vpop.eup %3685 }
 0xc35   : >> { %v2311_v11 = vmul.f32 %v3686_v9, %v2309_v3  ;;  %vm2316_vm14 = vweird.f32 %v3686_v9 }
 0xc36   : >> { %vm2317_vm0 = vmor %vm2315_vm15, %vm2316_vm14 }
 0xc37   : >> { %v2312_v12 = vsub.f32 1.0, %v2311_v11 }
 0xc39   : >> { %v2313_v31 = vmul.f32 %v3686_v9, %v2312_v12 }
 0xc3b   : >> { %v2314_v16 = vadd.f32 %v3686_v9, %v2313_v31 }
 0xc3d   : >> { %v2318_v21 = vsel %vm2317_vm0, %v3686_v9, %v2314_v16 }
 0xc3e   : >> { %v2323_v22 = vsel %vm2320_vm1, %v2322_v17, %v2318_v21 }
 0xc3f   : >> { %v2324_v23 = vmul.f32 %v2323_v22, %v2299_v20 }
 0xc41   : >> { %v3339_v25 = vclamps-f32 %v2324_v23, 1.0 }
 0xc43   : >> { %v2327_v28 = vadd.f32 1.0, %v3339_v25 }
 0xc45   : >> { %v2328_v29 = vmul.f32 %v2327_v28, %v2285_v26 }
 0xc47   : >> { %v2329_v30 = vmul.f32 %v2328_v29, %v2198_v27 }
 0xc49   : >> { %v2330_v32 = vpack.c.bf16 %v2329_v30, %v2329_v30 }
 0xc4b   : >> { %2405 = vmatmul.bf16.vlgmr.msra.gmra.mxu2 %v2330_v32 }
 0xcce   : >> { %v2406_v33 = vpop.f32.mrf.mxu2 }
 0xccf   : >> { %v2410_v34 = vadd.f32 %v3988_v19, %v2406_v33  }
 0xcd1   : >> { %v4906_v19 = vmov %v2410_v34  ;;  %v2411_v40 = vadd.f32 (%p2111_p4), %v2410_v34, %v4687_v60 }
 0xcd2   : > { %2113 = sbr.rel (!%p2111_p4) target bundleno = 2924 (0xb6c), region = 214  ;;  %v3546_v19 = vld [vmem:[%s4907_s1 + $0x28] sm:$0xff] (%p2111_p4) }
 0xcd3   : > { %2484 = vmatpush.bf16.msra.mxu0 (%p2111_p4), %v3546_v19  ;;  %v2416_v43 = vadd.f32 (%p2111_p4), %v3687_v41, %v2411_v40 }
 0xcd5   : > { %v2417_v45 = vpack.c.bf16 (%p2111_p4), %v2416_v43, %v2416_v43 }
 0xcd6   : >> { %v2408_v36 = vpop.f32.mrf.mxu2 }
 0xcd7   : > { %2485 = vmatpush.bf16.msra.mxu0 %v3545_v39 }
 0xcdb   : > { %2486 = vmatpush.bf16.msra.mxu0 %v3544_v18 }
 0xcdf   : > { %2487 = vmatpush.bf16.msra.mxu0 %v3543_v35 }
 0xce3   : > { %2488 = vmatpush.bf16.msra.mxu0 %v3542_v42 }
 0xce7   : > { %2489 = vmatpush.bf16.msra.mxu0 %v3541_v44 }
 0xcea   : > { %2490 = vmatmul.bf16.vlgmr.msra.gmra.mxu0 %v2417_v45 }
 0xd67   : > { %v2491_v60 = vpop.f32.mrf.mxu0 }
 0xd68   : > { %2495 = vst [vmem:[%s4701_s22] sm:$0xff] %v2491_v60 }
 0xd69   : > { %3925 = shalt.err (!%p3922_p2)
}
 0xd6a   : > { %3567 = dma.vmem_to_hbm [thread:$0]  (%p4170_p7), %s2510_s20, 128, %s2512_s17, %s2497_s3  }
 0xd6f   : > { %v2493_v46 = vpop.f32.mrf.mxu0 }
 0xd70 PF: > { %s4911_s15 = sld [smem:[#allocation21_spill]]  ;;  %p4913_p10 = scmp.ge.s32.totalorder %s3984_s30, 2 }
 0xd72   : > { %p3593_p13 = pnand %p4913_p10, %p4132_p6 }
 0xd74   : > { %p3594_p8 = pneg %p3593_p13 }
 0xd76   : > { %s2523_s29 = sand.u32 1, %s4911_s15  }
 0xd77   : > { %s2524_s13 = scalar_lea.sflag [#allocation5], %s2523_s29 }
 0xd78   : > { %3967 = dma.done.wait (%p3594_p8), %s2524_s13, 128  }
 0xd79   : > { %3969 = vsyncadd (%p3594_p8), %s2524_s13, 4294967168  ;;  %s4914_s30 = sld [smem:[#allocation24_spill]]  ;;  %s4917_s27 = smov %s3976_s28 }
 0xd7a   : > { %s4915_s5 = sld [smem:[#allocation22_spill]] }
 0xd7b   : > { %s4916_s29 = sld [smem:[#allocation25_spill]] }
 0xd7f   : > { %p38_p9 = scmp.ge.s32.totalorder %s4914_s30, 4  }
 0xd80   : > { %s4918_s28 = smov %s4915_s5 }
 0xd81   :  { %40 = sbr.rel (!%p38_p9) target bundleno = 26 (0x1a), region = 225 }
 0xd86   :  { %2530 = vsyncpa [#allocation4], 1 }
 0xd87   :  { %2532 = vsyncpa [#allocation4 + $0x1], 1 }
 0xd88   :  { %2533 = vsyncpa [#allocation7], 1 }
 0xd89   :  { %2535 = vsyncpa [#allocation7 + $0x1], 1 }
 0xd8a   :  { %2536 = vsyncpa [#allocation10], 1 }
 0xd8b   :  { %2538 = vsyncpa [#allocation10 + $0x1], 1 }
 0xd8c   :  { %2539 = vsyncpa [#allocation13], 1 }
 0xd8d   :  { %2540 = vsyncpa [#allocation5], 1 }
 0xd8e   :  { %2542 = vsyncpa [#allocation5 + $0x1], 1 }

// kernel: tpu_custom_call.1
= control target key start
LH: loop header
LB: loop body
LE: loop exit
PB: predicated region body
PF: predicated region fallthrough
CT: control target
= control target key end

     0   :  { %s4827_s0 = inlined_call_operand.hbm [shape: f32[2,8,16], index: 0, kind: input, shape index: {}]   ;;  %s4828_s1 = inlined_call_operand.hbm [shape: f32[2,1,128], index: 1, kind: input, shape index: {}]   ;;  %s4829_s2 = inlined_call_operand.hbm [shape: f32[2,1,128], index: 2, kind: input, shape index: {}]   ;;  %s4830_s3 = inlined_call_operand.hbm [shape: f32[2,1,128], index: 3, kind: input, shape index: {}]   ;;  %s4831_s4 = inlined_call_operand.hbm [shape: f32[2,1,128], index: 4, kind: input, shape index: {}]   ;;  %s4832_s5 = inlined_call_operand.hbm [shape: bf16[16,128], index: 5, kind: input, shape index: {}]   ;;  %s4833_s6 = inlined_call_operand.vmem [shape: bf16[4,128,32], index: 6, kind: input, shape index: {}]   ;;  %s4834_s7 = inlined_call_operand.vmem [shape: bf16[4,128,32], index: 7, kind: input, shape index: {}]   ;;  %s4835_s8 = inlined_call_operand.vmem [shape: bf16[4,128,32], index: 8, kind: input, shape index: {}]   ;;  %s4836_s9 = inlined_call_operand.vmem [shape: bf16[128,128], index: 9, kind: input, shape index: {}]   ;;  %s4837_s10 = inlined_call_operand.hbm [shape: f32[1,128], index: 10, kind: input, shape index: {}]   ;;  %s4838_s11 = inlined_call_operand.vmem [shape: bf16[4,128,128], index: 11, kind: input, shape index: {}]   ;;  %s4839_s12 = inlined_call_operand.vmem [shape: f32[4,1,128], index: 12, kind: input, shape index: {}]   ;;  %s4840_s13 = inlined_call_operand.vmem [shape: bf16[4,128,128], index: 13, kind: input, shape index: {}]   ;;  %s4841_s14 = inlined_call_operand.vmem [shape: f32[4,1,128], index: 14, kind: input, shape index: {}]   ;;  %s4842_s15 = inlined_call_operand.vmem [shape: bf16[4,128,128], index: 15, kind: input, shape index: {}]   ;;  %s4843_s16 = inlined_call_operand.vmem [shape: f32[1,128], index: 16, kind: input, shape index: {}]   ;;  %s4844_s17 = inlined_call_operand.vmem [shape: bf16[128,128], index: 17, kind: input, shape index: {}]   ;;  %s4845_s18 = inlined_call_operand.hbm [shape: f32[2,8,128], index: 18, kind: output, shape index: {}]  }
   0x1   :  { %4863 = sst [smem:[#allocation27_spill]] %s4827_s0 }
   0x2   :  { %4864 = sst [smem:[#allocation28_spill]] %s4828_s1 }
   0x3   :  { %4865 = sst [smem:[#allocation29_spill]] %s4829_s2 }
   0x4   :  { %4866 = sst [smem:[#allocation30_spill]] %s4830_s3 }
   0x5   :  { %4867 = sst [smem:[#allocation31_spill]] %s4832_s5 }
   0x6   :  { %4868 = sst [smem:[#allocation32_spill]] %s4836_s9 }
   0x7   :  { %4869 = sst [smem:[#allocation33_spill]] %s4837_s10 }
   0x8   :  { %4870 = sst [smem:[#allocation34_spill]] %s4838_s11 }
   0x9   :  { %4871 = sst [smem:[#allocation35_spill]] %s4839_s12 }
   0xa   :  { %4872 = sst [smem:[#allocation36_spill]] %s4840_s13 }
   0xb   :  { %4873 = sst [smem:[#allocation37_spill]] %s4841_s14 }
   0xc   :  { %4874 = sst [smem:[#allocation38_spill]] %s4842_s15 }
   0xd   :  { %4875 = sst [smem:[#allocation39_spill]] %s4843_s16 }
   0xe   :  { %4876 = sst [smem:[#allocation40_spill]] %s4844_s17 }
   0xf   :  { %4877 = sst [smem:[#allocation41_spill]] %s4845_s18 }
  0x10   :  { %23 = vsyncpa [#allocation4], 0 }
  0x11   :  { %25 = vsyncpa [#allocation4 + $0x1], 0 }
  0x12   :  { %26 = vsyncpa [#allocation7], 0 }
  0x13   :  { %28 = vsyncpa [#allocation7 + $0x1], 0 }
  0x14   :  { %29 = vsyncpa [#allocation10], 0 }
  0x15   :  { %31 = vsyncpa [#allocation10 + $0x1], 0 }
  0x16   :  { %32 = vsyncpa [#allocation13], 0 }
  0x17   :  { %33 = vsyncpa [#allocation5], 0 }
  0x18   :  { %35 = vsyncpa [#allocation5 + $0x1], 0  ;;  %s4097_s27 = smov 0   ;;  %s4099_s28 = smov 0  }
  0x19   :  { %s4101_s29 = smov 0   ;;  %s4103_s30 = smov 0  }
  0x1a LB: > { %4878 = sst [smem:[#allocation21_spill]] %s3972_s27  ;;  %s4118_s0 = sadd.s32 4294967295, %s3984_s30   ;;  %s3984_s30 = sphi %s4103_s30, %s4914_s30   ;;  %s3980_s29 = sphi %s4101_s29, %s4916_s29   ;;  %s3976_s28 = sphi %s4099_s28, %s4918_s28   ;;  %s3972_s27 = sphi %s4097_s27, %s4917_s27  }
  0x1b   : > { %4879 = sst [smem:[#allocation22_spill]] %s3980_s29  ;;  %s2687_s19 = sadd.s32 4294967294, %s3984_s30  }
  0x1c   : > { %p61_p0 = scmp.ne.s32.totalorder %s3976_s28, %s3972_s27  ;;  %p4859_p1 = scmp.eq.s32.totalorder %s4118_s0, 0 }
  0x1d   : > { %p462_p2 = scmp.eq.s32.totalorder %s4118_s0, 1  ;;  %p468_p3 = scmp.eq.s32.totalorder %s2687_s19, 1 }
  0x1e   : > { %p4127_p4 = por %p4859_p1, %p61_p0  ;;  %p2688_p5 = scmp.ge.s32.totalorder %s3984_s30, 1 }
  0x1f   : > { %p4132_p6 = por %p468_p3, %p61_p0  ;;  %p475_p7 = scmp.lt.s32.totalorder %s3984_s30, 3 }
  0x20   : > { %s4883_s5 = sld [smem:[#allocation31_spill]]  ;;  %s3994_s24 = smov [#allocation12]  }
  0x21   : > { %s4881_s20 = scalar_select %p4132_p6, 1, 0 }
  0x22   : > { %p4140_p8 = pnand %p2688_p5, %p475_p7  ;;  %s488_s25 = sshll.u32 %s3994_s24, 4  ;;  %s489_s25 = int_to_ptr.vmem [resolvable:$true] %s488_s25 }
  0x23   : > { %4882 = sst [smem:[#allocation23_spill]] %s4881_s20  ;;  %s4154_s19 = sadd.s32 1, %s3984_s30  }
  0x24   : > { %p3569_p9 = pneg %p4140_p8  ;;  %4886 = sst [smem:[#allocation24_spill]] %s4154_s19 }
  0x25   : > { %s3995_s21 = smov 64   ;;  %s3996_s22 = smov 4  }
  0x26   : > { %s486_s2 = sshll.u32 %s4883_s5, 4  ;;  %p4148_p10 = pnand %p3569_p9, %p4859_p1  ;;  %s487_s2 = int_to_ptr.hbm [resolvable:$true] %s486_s2 }
  0x27   : > { %s45_s24 = ssub.s32 %s3984_s30, %s4154_s19  ;;  %s48_s5 = sadd.s32 1, %s3980_s29 }
  0x28   : > { %3572 = dma.hbm_to_vmem [thread:$0]  (!%p4148_p10), %s487_s2, 128, %s489_s25, [#allocation13], %s3995_s21, %s3995_s21, %s3996_s22  }
  0x29   : > { %p46_p12 = scmp.eq.s32.totalorder %s45_s24, 0  ;;  %p55_p13 = scmp.ne.s32.totalorder %s3980_s29, %s3976_s28 }
  0x2a   : > { %p56_p0 = scmp.eq.s32.totalorder %s3984_s30, 0  ;;  %p3598_p3 = scmp.lt.s32.totalorder %s3984_s30, 2 }
  0x2b   : > { %s4166_s20 = scalar_select %p46_p12, %s3980_s29, %s48_s5  }
  0x2c   : > { %p57_p5 = por %p56_p0, %p55_p13  ;;  %p4170_p7 = por %p462_p2, %p55_p13 }
  0x2d   : > { %4887 = sst [smem:[#allocation25_spill]] %s4166_s20  ;;  %s4175_s18 = sand.u32 1, %s3980_s29  }
  0x2e   : > { %s4888_s27 = scalar_select %p4170_p7, 1, 0 }
  0x2f   : > { %s566_s16 = sand.u32 1, %s3984_s30   ;;  %p4178_p9 = pnand %p3598_p3, %p57_p5 }
  0x30   : > { %4889 = sst [smem:[#allocation26_spill]] %s4888_s27  ;;  %s569_s20 = scalar_lea.vmem [#allocation6], %s4175_s18 }
  0x31   : > { %s4891_s22 = sld [smem:[#allocation28_spill]]  ;;  %s576_s19 = sshll.u32 %s569_s20, 4  ;;  %s577_s19 = int_to_ptr.vmem [resolvable:$true] %s576_s19 }
  0x32   : > { %s4187_s17 = scalar_lea.sflag [#allocation7], %s566_s16  ;;  %p4191_p12 = pneg %p4178_p9 }
  0x37   : > { %s572_s5 = scalar_lea.hbm %s4891_s22, %s3984_s30  ;;  %s3725_s20 = scalar_lea.hbm %s4891_s22, 2 }
  0x38   : > { %s574_s24 = sshll.u32 %s572_s5, 4  ;;  %s575_s24 = int_to_ptr.hbm [resolvable:$true] %s574_s24 }
  0x39   : > { %s3718_s29 = sshra.s32 %s575_s24, 4  ;;  %s3719_s29 = int_to_ptr.hbm [resolvable:$true] %s3718_s29 }
  0x3a   : > { %s3720_s27 = scalar_lea.hbm %s3719_s29, 1  ;;  %p3726_p3 = scmp.lt.s32.totalorder %s3719_s29, %s4891_s22 }
  0x3b   : > { %p3721_p2 = scmp.ne.s32.totalorder %s3719_s29, %s3720_s27  ;;  %p3727_p5 = scmp.lt.s32.totalorder %s3725_s20, %s3720_s27 }
  0x3d   : > { %p3723_p13 = pnand %p4191_p12, %p3721_p2  ;;  %p3728_p11 = por %p3727_p5, %p3726_p3 }
  0x3f   : > { %p3724_p0 = pneg %p3723_p13 }
  0x41   : > { %p3729_p1 = pnand %p3728_p11, %p3724_p0 }
  0x43   : > { %3732 = shalt.err (!%p3729_p1)
}
  0x44   : > { %3582 = dma.hbm_to_vmem [thread:$0]  (!%p4178_p9), %s575_s24, 16, %s577_s19, %s4187_s17  }
  0x45   : > { %s4893_s3 = sld [smem:[#allocation30_spill]]  ;;  %s603_s14 = scalar_lea.vmem [#allocation9], %s4175_s18 }
  0x46   : > { %s610_s9 = sshll.u32 %s603_s14, 4  ;;  %s4211_s12 = scalar_lea.sflag [#allocation10], %s566_s16  ;;  %s611_s9 = int_to_ptr.vmem [resolvable:$true] %s610_s9 }
  0x4b   : > { %s606_s25 = scalar_lea.hbm %s4893_s3, %s3984_s30  ;;  %s3755_s24 = scalar_lea.hbm %s4893_s3, 2 }
  0x4c   : > { %s608_s21 = sshll.u32 %s606_s25, 4  ;;  %s609_s21 = int_to_ptr.hbm [resolvable:$true] %s608_s21 }
  0x4d   : > { %s3748_s27 = sshra.s32 %s609_s21, 4  ;;  %s3749_s27 = int_to_ptr.hbm [resolvable:$true] %s3748_s27 }
  0x4e   : > { %s3750_s29 = scalar_lea.hbm %s3749_s27, 1  ;;  %p3756_p13 = scmp.lt.s32.totalorder %s3749_s27, %s4893_s3 }
  0x4f   : > { %p3751_p1 = scmp.ne.s32.totalorder %s3749_s27, %s3750_s29  ;;  %p3757_p0 = scmp.lt.s32.totalorder %s3755_s24, %s3750_s29 }
  0x51   : > { %p3753_p11 = pnand %p3751_p1, %p4191_p12  ;;  %p3758_p3 = por %p3757_p0, %p3756_p13 }
  0x53   : > { %p3754_p2 = pneg %p3753_p11 }
  0x55   : > { %p3759_p5 = pnand %p3758_p3, %p3754_p2 }
  0x57   : > { %3762 = shalt.err (!%p3759_p5)
}
  0x58   : > { %3588 = dma.hbm_to_vmem [thread:$0]  (!%p4178_p9), %s609_s21, 16, %s611_s9, %s4211_s12  }
  0x59   : > { %s4894_s10 = sld [smem:[#allocation33_spill]]  ;;  %s3997_s25 = smov [#allocation14]  }
  0x5a   : > { %s515_s20 = sshll.u32 %s3997_s25, 4  ;;  %s2692_s27 = sshll.u32 %s4175_s18, 3  ;;  %s516_s20 = int_to_ptr.vmem [resolvable:$true] %s515_s20 }
  0x5b   : > { %s2693_s29 = sshll.u32 %s3984_s30, 3  ;;  %s4895_s11 = sld [smem:[#allocation27_spill]] }
  0x5c   : > { %s551_s22 = scalar_lea.vmem [#allocation3], %s2692_s27  ;;  %s548_s21 = scalar_lea.sflag [#allocation4], %s4175_s18 }
  0x5d   : > { %s559_s9 = sshll.u32 %s551_s22, 4  ;;  %s560_s9 = int_to_ptr.vmem [resolvable:$true] %s559_s9 }
  0x5f   : > { %s513_s5 = sshll.u32 %s4894_s10, 4  ;;  %s514_s5 = int_to_ptr.hbm [resolvable:$true] %s513_s5 }
  0x60   : > { %3575 = dma.hbm_to_vmem [thread:$0]  (!%p4148_p10), %s514_s5, 16, %s516_s20, [#allocation13]  }
  0x61   : > { %s555_s13 = scalar_lea.hbm %s4895_s11, %s2693_s29  ;;  %s3815_s25 = scalar_lea.hbm %s4895_s11, 16 }
  0x62   : > { %s557_s3 = sshll.u32 %s555_s13, 4  ;;  %s558_s3 = int_to_ptr.hbm [resolvable:$true] %s557_s3 }
  0x63   : > { %s3808_s14 = sshra.s32 %s558_s3, 4  ;;  %s3809_s14 = int_to_ptr.hbm [resolvable:$true] %s3808_s14 }
  0x64   : > { %s3810_s16 = scalar_lea.hbm %s3809_s14, 8  ;;  %p3816_p10 = scmp.lt.s32.totalorder %s3809_s14, %s4895_s11 }
  0x65   : > { %p3811_p1 = scmp.ne.s32.totalorder %s3809_s14, %s3810_s16  ;;  %p3817_p13 = scmp.lt.s32.totalorder %s3815_s25, %s3810_s16 }
  0x67   : > { %p3813_p11 = pnand %p3811_p1, %p4191_p12  ;;  %p3818_p0 = por %p3817_p13, %p3816_p10 }
  0x69   : > { %p3814_p2 = pneg %p3813_p11 }
  0x6b   : > { %p3819_p3 = pnand %p3818_p0, %p3814_p2 }
  0x6d   : > { %3822 = shalt.err (!%p3819_p3)
}
  0x6e   : > { %3579 = dma.hbm_to_vmem [thread:$0]  (!%p4178_p9), %s558_s3, 128, %s560_s9, %s548_s21  }
  0x6f   : > { %s4896_s29 = sld [smem:[#allocation29_spill]]  ;;  %s586_s5 = scalar_lea.vmem [#allocation8], %s4175_s18 }
  0x70   : > { %s593_s10 = sshll.u32 %s586_s5, 4  ;;  %s594_s10 = int_to_ptr.vmem [resolvable:$true] %s593_s10 }
  0x75   : > { %s4897_s24 = smov %s4896_s29  ;;  %s589_s13 = scalar_lea.hbm %s4896_s29, %s3984_s30 }
  0x76   : > { %s591_s26 = sshll.u32 %s589_s13, 4  ;;  %s3845_s3 = scalar_lea.hbm %s4897_s24, 2  ;;  %s592_s26 = int_to_ptr.hbm [resolvable:$true] %s591_s26 }
  0x77   : > { %s3838_s14 = sshra.s32 %s592_s26, 4  ;;  %s3839_s14 = int_to_ptr.hbm [resolvable:$true] %s3838_s14 }
  0x78   : > { %s3840_s16 = scalar_lea.hbm %s3839_s14, 1  ;;  %p3846_p2 = scmp.lt.s32.totalorder %s3839_s14, %s4897_s24 }
  0x79   : > { %p3841_p5 = scmp.ne.s32.totalorder %s3839_s14, %s3840_s16  ;;  %p3847_p10 = scmp.lt.s32.totalorder %s3845_s3, %s3840_s16 }
  0x7b   : > { %p3843_p1 = pnand %p3841_p5, %p4191_p12  ;;  %p3848_p13 = por %p3847_p10, %p3846_p2 }
  0x7d   : > { %p3844_p11 = pneg %p3843_p1 }
  0x7f   : > { %p3849_p0 = pnand %p3848_p13, %p3844_p11 }
  0x81   : > { %3852 = shalt.err (!%p3849_p0)
}
  0x82   : > { %3585 = dma.hbm_to_vmem [thread:$0]  (!%p4178_p9), %s592_s26, 16, %s594_s10, %s4187_s17  }
  0x83   : > { %s623_s27 = scalar_lea.hbm %s4831_s4, %s3984_s30  ;;  %s620_s13 = scalar_lea.vmem [#allocation11], %s4175_s18 }
  0x84   : > { %s625_s29 = sshll.u32 %s623_s27, 4  ;;  %s627_s5 = sshll.u32 %s620_s13, 4  ;;  %s626_s29 = int_to_ptr.hbm [resolvable:$true] %s625_s29  ;;  %s628_s5 = int_to_ptr.vmem [resolvable:$true] %s627_s5 }
  0x85   : > { %s3868_s14 = sshra.s32 %s626_s29, 4  ;;  %s3875_s10 = scalar_lea.hbm %s4831_s4, 2  ;;  %s3869_s14 = int_to_ptr.hbm [resolvable:$true] %s3868_s14 }
  0x86   : > { %s3870_s16 = scalar_lea.hbm %s3869_s14, 1  ;;  %p3876_p11 = scmp.lt.s32.totalorder %s3869_s14, %s4831_s4 }
  0x87   : > { %p3871_p3 = scmp.ne.s32.totalorder %s3869_s14, %s3870_s16  ;;  %p3877_p2 = scmp.lt.s32.totalorder %s3875_s10, %s3870_s16 }
  0x89   : > { %p3873_p5 = pnand %p3871_p3, %p4191_p12  ;;  %p3878_p10 = por %p3877_p2, %p3876_p11 }
  0x8b   : > { %p3874_p1 = pneg %p3873_p5 }
  0x8d   : > { %p3879_p13 = pnand %p3878_p10, %p3874_p1 }
  0x8f   : > { %3882 = shalt.err (!%p3879_p13)
}
  0x90   : > { %3591 = dma.hbm_to_vmem [thread:$0]  (!%p4178_p9), %s626_s29, 16, %s628_s5, %s4211_s12  }
  0x91   : > { %636 = sbr.rel (%p4140_p8) target bundleno = 3440 (0xd70), region = 92  ;;  %s4280_s15 = sand.u32 (!%p4140_p8), 1, %s3976_s28  }
  0x92   : > { %s2695_s18 = sshll.u32 (!%p4140_p8), %s4280_s15, 3  ;;  %s639_s3 = scalar_lea.sflag (!%p4140_p8), [#allocation4], %s4280_s15 }
  0x93   : > { %s642_s9 = scalar_lea.vmem (!%p4140_p8), [#allocation3], %s2695_s18 }
  0x96   : > { %3951 = dma.done.wait (%p4127_p4), %s639_s3, 128  }
  0x97   : > { %3953 = vsyncadd (%p4127_p4), %s639_s3, 4294967168  ;;  %s648_s23 = sand.u32 1, %s4118_s0   ;;  %s651_s12 = scalar_lea.vmem [#allocation6], %s4280_s15 }
  0x98   : > { %s649_s2 = scalar_lea.sflag [#allocation7], %s648_s23 }
  0x99   : > { %3955 = dma.done.wait (%p4127_p4), %s649_s2, 32  }
  0x9a   : > { %3957 = vsyncadd (%p4127_p4), %s649_s2, 4294967264  ;;  %s660_s21 = scalar_lea.vmem [#allocation8], %s4280_s15  ;;  %s667_s19 = scalar_lea.sflag [#allocation10], %s648_s23 }
  0x9b   : > { %s669_s22 = scalar_lea.vmem [#allocation9], %s4280_s15 }
  0x9c   : > { %3959 = dma.done.wait (%p4127_p4), %s667_s19, 32  }
  0x9d   : > { %3961 = vsyncadd (%p4127_p4), %s667_s19, 4294967264  ;;  %s678_s27 = scalar_lea.vmem [#allocation11], %s4280_s15  ;;  %p4898_p8 = scmp.eq.s32.totalorder %s4118_s0, 0 }
  0x9f   : > { %3963 = dma.done.wait (%p4898_p8), [#allocation13], 144   ;;  %p4899_p9 = pmov %p4898_p8 }
  0xa0   : > { %v3409_v0 = vld [vmem:[#allocation12] sm:$0xff]  ;;  %v759_v1 = vld [vmem:[%s642_s9] sm:$0xff]  ;;  %vm769_vm0 = vcmask 130048   ;;  %v3998_v5 = vmov 128.0   ;;  %v3417_v6 = vld [vmem:[%s4833_s6 + $0x38] sm:$0xff]  ;;  %vm1059_vm5 = vcmask 261120  }
  0xa1   : > { %3965 = vsyncadd (%p4899_p9), [#allocation13], 4294967152  ;;  %v760_v2 = vpack.c.bf16 %v759_v1, %v759_v1  ;;  %780 = vmatpush.bf16.msra.mxu0 %v3409_v0  ;;  %3661 = vrcp.f32 %v3998_v5  ;;  %v3425_v7 = vld [vmem:[%s4834_s7 + $0x38] sm:$0xff]  ;;  %889 = vmatpush.bf16.msra.mxu1 %v3417_v6  ;;  %v3416_v9 = vld [vmem:[%s4833_s6 + $0x30] sm:$0xff]  ;;  %vm1095_vm6 = vcmask 1043456   ;;  %vm1079_vm7 = vcmask 64512  }
  0xa2   : > { %v3433_v8 = vld [vmem:[%s4835_s8 + $0x38] sm:$0xff]  ;;  %966 = vmatpush.bf16.msra.mxu2 %v3425_v7  ;;  %v3424_v10 = vld [vmem:[%s4834_s7 + $0x30] sm:$0xff]  ;;  %v3415_v13 = vld [vmem:[%s4833_s6 + $0x28] sm:$0xff]  ;;  %vm1404_vm8 = vcmask 523520   ;;  %s4000_s16 = smov 64   ;;  %vm1697_vm9 = vcmask 785920  }
  0xa3   : > { %1043 = vmatpush.bf16.msra.mxu3 %v3433_v8  ;;  %v3432_v11 = vld [vmem:[%s4835_s8 + $0x30] sm:$0xff]  ;;  %v3423_v14 = vld [vmem:[%s4834_s7 + $0x28] sm:$0xff]  ;;  %v3414_v17 = vld [vmem:[%s4833_s6 + $0x20] sm:$0xff]  ;;  %s4900_s10 = sld [smem:[#allocation32_spill]]  ;;  %s4001_s13 = smov 96   ;;  %vm1990_vm10 = vcmask 1048320  }
  0xa4   : > { %2703 = vmatmul.msk.bf16.vlgmr.msra.gmra.mxu0 %vm769_vm0, %v760_v2  ;;  %v3431_v16 = vld [vmem:[%s4835_s8 + $0x28] sm:$0xff]  ;;  %v3422_v18 = vld [vmem:[%s4834_s7 + $0x20] sm:$0xff]  ;;  %v3413_v21 = vld [vmem:[%s4833_s6 + $0x18] sm:$0xff]  ;;  %s4705_s25 = smov 0  }
  0xa5   : > { %890 = vmatpush.bf16.msra.mxu1 %v3416_v9  ;;  %v3430_v20 = vld [vmem:[%s4835_s8 + $0x20] sm:$0xff]  ;;  %v3421_v22 = vld [vmem:[%s4834_s7 + $0x18] sm:$0xff]  ;;  %v3412_v25 = vld [vmem:[%s4833_s6 + $0x10] sm:$0xff] }
  0xa6   : > { %967 = vmatpush.bf16.msra.mxu2 %v3424_v10  ;;  %v3429_v24 = vld [vmem:[%s4835_s8 + $0x18] sm:$0xff]  ;;  %v3420_v26 = vld [vmem:[%s4834_s7 + $0x10] sm:$0xff]  ;;  %v3411_v29 = vld [vmem:[%s4833_s6 + $0x8] sm:$0xff] }
  0xa7   : > { %v3662_v12 = vpop.eup %3661  ;;  %1044 = vmatpush.bf16.msra.mxu3 %v3432_v11  ;;  %v3428_v28 = vld [vmem:[%s4835_s8 + $0x10] sm:$0xff]  ;;  %v3419_v30 = vld [vmem:[%s4834_s7 + $0x8] sm:$0xff]  ;;  %v3410_v37 = vld [vmem:[%s4833_s6] sm:$0xff] }
  0xa8   : > { %v791_v15 = vmul.f32 128.0, %v3662_v12  ;;  %vm795_vm1 = vweird.f32 %v3662_v12  ;;  %v3427_v32 = vld [vmem:[%s4835_s8 + $0x8] sm:$0xff]  ;;  %v3418_v38 = vld [vmem:[%s4834_s7] sm:$0xff]  ;;  %v3441_v40 = vld [vmem:[%s4833_s6 + $0x78] sm:$0xff] }
  0xa9   : > { %891 = vmatpush.bf16.msra.mxu1 %v3415_v13  ;;  %v3426_v39 = vld [vmem:[%s4835_s8] sm:$0xff]  ;;  %v3449_v41 = vld [vmem:[%s4834_s7 + $0x78] sm:$0xff]  ;;  %v3440_v43 = vld [vmem:[%s4833_s6 + $0x70] sm:$0xff] }
  0xaa   : > { %968 = vmatpush.bf16.msra.mxu2 %v3423_v14  ;;  %v792_v19 = vsub.f32 1.0, %v791_v15  ;;  %v3457_v42 = vld [vmem:[%s4835_s8 + $0x78] sm:$0xff]  ;;  %v3448_v44 = vld [vmem:[%s4834_s7 + $0x70] sm:$0xff]  ;;  %v3439_v46 = vld [vmem:[%s4833_s6 + $0x68] sm:$0xff] }
  0xab   : > { %1045 = vmatpush.bf16.msra.mxu3 %v3431_v16  ;;  %v3456_v45 = vld [vmem:[%s4835_s8 + $0x70] sm:$0xff]  ;;  %v3447_v47 = vld [vmem:[%s4834_s7 + $0x68] sm:$0xff]  ;;  %v3438_v49 = vld [vmem:[%s4833_s6 + $0x60] sm:$0xff] }
  0xac   : > { %v793_v23 = vmul.f32 %v3662_v12, %v792_v19  ;;  %v3455_v48 = vld [vmem:[%s4835_s8 + $0x68] sm:$0xff]  ;;  %v3446_v50 = vld [vmem:[%s4834_s7 + $0x60] sm:$0xff]  ;;  %v3437_v52 = vld [vmem:[%s4833_s6 + $0x58] sm:$0xff] }
  0xad   : > { %892 = vmatpush.bf16.msra.mxu1 %v3414_v17  ;;  %v3454_v51 = vld [vmem:[%s4835_s8 + $0x60] sm:$0xff]  ;;  %v3445_v53 = vld [vmem:[%s4834_s7 + $0x58] sm:$0xff]  ;;  %v3436_v55 = vld [vmem:[%s4833_s6 + $0x50] sm:$0xff] }
  0xae   : > { %969 = vmatpush.bf16.msra.mxu2 %v3422_v18  ;;  %v794_v27 = vadd.f32 %v3662_v12, %v793_v23  ;;  %v3453_v54 = vld [vmem:[%s4835_s8 + $0x58] sm:$0xff]  ;;  %v3444_v56 = vld [vmem:[%s4834_s7 + $0x50] sm:$0xff]  ;;  %v3435_v58 = vld [vmem:[%s4833_s6 + $0x48] sm:$0xff] }
  0xaf   : > { %1046 = vmatpush.bf16.msra.mxu3 %v3430_v20  ;;  %v3452_v57 = vld [vmem:[%s4835_s8 + $0x50] sm:$0xff]  ;;  %v3443_v59 = vld [vmem:[%s4834_s7 + $0x48] sm:$0xff]  ;;  %v3434_v61 = vld [vmem:[%s4833_s6 + $0x40] sm:$0xff] }
  0xb0   : > { %v4370_v31 = vsel %vm795_vm1, %v3662_v12, %v794_v27  ;;  %v3451_v60 = vld [vmem:[%s4835_s8 + $0x48] sm:$0xff]  ;;  %v3442_v62 = vld [vmem:[%s4834_s7 + $0x40] sm:$0xff]  ;;  %v3465_v18 = vld [vmem:[%s4833_s6 + $0xb8] sm:$0xff] }
  0xb1   : > { %893 = vmatpush.bf16.msra.mxu1 %v3413_v21  ;;  %v3450_v63 = vld [vmem:[%s4835_s8 + $0x40] sm:$0xff]  ;;  %v3473_v20 = vld [vmem:[%s4834_s7 + $0xb8] sm:$0xff]  ;;  %v3472_v23 = vld [vmem:[%s4834_s7 + $0xb0] sm:$0xff] }
  0xb2   : > { %970 = vmatpush.bf16.msra.mxu2 %v3421_v22  ;;  %v786_v6 = vld [vmem:[%s651_s12] sm:$0x1]  ;;  %v3481_v21 = vld [vmem:[%s4835_s8 + $0xb8] sm:$0xff]  ;;  %v3464_v22 = vld [vmem:[%s4833_s6 + $0xb0] sm:$0xff] }
  0xb3   : > { %1047 = vmatpush.bf16.msra.mxu3 %v3429_v24  ;;  %v815_v9 = vadd.f32 1.0, %v786_v6  ;;  %v3658_v14 = vld [vmem:[%s660_s21] ss:$0 sm:$0xff]  ;;  %v3480_v24 = vld [vmem:[%s4835_s8 + $0xb0] sm:$0xff]  ;;  %v3479_v27 = vld [vmem:[%s4835_s8 + $0xa8] sm:$0xff]  ;;  %s3999_s21 = smov 32  }
  0xb5   : > { %894 = vmatpush.bf16.msra.mxu1 %v3412_v25  ;;  %v817_v12 = vperm.slane %v815_v9, 0  ;;  %v3463_v25 = vld [vmem:[%s4833_s6 + $0xa8] sm:$0xff] }
  0xb6   : > { %971 = vmatpush.bf16.msra.mxu2 %v3420_v26  ;;  %v3471_v26 = vld [vmem:[%s4834_s7 + $0xa8] sm:$0xff] }
  0xb7   : > { %1048 = vmatpush.bf16.msra.mxu3 %v3428_v28  ;;  %v3462_v28 = vld [vmem:[%s4833_s6 + $0xa0] sm:$0xff] }
  0xb9   : > { %895 = vmatpush.bf16.msra.mxu1 %v3411_v29  ;;  %v3470_v29 = vld [vmem:[%s4834_s7 + $0xa0] sm:$0xff] }
  0xba   : > { %972 = vmatpush.bf16.msra.mxu2 %v3419_v30  ;;  %v3478_v30 = vld [vmem:[%s4835_s8 + $0xa0] sm:$0xff] }
  0xbb   : > { %1049 = vmatpush.bf16.msra.mxu3 %v3427_v32  ;;  %v3461_v32 = vld [vmem:[%s4833_s6 + $0x98] sm:$0xff] }
  0xbd   : > { %896 = vmatpush.bf16.msra.mxu1 %v3410_v37  ;;  %v3476_v37 = vld [vmem:[%s4835_s8 + $0x90] sm:$0xff] }
  0xbe   : > { %973 = vmatpush.bf16.msra.mxu2 %v3418_v38  ;;  %v3459_v38 = vld [vmem:[%s4833_s6 + $0x88] sm:$0xff] }
  0xbf   : > { %1050 = vmatpush.bf16.msra.mxu3 %v3426_v39  ;;  %v3467_v39 = vld [vmem:[%s4834_s7 + $0x88] sm:$0xff] }
  0xc1   : > { %1178 = vmatpush.bf16.msrb.mxu1 %v3441_v40  ;;  %v3475_v40 = vld [vmem:[%s4835_s8 + $0x88] sm:$0xff] }
  0xc2   : > { %1256 = vmatpush.bf16.msrb.mxu2 %v3449_v41  ;;  %v3458_v41 = vld [vmem:[%s4833_s6 + $0x80] sm:$0xff] }
  0xc3   : > { %1334 = vmatpush.bf16.msrb.mxu3 %v3457_v42  ;;  %v3466_v42 = vld [vmem:[%s4834_s7 + $0x80] sm:$0xff] }
  0xc5   : > { %1179 = vmatpush.bf16.msrb.mxu1 %v3440_v43  ;;  %v3474_v43 = vld [vmem:[%s4835_s8 + $0x80] sm:$0xff] }
  0xc6   : > { %1257 = vmatpush.bf16.msrb.mxu2 %v3448_v44  ;;  %v3489_v44 = vld [vmem:[%s4833_s6 + $0xf8] sm:$0xff] }
  0xc7   : > { %1335 = vmatpush.bf16.msrb.mxu3 %v3456_v45  ;;  %v3497_v45 = vld [vmem:[%s4834_s7 + $0xf8] sm:$0xff] }
  0xc9   : > { %1180 = vmatpush.bf16.msrb.mxu1 %v3439_v46  ;;  %v3505_v46 = vld [vmem:[%s4835_s8 + $0xf8] sm:$0xff] }
  0xca   : > { %1258 = vmatpush.bf16.msrb.mxu2 %v3447_v47  ;;  %v3488_v47 = vld [vmem:[%s4833_s6 + $0xf0] sm:$0xff] }
  0xcb   : > { %1336 = vmatpush.bf16.msrb.mxu3 %v3455_v48  ;;  %v3496_v48 = vld [vmem:[%s4834_s7 + $0xf0] sm:$0xff] }
  0xcd   : > { %1181 = vmatpush.bf16.msrb.mxu1 %v3438_v49  ;;  %v3504_v49 = vld [vmem:[%s4835_s8 + $0xf0] sm:$0xff] }
  0xce   : > { %1259 = vmatpush.bf16.msrb.mxu2 %v3446_v50  ;;  %v3487_v50 = vld [vmem:[%s4833_s6 + $0xe8] sm:$0xff] }
  0xcf   : > { %1337 = vmatpush.bf16.msrb.mxu3 %v3454_v51  ;;  %v3495_v51 = vld [vmem:[%s4834_s7 + $0xe8] sm:$0xff] }
  0xd1   : > { %1182 = vmatpush.bf16.msrb.mxu1 %v3437_v52  ;;  %v3503_v52 = vld [vmem:[%s4835_s8 + $0xe8] sm:$0xff] }
  0xd2   : > { %1260 = vmatpush.bf16.msrb.mxu2 %v3445_v53  ;;  %v3486_v53 = vld [vmem:[%s4833_s6 + $0xe0] sm:$0xff] }
  0xd3   : > { %1338 = vmatpush.bf16.msrb.mxu3 %v3453_v54  ;;  %v3494_v54 = vld [vmem:[%s4834_s7 + $0xe0] sm:$0xff] }
  0xd5   : > { %1183 = vmatpush.bf16.msrb.mxu1 %v3436_v55  ;;  %v3502_v55 = vld [vmem:[%s4835_s8 + $0xe0] sm:$0xff] }
  0xd6   : > { %1261 = vmatpush.bf16.msrb.mxu2 %v3444_v56  ;;  %v3485_v56 = vld [vmem:[%s4833_s6 + $0xd8] sm:$0xff] }
  0xd7   : > { %1339 = vmatpush.bf16.msrb.mxu3 %v3452_v57  ;;  %v3493_v57 = vld [vmem:[%s4834_s7 + $0xd8] sm:$0xff] }
  0xd9   : > { %1184 = vmatpush.bf16.msrb.mxu1 %v3435_v58  ;;  %v3501_v58 = vld [vmem:[%s4835_s8 + $0xd8] sm:$0xff] }
  0xda   : > { %1262 = vmatpush.bf16.msrb.mxu2 %v3443_v59  ;;  %v3484_v59 = vld [vmem:[%s4833_s6 + $0xd0] sm:$0xff] }
  0xdb   : > { %1340 = vmatpush.bf16.msrb.mxu3 %v3451_v60  ;;  %v3492_v60 = vld [vmem:[%s4834_s7 + $0xd0] sm:$0xff] }
  0xdd   : > { %1185 = vmatpush.bf16.msrb.mxu1 %v3434_v61  ;;  %v3500_v61 = vld [vmem:[%s4835_s8 + $0xd0] sm:$0xff] }
  0xde   : > { %1263 = vmatpush.bf16.msrb.mxu2 %v3442_v62  ;;  %v3483_v62 = vld [vmem:[%s4833_s6 + $0xc8] sm:$0xff] }
  0xdf   : > { %1341 = vmatpush.bf16.msrb.mxu3 %v3450_v63  ;;  %v3491_v63 = vld [vmem:[%s4834_s7 + $0xc8] sm:$0xff] }
 0x121   : > { %v4307_v3 = vpop.f32.mrf.mxu0 }
 0x122   : > { %788 = vadd.xlane.f32.xlu0 %v4307_v3 }
 0x129   : > { %v784_v4 = vpop.f32.mrf.mxu0 }
 0x195   : > { %v789_v33 = vpop.xlane.xlu0 %788 }
 0x196   : > { %v797_v34 = vmul.f32 %v4370_v31, %v789_v33  ;;  %v3469_v33 = vld [vmem:[%s4834_s7 + $0x98] sm:$0xff] }
 0x198   : > { %v4377_v35 = vsub.f32 %v4307_v3, %v797_v34  ;;  %v3477_v34 = vld [vmem:[%s4835_s8 + $0x98] sm:$0xff] }
 0x19a   : > { %v799_v36 = vmul.f32 %v4377_v35, %v4377_v35 }
 0x19c   : > { %800 = vadd.xlane.f32.xlu0 %v799_v36  ;;  %v3468_v36 = vld [vmem:[%s4834_s7 + $0x90] sm:$0xff] }
 0x20f   : > { %v801_v0 = vpop.xlane.xlu0 %800 }
 0x210   : > { %v802_v1 = vmul.f32 %v801_v0, %v4370_v31  ;;  %v3499_v0 = vld [vmem:[%s4835_s8 + $0xc8] sm:$0xff] }
 0x212   : > { %v803_v2 = vadd.f32 1e-05, %v802_v1  ;;  %v3482_v1 = vld [vmem:[%s4833_s6 + $0xc0] sm:$0xff] }
 0x214   : > { %3663 = vrsqrt.f32 %v803_v2  ;;  %vm810_vm3 = vweird.f32 %v803_v2 }
 0x21a   : > { %v3664_v4 = vpop.eup %3663 }
 0x21b   : > { %v805_v5 = vmul.f32 %v3664_v4, %v803_v2  ;;  %vm811_vm2 = vweird.f32 %v3664_v4  ;;  %v3490_v2 = vld [vmem:[%s4834_s7 + $0xc0] sm:$0xff] }
 0x21c   : > { %vm812_vm4 = vmor %vm810_vm3, %vm811_vm2 }
 0x21d   : > { %v806_v7 = vmul.f32 %v3664_v4, %v805_v5 }
 0x21f   : > { %v807_v8 = vmul.f32 0.5, %v806_v7 }
 0x221   : > { %v808_v10 = vsub.f32 1.5, %v807_v8 }
 0x223   : > { %v809_v11 = vmul.f32 %v3664_v4, %v808_v10 }
 0x225   : > { %v813_v13 = vsel %vm812_vm4, %v3664_v4, %v809_v11  ;;  %v3498_v4 = vld [vmem:[%s4835_s8 + $0xc0] sm:$0xff] }
 0x226   : > { %v814_v15 = vmul.f32 %v813_v13, %v4377_v35  ;;  %v3460_v35 = vld [vmem:[%s4833_s6 + $0x90] sm:$0xff] }
 0x228   : > { %v819_v16 = vmul.f32 %v817_v12, %v814_v15 }
 0x22a   : > { %v823_v17 = vadd.f32 %v3658_v14, %v819_v16 }
 0x22c   : > { %v4471_v19 = vpack.c.bf16 %v823_v17, %v823_v17 }
 0x22e   : > { %897 = vmatmul.bf16.vlgmr.msra.gmra.mxu1 %v4471_v19  ;;  %974 = vmatmul.bf16.vlgmr.msra.gmra.mxu2 %v4471_v19 }
 0x22f   : > { %1051 = vmatmul.bf16.vlgmr.msra.gmra.mxu3 %v4471_v19  ;;  %1471 = vmatpush.bf16.msra.mxu1 %v3465_v18 }
 0x230   : > { %1549 = vmatpush.bf16.msra.mxu2 %v3473_v20  ;;  %1627 = vmatpush.bf16.msra.mxu3 %v3481_v21 }
 0x233   : > { %1472 = vmatpush.bf16.msra.mxu1 %v3464_v22 }
 0x234   : > { %1550 = vmatpush.bf16.msra.mxu2 %v3472_v23  ;;  %1628 = vmatpush.bf16.msra.mxu3 %v3480_v24 }
 0x237   : > { %1473 = vmatpush.bf16.msra.mxu1 %v3463_v25 }
 0x238   : > { %1551 = vmatpush.bf16.msra.mxu2 %v3471_v26  ;;  %1629 = vmatpush.bf16.msra.mxu3 %v3479_v27 }
 0x23b   : > { %1474 = vmatpush.bf16.msra.mxu1 %v3462_v28 }
 0x23c   : > { %1552 = vmatpush.bf16.msra.mxu2 %v3470_v29  ;;  %1630 = vmatpush.bf16.msra.mxu3 %v3478_v30 }
 0x23e   : > { %1186 = vmatmul.bf16.vlgmr.msrb.gmra.mxu1 %v4471_v19  ;;  %1264 = vmatmul.bf16.vlgmr.msrb.gmra.mxu2 %v4471_v19 }
 0x23f   : > { %1342 = vmatmul.bf16.vlgmr.msrb.gmra.mxu3 %v4471_v19  ;;  %1475 = vmatpush.bf16.msra.mxu1 %v3461_v32 }
 0x240   : > { %1553 = vmatpush.bf16.msra.mxu2 %v3469_v33  ;;  %1631 = vmatpush.bf16.msra.mxu3 %v3477_v34 }
 0x243   : > { %1476 = vmatpush.bf16.msra.mxu1 %v3460_v35 }
 0x244   : > { %1554 = vmatpush.bf16.msra.mxu2 %v3468_v36  ;;  %1632 = vmatpush.bf16.msra.mxu3 %v3476_v37 }
 0x247   : > { %1477 = vmatpush.bf16.msra.mxu1 %v3459_v38 }
 0x248   : > { %1555 = vmatpush.bf16.msra.mxu2 %v3467_v39  ;;  %1633 = vmatpush.bf16.msra.mxu3 %v3475_v40 }
 0x24b   : > { %1478 = vmatpush.bf16.msra.mxu1 %v3458_v41 }
 0x24c   : > { %1556 = vmatpush.bf16.msra.mxu2 %v3466_v42  ;;  %1634 = vmatpush.bf16.msra.mxu3 %v3474_v43 }
 0x24e   : > { %1479 = vmatmul.bf16.vlgmr.msra.gmra.mxu1 %v4471_v19 }
 0x24f   : > { %1764 = vmatpush.bf16.msrb.mxu1 %v3489_v44  ;;  %1557 = vmatmul.bf16.vlgmr.msra.gmra.mxu2 %v4471_v19 }
 0x250   : > { %1842 = vmatpush.bf16.msrb.mxu2 %v3497_v45  ;;  %1920 = vmatpush.bf16.msrb.mxu3 %v3505_v46 }
 0x251   : > { %1635 = vmatmul.bf16.vlgmr.msra.gmra.mxu3 %v4471_v19 }
 0x253   : > { %1765 = vmatpush.bf16.msrb.mxu1 %v3488_v47 }
 0x254   : > { %1843 = vmatpush.bf16.msrb.mxu2 %v3496_v48  ;;  %1921 = vmatpush.bf16.msrb.mxu3 %v3504_v49 }
 0x257   : > { %1766 = vmatpush.bf16.msrb.mxu1 %v3487_v50 }
 0x258   : > { %1844 = vmatpush.bf16.msrb.mxu2 %v3495_v51  ;;  %1922 = vmatpush.bf16.msrb.mxu3 %v3503_v52 }
 0x25b   : > { %1767 = vmatpush.bf16.msrb.mxu1 %v3486_v53 }
 0x25c   : > { %1845 = vmatpush.bf16.msrb.mxu2 %v3494_v54  ;;  %1923 = vmatpush.bf16.msrb.mxu3 %v3502_v55 }
 0x25f   : > { %1768 = vmatpush.bf16.msrb.mxu1 %v3485_v56 }
 0x260   : > { %1846 = vmatpush.bf16.msrb.mxu2 %v3493_v57  ;;  %1924 = vmatpush.bf16.msrb.mxu3 %v3501_v58 }
 0x263   : > { %1769 = vmatpush.bf16.msrb.mxu1 %v3484_v59 }
 0x264   : > { %1847 = vmatpush.bf16.msrb.mxu2 %v3492_v60  ;;  %1925 = vmatpush.bf16.msrb.mxu3 %v3500_v61 }
 0x267   : > { %1770 = vmatpush.bf16.msrb.mxu1 %v3483_v62 }
 0x268   : > { %1848 = vmatpush.bf16.msrb.mxu2 %v3491_v63  ;;  %1926 = vmatpush.bf16.msrb.mxu3 %v3499_v0 }
 0x26b   : > { %1771 = vmatpush.bf16.msrb.mxu1 %v3482_v1 }
 0x26c   : > { %1849 = vmatpush.bf16.msrb.mxu2 %v3490_v2  ;;  %1927 = vmatpush.bf16.msrb.mxu3 %v3498_v4 }
 0x26e   : > { %1772 = vmatmul.bf16.vlgmr.msrb.gmra.mxu1 %v4471_v19 }
 0x26f   : > { %1850 = vmatmul.bf16.vlgmr.msrb.gmra.mxu2 %v4471_v19  ;;  %1928 = vmatmul.bf16.vlgmr.msrb.gmra.mxu3 %v4471_v19 }
 0x2ab   : > { %v898_v5 = vpop.f32.mrf.mxu1 }
 0x2ac   : > { %v1056_v14 = vpack.c.bf16 %v898_v5, %v898_v5 }
 0x2b1   : > { %v975_v6 = vpop.f32.mrf.mxu2 }
 0x2b2   : > { %v1057_v7 = vpack.c.bf16 %v975_v6, %v975_v6  ;;  %v1052_v8 = vpop.f32.mrf.mxu3 }
 0x2b3   : > { %v1058_v9 = vpack.c.bf16 %v1052_v8, %v1052_v8  ;;  %v900_v10 = vpop.f32.mrf.mxu1 }
 0x2b4   : > { %v1064_v11 = vsel %vm1059_vm5, %v1057_v7, 0 }
 0x2b5   : > { %v1097_v12 = vsel %vm1095_vm6, %v1058_v9, 0  ;;  %1073 = vmatpush.bf16.xpose.msrb.mxu0 %v1064_v11 }
 0x2b9   : > { %v977_v13 = vpop.f32.mrf.mxu2 }
 0x2ba   : > { %v1054_v15 = vpop.f32.mrf.mxu3 }
 0x2bb   : > { %v1187_v16 = vpop.f32.mrf.mxu1 }
 0x2bc   : > { %2800 = vmatmul.msk.bf16.vlgmr.msrb.gmra.mxu0 %vm1059_vm5, %v1056_v14  ;;  %v1347_v56 = vpack.c.bf16 %v1187_v16, %v1187_v16 }
 0x2bd   : > { %1106 = vmatpush.bf16.msra.mxu0 %v1097_v12 }
 0x2c1   : > { %v1265_v17 = vpop.f32.mrf.mxu2 }
 0x2c2   : > { %v1348_v18 = vpack.c.bf16 %v1265_v17, %v1265_v17  ;;  %v1343_v19 = vpop.f32.mrf.mxu3 }
 0x2c3   : > { %v1349_v20 = vpack.c.bf16 %v1343_v19, %v1343_v19  ;;  %v1189_v21 = vpop.f32.mrf.mxu1 }
 0x2c4   : > { %v1354_v22 = vsel %vm1059_vm5, %v1348_v18, 0 }
 0x2c5   : > { %v1385_v23 = vsel %vm1095_vm6, %v1349_v20, 0  ;;  %1363 = vmatpush.bf16.xpose.msrb.mxu0 %v1354_v22 }
 0x2c9   : > { %v1267_v24 = vpop.f32.mrf.mxu2 }
 0x2ca   : > { %v1345_v25 = vpop.f32.mrf.mxu3 }
 0x2cb   : > { %v4631_v26 = vpop.f32.mrf.mxu1 }
 0x2cc   : > { %v1640_v10 = vpack.c.bf16 %v4631_v26, %v4631_v26 }
 0x2d2   : > { %v1558_v27 = vpop.f32.mrf.mxu2 }
 0x2d3   : > { %v1482_v30 = vpop.f32.mrf.mxu1  ;;  %v1641_v55 = vpack.c.bf16 %v1558_v27, %v1558_v27 }
 0x2d4   : > { %v1636_v28 = vpop.f32.mrf.mxu3 }
 0x2d5   : > { %v1642_v29 = vpack.c.bf16 %v1636_v28, %v1636_v28  ;;  %v1647_v57 = vsel %vm1059_vm5, %v1641_v55, 0 }
 0x2d7   : > { %v1678_v32 = vsel %vm1095_vm6, %v1642_v29, 0 }
 0x2da   : > { %v1560_v33 = vpop.f32.mrf.mxu2 }
 0x2dc   : > { %v1638_v34 = vpop.f32.mrf.mxu3 }
 0x2eb   : > { %v4634_v35 = vpop.f32.mrf.mxu1 }
 0x2ec   : > { %v1933_v27 = vpack.c.bf16 %v4634_v35, %v4634_v35 }
 0x2f2   : > { %v1851_v36 = vpop.f32.mrf.mxu2  ;;  %v1929_v37 = vpop.f32.mrf.mxu3 }
 0x2f3   : > { %v1935_v38 = vpack.c.bf16 %v1929_v37, %v1929_v37  ;;  %v1775_v39 = vpop.f32.mrf.mxu1  ;;  %v1934_v9 = vpack.c.bf16 %v1851_v36, %v1851_v36 }
 0x2f5   : > { %v4637_v40 = vsel %vm1095_vm6, %v1935_v38, 0  ;;  %v1940_v11 = vsel %vm1059_vm5, %v1934_v9, 0 }
 0x2fa   : > { %v1853_v41 = vpop.f32.mrf.mxu2  ;;  %v1931_v42 = vpop.f32.mrf.mxu3 }
 0x339   : > { %v1075_v43 = vpop.f32.mrf.mxu0 }
 0x33a   : > { %v1080_v44 = vsel %vm1079_vm7, %v1075_v43, -inf }
 0x33b   : > { %1081 = vmax.xlane.f32.xlu1 %v1080_v44  ;;  %v3513_v44 = vld [vmem:[%s4900_s10 + $0x38] sm:$0xff] }
 0x33c   : > { %2058 = vmatpush.bf16.msra.mxu1 %v3513_v44 }
 0x341   : > { %v1077_v45 = vpop.f32.mrf.mxu0 }
 0x342   : > { %v3512_v45 = vld [vmem:[%s4900_s10 + $0x30] sm:$0xff] }
 0x343   : > { %2059 = vmatpush.bf16.msra.mxu1 %v3512_v45 }
 0x3ae   : > { %v1082_v46 = vpop.xlane.xlu1 %1081 }
 0x3af   : > { %v1083_v47 = vsub.f32 %v1075_v43, %v1082_v46  ;;  %v3511_v46 = vld [vmem:[%s4900_s10 + $0x28] sm:$0xff] }
 0x3b0   : > { %2060 = vmatpush.bf16.msra.mxu1 %v3511_v46 }
 0x3b1   : > { %v1084_v48 = vmul.f32 1.442695, %v1083_v47  ;;  %v3510_v47 = vld [vmem:[%s4900_s10 + $0x20] sm:$0xff] }
 0x3b3   : > { %3665 = vpow2.f32 %v1084_v48  ;;  %v3509_v48 = vld [vmem:[%s4900_s10 + $0x18] sm:$0xff] }
 0x3b4   : > { %2061 = vmatpush.bf16.msra.mxu1 %v3510_v47 }
 0x3b8   : > { %2062 = vmatpush.bf16.msra.mxu1 %v3509_v48 }
 0x3b9   : > { %v3666_v49 = vpop.eup %3665 }
 0x3ba   : > { %v1086_v50 = vsel %vm1079_vm7, %v3666_v49, 0.0 }
 0x3bb   : > { %1087 = vadd.xlane.f32.xlu1 %v1086_v50 }
 0x42e   : > { %v1088_v51 = vpop.xlane.xlu1 %1087 }
 0x42f   : > { %3667 = vrcp.f32 %v1088_v51 }
 0x435   : > { %v3668_v52 = vpop.eup %3667 }
 0x436   : > { %v1090_v53 = vmul.f32 %v3668_v52, %v3666_v49  ;;  %v3508_v49 = vld [vmem:[%s4900_s10 + $0x10] sm:$0xff]  ;;  %v3507_v52 = vld [vmem:[%s4900_s10 + $0x8] sm:$0xff] }
 0x437   : > { %2063 = vmatpush.bf16.msra.mxu1 %v3508_v49 }
 0x438   : > { %v1091_v54 = vpack.c.bf16 %v1090_v53, %v1090_v53  ;;  %v3506_v53 = vld [vmem:[%s4900_s10] sm:$0xff] }
 0x43a   : > { %2801 = vmatmul.msk.bf16.vlgmr.msra.gmra.mxu0 %vm1079_vm7, %v1091_v54 }
 0x43b   : > { %1394 = vmatpush.bf16.msra.mxu0 %v1385_v23  ;;  %2064 = vmatpush.bf16.msra.mxu1 %v3507_v52 }
 0x43f   : > { %2065 = vmatpush.bf16.msra.mxu1 %v3506_v53 }
 0x44a   : > { %2946 = vmatmul.msk.bf16.vlgmr.msrb.gmra.mxu0 %vm1059_vm5, %v1347_v56 }
 0x44b   : > { %1656 = vmatpush.bf16.xpose.msrb.mxu0 %v1647_v57  ;;  %v3659_v57 = vld [vmem:[#allocation14] ss:$0 sm:$0xff] }
 0x4b7   : > { %v1108_v58 = vpop.f32.mrf.mxu0 }
 0x4b8   : > { %1112 = vst.msk [vmem:[#allocation2] sm:$0xff] %vm1059_vm5, %v1108_v58 }
 0x4bf   : > { %v1110_v59 = vpop.f32.mrf.mxu0 }
 0x4c7   : > { %v1365_v60 = vpop.f32.mrf.mxu0 }
 0x4c8   : > { %v1369_v61 = vsel %vm1079_vm7, %v1365_v60, -inf }
 0x4c9   : > { %1370 = vmax.xlane.f32.xlu2 %v1369_v61 }
 0x4cf   : > { %v1367_v62 = vpop.f32.mrf.mxu0 }
 0x53c   : > { %v1371_v63 = vpop.xlane.xlu2 %1370 }
 0x53d   : > { %v1372_v0 = vsub.f32 %v1365_v60, %v1371_v63 }
 0x53f   : > { %v1373_v1 = vmul.f32 1.442695, %v1372_v0 }
 0x541   : > { %3669 = vpow2.f32 %v1373_v1 }
 0x547   : > { %v3670_v2 = vpop.eup %3669 }
 0x548   : > { %v1375_v4 = vsel %vm1079_vm7, %v3670_v2, 0.0 }
 0x549   : > { %1376 = vadd.xlane.f32.xlu2 %v1375_v4 }
 0x5bc   : > { %v1377_v5 = vpop.xlane.xlu2 %1376 }
 0x5bd   : > { %3671 = vrcp.f32 %v1377_v5 }
 0x5c3   : > { %v3672_v6 = vpop.eup %3671 }
 0x5c4   : > { %v1379_v7 = vmul.f32 %v3672_v6, %v3670_v2 }
 0x5c6   : > { %v1380_v8 = vpack.c.bf16 %v1379_v7, %v1379_v7  ;;  %v2077_v7 = vld [vmem:[%s669_s22] sm:$0x1]  ;;  %s4701_s22 = scalar_lea.vmem [#allocation15], %s2695_s18 }
 0x5c8   : > { %2947 = vmatmul.msk.bf16.vlgmr.msra.gmra.mxu0 %vm1079_vm7, %v1380_v8 }
 0x5c9   : > { %1687 = vmatpush.bf16.msra.mxu0 %v1678_v32 }
 0x5d8   : > { %3092 = vmatmul.msk.bf16.vlgmr.msrb.gmra.mxu0 %vm1059_vm5, %v1640_v10  ;;  %v2099_v10 = vadd.f32 1.0, %v2077_v7 }
 0x5d9   : > { %1949 = vmatpush.bf16.xpose.msrb.mxu0 %v1940_v11 }
 0x645   : > { %v1396_v12 = vpop.f32.mrf.mxu0 }
 0x64d   : > { %v1398_v13 = vpop.f32.mrf.mxu0 }
 0x64e   : > { %v2101_v13 = vperm.slane %v2099_v10, 0 }
 0x655   : > { %v1658_v14 = vpop.f32.mrf.mxu0 }
 0x656   : > { %v1662_v15 = vsel %vm1079_vm7, %v1658_v14, -inf }
 0x657   : > { %1663 = vmax.xlane.f32.xlu0 %v1662_v15 }
 0x65d   : > { %v1660_v16 = vpop.f32.mrf.mxu0 }
 0x6ca   : > { %v1664_v17 = vpop.xlane.xlu0 %1663 }
 0x6cb   : > { %v1665_v18 = vsub.f32 %v1658_v14, %v1664_v17 }
 0x6cd   : > { %v1666_v19 = vmul.f32 1.442695, %v1665_v18 }
 0x6cf   : > { %3673 = vpow2.f32 %v1666_v19  ;;  %v4703_v19 = vmov 0.0  }
 0x6d5   : > { %v3674_v20 = vpop.eup %3673 }
 0x6d6   : > { %v1668_v21 = vsel %vm1079_vm7, %v3674_v20, 0.0 }
 0x6d7   : > { %1669 = vadd.xlane.f32.xlu1 %v1668_v21 }
 0x6f0   : > { %1401 = vrot.lane.b32.xlu1 %v1396_v12, %s3999_s21 }
 0x74a   : > { %v1670_v22 = vpop.xlane.xlu1 %1669 }
 0x74b   : > { %3675 = vrcp.f32 %v1670_v22 }
 0x751   : > { %v3676_v23 = vpop.eup %3675 }
 0x752   : > { %v1672_v24 = vmul.f32 %v3676_v23, %v3674_v20 }
 0x754   : > { %v1673_v25 = vpack.c.bf16 %v1672_v24, %v1672_v24 }
 0x756   : > { %3093 = vmatmul.msk.bf16.vlgmr.msra.gmra.mxu0 %vm1079_vm7, %v1673_v25 }
 0x757   : > { %1980 = vmatpush.bf16.msra.mxu0 %v4637_v40 }
 0x762   : > { %v1402_v26 = vpop.permute.xlu1 %1401 }
 0x763   : > { %1405 = vst.msk [vmem:[#allocation2] sm:$0xff] %vm1404_vm8, %v1402_v26 }
 0x766   : > { %3238 = vmatmul.msk.bf16.vlgmr.msrb.gmra.mxu0 %vm1059_vm5, %v1933_v27 }
 0x7d3   : > { %v1689_v28 = vpop.f32.mrf.mxu0 }
 0x7db   : > { %v1691_v29 = vpop.f32.mrf.mxu0 }
 0x7e3   : > { %v1951_v30 = vpop.f32.mrf.mxu0 }
 0x7e4   : > { %v1955_v32 = vsel %vm1079_vm7, %v1951_v30, -inf }
 0x7e5   : > { %1956 = vmax.xlane.f32.xlu2 %v1955_v32 }
 0x7eb   : > { %v1953_v33 = vpop.f32.mrf.mxu0 }
 0x7fd   : > { %1694 = vrot.lane.b32.xlu2 %v1689_v28, %s4000_s16 }
 0x858   : > { %v1957_v34 = vpop.xlane.xlu2 %1956 }
 0x859   : > { %v1958_v36 = vsub.f32 %v1951_v30, %v1957_v34 }
 0x85b   : > { %v1959_v37 = vmul.f32 1.442695, %v1958_v36 }
 0x85d   : > { %3677 = vpow2.f32 %v1959_v37 }
 0x860   : > { %v1695_v38 = vpop.permute.xlu2 %1694 }
 0x861   : > { %1698 = vst.msk [vmem:[#allocation2] sm:$0xff] %vm1697_vm9, %v1695_v38 }
 0x863   : > { %v3678_v39 = vpop.eup %3677 }
 0x864   : > { %v1961_v35 = vsel %vm1079_vm7, %v3678_v39, 0.0 }
 0x865   : > { %1962 = vadd.xlane.f32.xlu0 %v1961_v35 }
 0x8d8   : > { %v1963_v40 = vpop.xlane.xlu0 %1962 }
 0x8d9   : > { %3679 = vrcp.f32 %v1963_v40 }
 0x8df   : > { %v3680_v41 = vpop.eup %3679 }
 0x8e0   : > { %v1965_v42 = vmul.f32 %v3680_v41, %v3678_v39 }
 0x8e2   : > { %v1966_v43 = vpack.c.bf16 %v1965_v42, %v1965_v42 }
 0x8e4   : > { %3239 = vmatmul.msk.bf16.vlgmr.msra.gmra.mxu0 %vm1079_vm7, %v1966_v43 }
 0x961   : > { %v1982_v50 = vpop.f32.mrf.mxu0 }
 0x962   : > { %1987 = vrot.lane.b32.xlu0 %v1982_v50, %s4001_s13 }
 0x969   : > { %v1984_v51 = vpop.f32.mrf.mxu0 }
 0x9d4   : > { %v1988_v54 = vpop.permute.xlu0 %1987 }
 0x9d5   : > { %1991 = vst.msk [vmem:[#allocation2] sm:$0xff] %vm1990_vm10, %v1988_v54 }
 0x9dc   : > { %v1992_v55 = vld [vmem:[#allocation2] sm:$0xff] }
 0x9dd   : > { %v1993_v56 = vpack.c.bf16 %v1992_v55, %v1992_v55 }
 0x9df   : > { %2066 = vmatmul.bf16.vlgmr.msra.gmra.mxu1 %v1993_v56 }
 0xa5c   : > { %v2067_v58 = vpop.f32.mrf.mxu1 }
 0xa5d   : > { %v2071_v59 = vadd.f32 %v2067_v58, %v4307_v3 }
 0xa5f   : > { %v4687_v60 = vadd.f32 %v3659_v57, %v2071_v59 }
 0xa61   : > { %2079 = vadd.xlane.f32.xlu2 %v4687_v60 }
 0xa64   : > { %v2069_v61 = vpop.f32.mrf.mxu1 }
 0xad4   : > { %v2080_v62 = vpop.xlane.xlu2 %2079 }
 0xad5   : > { %v2081_v63 = vmul.f32 %v2080_v62, %v4370_v31 }
 0xad7   : > { %v2082_v0 = vsub.f32 %v4687_v60, %v2081_v63 }
 0xad9   : > { %v2083_v1 = vmul.f32 %v2082_v0, %v2082_v0 }
 0xadb   : > { %2084 = vadd.xlane.f32.xlu1 %v2083_v1 }
 0xb4e   : > { %v2085_v2 = vpop.xlane.xlu1 %2084 }
 0xb4f   : > { %v2086_v4 = vmul.f32 %v2085_v2, %v4370_v31  ;;  %v3660_v31 = vld [vmem:[%s678_s27] ss:$0 sm:$0xff] }
 0xb51   : > { %v2087_v5 = vadd.f32 1e-05, %v2086_v4 }
 0xb53   : > { %3681 = vrsqrt.f32 %v2087_v5  ;;  %vm2094_vm12 = vweird.f32 %v2087_v5 }
 0xb59   : > { %v3682_v6 = vpop.eup %3681 }
 0xb5a   : > { %v2089_v3 = vmul.f32 %v3682_v6, %v2087_v5  ;;  %vm2095_vm11 = vweird.f32 %v3682_v6 }
 0xb5b   : > { %vm2096_vm13 = vmor %vm2094_vm12, %vm2095_vm11 }
 0xb5c   : > { %v2090_v8 = vmul.f32 %v3682_v6, %v2089_v3 }
 0xb5e   : > { %v2091_v9 = vmul.f32 0.5, %v2090_v8 }
 0xb60   : > { %v2092_v11 = vsub.f32 1.5, %v2091_v9 }
 0xb62   : > { %v2093_v12 = vmul.f32 %v3682_v6, %v2092_v11 }
 0xb64   : > { %v2097_v14 = vsel %vm2096_vm13, %v3682_v6, %v2093_v12 }
 0xb65   : > { %v2098_v15 = vmul.f32 %v2097_v14, %v2082_v0 }
 0xb67   : > { %v2103_v16 = vmul.f32 %v2101_v13, %v2098_v15 }
 0xb69   : > { %v2107_v17 = vadd.f32 %v3660_v31, %v2103_v16 }
 0xb6b   : > { %v4697_v18 = vpack.c.bf16 %v2107_v17, %v2107_v17 }
 0xb6c LB: >> { %s4714_s27 = sshll.u32 %s3992_s25, 6  ;;  %s4901_s18 = sld [smem:[#allocation37_spill]]  ;;  %s3992_s25 = sphi %s4705_s25, %s2114_s25   ;;  %v3988_v19 = vphi %v4703_v19, %v4906_v19  }
 0xb6d   : >> { %s4902_s23 = sld [smem:[#allocation36_spill]] }
 0xb6e   : >> { %s4903_s29 = sld [smem:[#allocation34_spill]] }
 0xb6f   : >> { %s4904_s14 = sld [smem:[#allocation35_spill]] }
 0xb70   : >> { %s4905_s17 = sld [smem:[#allocation38_spill]] }
 0xb72   : >> { %s2219_s26 = scalar_lea.vmem %s4901_s18, %s3992_s25 }
 0xb73   : >> { %s2202_s2 = scalar_lea.vmem %s4902_s23, %s4714_s27  ;;  %v3683_v39 = vld [vmem:[%s2219_s26] ss:$0 sm:$0xff] }
 0xb74   : >> { %s2118_s12 = scalar_lea.vmem %s4903_s29, %s4714_s27  ;;  %v3531_v20 = vld [vmem:[%s2202_s2 + $0x38] sm:$0xff]  ;;  %v3530_v21 = vld [vmem:[%s2202_s2 + $0x30] sm:$0xff]  ;;  %v3529_v24 = vld [vmem:[%s2202_s2 + $0x28] sm:$0xff] }
 0xb75   : >> { %2272 = vmatpush.bf16.msra.mxu1 %v3531_v20  ;;  %v3522_v22 = vld [vmem:[%s2118_s12 + $0x38] sm:$0xff]  ;;  %v3521_v23 = vld [vmem:[%s2118_s12 + $0x30] sm:$0xff]  ;;  %v3520_v25 = vld [vmem:[%s2118_s12 + $0x28] sm:$0xff]  ;;  %s2135_s21 = scalar_lea.vmem %s4904_s14, %s3992_s25  ;;  %s2114_s25 = sadd.s32 1, %s3992_s25  }
 0xb76   : >> { %2188 = vmatpush.bf16.msra.mxu0 %v3522_v22  ;;  %v3528_v26 = vld [vmem:[%s2202_s2 + $0x20] sm:$0xff]  ;;  %v3527_v28 = vld [vmem:[%s2202_s2 + $0x18] sm:$0xff]  ;;  %v3526_v30 = vld [vmem:[%s2202_s2 + $0x10] sm:$0xff]  ;;  %s4738_s3 = scalar_lea.vmem %s4905_s17, %s4714_s27  ;;  %p2111_p4 = scmp.ge.s32.totalorder %s2114_s25, 4  }
 0xb77   : >> { %v3519_v27 = vld [vmem:[%s2118_s12 + $0x20] sm:$0xff]  ;;  %v3518_v29 = vld [vmem:[%s2118_s12 + $0x18] sm:$0xff]  ;;  %v3517_v32 = vld [vmem:[%s2118_s12 + $0x10] sm:$0xff]  ;;  %s4907_s1 = sld [smem:[#allocation40_spill]] (%p2111_p4)  ;;  %s3406_s13 = sshll.u32 (%p2111_p4), %s4118_s0, 3 }
 0xb78   : >> { %v3525_v33 = vld [vmem:[%s2202_s2 + $0x8] sm:$0xff]  ;;  %v3524_v36 = vld [vmem:[%s2202_s2] sm:$0xff]  ;;  %v3540_v38 = vld [vmem:[%s4738_s3 + $0x38] sm:$0xff]  ;;  %s4908_s27 = sld [smem:[#allocation39_spill]] (%p2111_p4)  ;;  %s2509_s20 = sshll.u32 (%p2111_p4), %s4701_s22, 4  ;;  %s2510_s20 = int_to_ptr.vmem [resolvable:$true] %s2509_s20 }
 0xb79   : >> { %2273 = vmatpush.bf16.msra.mxu1 %v3530_v21  ;;  %v3516_v34 = vld [vmem:[%s2118_s12 + $0x8] sm:$0xff]  ;;  %v3515_v37 = vld [vmem:[%s2118_s12] sm:$0xff]  ;;  %2397 = vmatpush.bf16.msra.mxu2 %v3540_v38  ;;  %v3539_v35 = vld [vmem:[%s4738_s3 + $0x30] sm:$0xff]  ;;  %s4910_s16 = sld [smem:[#allocation41_spill]] (%p2111_p4) }
 0xb7a   : >> { %2189 = vmatpush.bf16.msra.mxu0 %v3521_v23  ;;  %v3538_v42 = vld [vmem:[%s4738_s3 + $0x28] sm:$0xff]  ;;  %v3537_v45 = vld [vmem:[%s4738_s3 + $0x20] sm:$0xff]  ;;  %v3536_v50 = vld [vmem:[%s4738_s3 + $0x18] sm:$0xff] }
 0xb7b   : >> { %v3535_v56 = vld [vmem:[%s4738_s3 + $0x10] sm:$0xff]  ;;  %v3534_v59 = vld [vmem:[%s4738_s3 + $0x8] sm:$0xff]  ;;  %v3533_v1 = vld [vmem:[%s4738_s3] sm:$0xff]  ;;  %s2497_s3 = scalar_lea.sflag (%p2111_p4), [#allocation5], %s4280_s15 }
 0xb7d   : >> { %2274 = vmatpush.bf16.msra.mxu1 %v3529_v24  ;;  %2398 = vmatpush.bf16.msra.mxu2 %v3539_v35  ;;  %v3684_v24 = vld [vmem:[%s2135_s21] ss:$0 sm:$0xff]  ;;  %v3547_v38 = vld [vmem:[%s4907_s1 + $0x30] sm:$0xff] (%p2111_p4) }
 0xb7e   : >> { %2190 = vmatpush.bf16.msra.mxu0 %v3520_v25  ;;  %v3543_v35 = vld [vmem:[%s4907_s1 + $0x10] sm:$0xff] (%p2111_p4) }
 0xb7f   : > { %s2507_s25 = scalar_lea.hbm (%p2111_p4), %s4910_s16, %s3406_s13  ;;  %s3918_s26 = scalar_lea.hbm (%p2111_p4), %s4910_s16, 16 }
 0xb80   : > { %s2511_s17 = sshll.u32 (%p2111_p4), %s2507_s25, 4  ;;  %s2512_s17 = int_to_ptr.hbm [resolvable:$true] %s2511_s17 }
 0xb81   : >> { %2275 = vmatpush.bf16.msra.mxu1 %v3528_v26  ;;  %2399 = vmatpush.bf16.msra.mxu2 %v3538_v42  ;;  %v3542_v42 = vld [vmem:[%s4907_s1 + $0x8] sm:$0xff] (%p2111_p4)  ;;  %s3912_s9 = sshra.s32 (%p2111_p4), %s2512_s17, 4  ;;  %s3913_s9 = int_to_ptr.hbm [resolvable:$true] %s3912_s9 }
 0xb82   : >> { %2191 = vmatpush.bf16.msra.mxu0 %v3519_v27  ;;  %s3914_s23 = scalar_lea.hbm (%p2111_p4), %s3913_s9, 8  ;;  %p3919_p5 = scmp.lt.s32.totalorder (%p2111_p4), %s3913_s9, %s4910_s16 }
 0xb83   : > { %p3915_p12 = scmp.ne.s32.totalorder (%p2111_p4), %s3913_s9, %s3914_s23  ;;  %p3920_p1 = scmp.lt.s32.totalorder (%p2111_p4), %s3918_s26, %s3914_s23 }
 0xb85   : >> { %2276 = vmatpush.bf16.msra.mxu1 %v3527_v28  ;;  %2400 = vmatpush.bf16.msra.mxu2 %v3537_v45  ;;  %p3916_p0 = pnand (%p2111_p4), %p3915_p12, %p4170_p7  ;;  %p3921_p11 = por (%p2111_p4), %p3920_p1, %p3919_p5 }
 0xb86   : >> { %2192 = vmatpush.bf16.msra.mxu0 %v3518_v29 }
 0xb87   : > { %p3917_p3 = pneg (%p2111_p4), %p3916_p0 }
 0xb89   : >> { %2277 = vmatpush.bf16.msra.mxu1 %v3526_v30  ;;  %2401 = vmatpush.bf16.msra.mxu2 %v3536_v50  ;;  %p3922_p2 = pnand (%p2111_p4), %p3921_p11, %p3917_p3 }
 0xb8a   : >> { %2193 = vmatpush.bf16.msra.mxu0 %v3517_v32 }
 0xb8d   : >> { %2278 = vmatpush.bf16.msra.mxu1 %v3525_v33  ;;  %2402 = vmatpush.bf16.msra.mxu2 %v3535_v56 }
 0xb8e   : >> { %2194 = vmatpush.bf16.msra.mxu0 %v3516_v34 }
 0xb91   : >> { %2279 = vmatpush.bf16.msra.mxu1 %v3524_v36  ;;  %2403 = vmatpush.bf16.msra.mxu2 %v3534_v59 }
 0xb92   : >> { %2195 = vmatpush.bf16.msra.mxu0 %v3515_v37  ;;  %v3548_v37 = vld [vmem:[%s4907_s1 + $0x38] sm:$0xff] (%p2111_p4) }
 0xb94   : >> { %2280 = vmatmul.bf16.vlgmr.msra.gmra.mxu1 %v4697_v18 }
 0xb95   : >> { %2196 = vmatmul.bf16.vlgmr.msra.gmra.mxu0 %v4697_v18  ;;  %2404 = vmatpush.bf16.msra.mxu2 %v3533_v1  ;;  %v3544_v18 = vld [vmem:[%s4907_s1 + $0x18] sm:$0xff] (%p2111_p4) }
 0xb96   : > { %2482 = vmatpush.bf16.msra.mxu0 (%p2111_p4), %v3548_v37 }
 0xb9a   : > { %2483 = vmatpush.bf16.msra.mxu0 (%p2111_p4), %v3547_v38 }
 0xc11   : >> { %v2281_v40 = vpop.f32.mrf.mxu1 }
 0xc12   : >> { %v2282_v41 = vadd.f32 %v3683_v39, %v2281_v40  ;;  %v2197_v53 = vpop.f32.mrf.mxu0  ;;  %v3545_v39 = vld [vmem:[%s4907_s1 + $0x20] sm:$0xff] (%p2111_p4) }
 0xc13   : >> { %v2198_v27 = vadd.f32 %v3684_v24, %v2197_v53 }
 0xc14   : >> { %v2286_v43 = vmul.f32 0.70710677, %v2282_v41  ;;  %v2285_v26 = vmul.f32 0.5, %v2282_v41  ;;  %v3687_v41 = vld [vmem:[%s4908_s27] ss:$0 sm:$0xff] (%p2111_p4) }
 0xc16   : >> { %v2287_v44 = vmul.f32 %v2286_v43, %v2286_v43 }
 0xc18   : >> { %v2288_v46 = vmin.f32 %v2287_v44, 16.0  ;;  %v3541_v44 = vld [vmem:[%s4907_s1] sm:$0xff] (%p2111_p4) }
 0xc19   : >> { %v2283_v47 = vpop.f32.mrf.mxu1 }
 0xc1a   : >> { %v2289_v48 = vmul.f32 2.1237322e-06, %v2288_v46  ;;  %v2300_v49 = vmul.f32 3.8918573e-05, %v2288_v46  ;;  %v2199_v0 = vpop.f32.mrf.mxu0 }
 0xc1c   : >> { %v2290_v51 = vadd.f32 0.00028619796, %v2289_v48  ;;  %v2301_v52 = vadd.f32 0.001143296, %v2300_v49 }
 0xc1e   : >> { %v2291_v54 = vmul.f32 %v2290_v51, %v2288_v46  ;;  %v2302_v55 = vmul.f32 %v2301_v52, %v2288_v46 }
 0xc20   : >> { %v2303_v57 = vadd.f32 0.014752088, %v2302_v55  ;;  %v2292_v58 = vadd.f32 0.0036580483, %v2291_v54 }
 0xc22   : >> { %v2304_v61 = vmul.f32 %v2303_v57, %v2288_v46  ;;  %v2293_v63 = vmul.f32 %v2292_v58, %v2288_v46 }
 0xc24   : >> { %v2305_v62 = vadd.f32 0.112945676, %v2304_v61  ;;  %v2294_v5 = vadd.f32 0.05243302, %v2293_v63 }
 0xc26   : >> { %v2306_v2 = vmul.f32 %v2305_v62, %v2288_v46  ;;  %v2295_v7 = vmul.f32 %v2294_v5, %v2288_v46 }
 0xc28   : >> { %v2307_v4 = vadd.f32 0.4994258, %v2306_v2  ;;  %v2296_v8 = vadd.f32 0.18741608, %v2295_v7 }
 0xc2a   : >> { %v2308_v6 = vmul.f32 %v2307_v4, %v2288_v46  ;;  %v2297_v10 = vmul.f32 %v2296_v8, %v2288_v46 }
 0xc2c   : >> { %v2309_v3 = vadd.f32 1.0, %v2308_v6  ;;  %v2298_v14 = vadd.f32 1.1283791, %v2297_v10 }
 0xc2e   : >> { %3685 = vrcp.f32 %v2309_v3  ;;  %v2321_v13 = vand.u32 2147483648, %v2309_v3  ;;  %v2319_v15 = vand.u32 2147483647, %v2309_v3  ;;  %vm2315_vm15 = vweird.f32 %v2309_v3 }
 0xc2f   : >> { %v2299_v20 = vmul.f32 %v2298_v14, %v2286_v43 }
 0xc30   : >> { %v2322_v17 = vor.u32 1.1754944e-38, %v2321_v13  ;;  %vm2320_vm1 = vcmp.eq.f32.partialorder %v2319_v15, 8.507059e+37 }
 0xc34   : >> { %v3686_v9 = vpop.eup %3685 }
 0xc35   : >> { %v2311_v11 = vmul.f32 %v3686_v9, %v2309_v3  ;;  %vm2316_vm14 = vweird.f32 %v3686_v9 }
 0xc36   : >> { %vm2317_vm0 = vmor %vm2315_vm15, %vm2316_vm14 }
 0xc37   : >> { %v2312_v12 = vsub.f32 1.0, %v2311_v11 }
 0xc39   : >> { %v2313_v31 = vmul.f32 %v3686_v9, %v2312_v12 }
 0xc3b   : >> { %v2314_v16 = vadd.f32 %v3686_v9, %v2313_v31 }
 0xc3d   : >> { %v2318_v21 = vsel %vm2317_vm0, %v3686_v9, %v2314_v16 }
 0xc3e   : >> { %v2323_v22 = vsel %vm2320_vm1, %v2322_v17, %v2318_v21 }
 0xc3f   : >> { %v2324_v23 = vmul.f32 %v2323_v22, %v2299_v20 }
 0xc41   : >> { %v3339_v25 = vclamps-f32 %v2324_v23, 1.0 }
 0xc43   : >> { %v2327_v28 = vadd.f32 1.0, %v3339_v25 }
 0xc45   : >> { %v2328_v29 = vmul.f32 %v2327_v28, %v2285_v26 }
 0xc47   : >> { %v2329_v30 = vmul.f32 %v2328_v29, %v2198_v27 }
 0xc49   : >> { %v2330_v32 = vpack.c.bf16 %v2329_v30, %v2329_v30 }
 0xc4b   : >> { %2405 = vmatmul.bf16.vlgmr.msra.gmra.mxu2 %v2330_v32 }
 0xcce   : >> { %v2406_v33 = vpop.f32.mrf.mxu2 }
 0xccf   : >> { %v2410_v34 = vadd.f32 %v3988_v19, %v2406_v33  }
 0xcd1   : >> { %v4906_v19 = vmov %v2410_v34  ;;  %v2411_v40 = vadd.f32 (%p2111_p4), %v2410_v34, %v4687_v60 }
 0xcd2   : > { %2113 = sbr.rel (!%p2111_p4) target bundleno = 2924 (0xb6c), region = 214  ;;  %v3546_v19 = vld [vmem:[%s4907_s1 + $0x28] sm:$0xff] (%p2111_p4) }
 0xcd3   : > { %2484 = vmatpush.bf16.msra.mxu0 (%p2111_p4), %v3546_v19  ;;  %v2416_v43 = vadd.f32 (%p2111_p4), %v3687_v41, %v2411_v40 }
 0xcd5   : > { %v2417_v45 = vpack.c.bf16 (%p2111_p4), %v2416_v43, %v2416_v43 }
 0xcd6   : >> { %v2408_v36 = vpop.f32.mrf.mxu2 }
 0xcd7   : > { %2485 = vmatpush.bf16.msra.mxu0 %v3545_v39 }
 0xcdb   : > { %2486 = vmatpush.bf16.msra.mxu0 %v3544_v18 }
 0xcdf   : > { %2487 = vmatpush.bf16.msra.mxu0 %v3543_v35 }
 0xce3   : > { %2488 = vmatpush.bf16.msra.mxu0 %v3542_v42 }
 0xce7   : > { %2489 = vmatpush.bf16.msra.mxu0 %v3541_v44 }
 0xcea   : > { %2490 = vmatmul.bf16.vlgmr.msra.gmra.mxu0 %v2417_v45 }
 0xd67   : > { %v2491_v60 = vpop.f32.mrf.mxu0 }
 0xd68   : > { %2495 = vst [vmem:[%s4701_s22] sm:$0xff] %v2491_v60 }
 0xd69   : > { %3925 = shalt.err (!%p3922_p2)
}
 0xd6a   : > { %3567 = dma.vmem_to_hbm [thread:$0]  (%p4170_p7), %s2510_s20, 128, %s2512_s17, %s2497_s3  }
 0xd6f   : > { %v2493_v46 = vpop.f32.mrf.mxu0 }
 0xd70 PF: > { %s4911_s15 = sld [smem:[#allocation21_spill]]  ;;  %p4913_p10 = scmp.ge.s32.totalorder %s3984_s30, 2 }
 0xd72   : > { %p3593_p13 = pnand %p4913_p10, %p4132_p6 }
 0xd74   : > { %p3594_p8 = pneg %p3593_p13 }
 0xd76   : > { %s2523_s29 = sand.u32 1, %s4911_s15  }
 0xd77   : > { %s2524_s13 = scalar_lea.sflag [#allocation5], %s2523_s29 }
 0xd78   : > { %3967 = dma.done.wait (%p3594_p8), %s2524_s13, 128  }
 0xd79   : > { %3969 = vsyncadd (%p3594_p8), %s2524_s13, 4294967168  ;;  %s4914_s30 = sld [smem:[#allocation24_spill]]  ;;  %s4917_s27 = smov %s3976_s28 }
 0xd7a   : > { %s4915_s5 = sld [smem:[#allocation22_spill]] }
 0xd7b   : > { %s4916_s29 = sld [smem:[#allocation25_spill]] }
 0xd7f   : > { %p38_p9 = scmp.ge.s32.totalorder %s4914_s30, 4  }
 0xd80   : > { %s4918_s28 = smov %s4915_s5 }
 0xd81   :  { %40 = sbr.rel (!%p38_p9) target bundleno = 26 (0x1a), region = 225 }
 0xd86   :  { %2530 = vsyncpa [#allocation4], 1 }
 0xd87   :  { %2532 = vsyncpa [#allocation4 + $0x1], 1 }
 0xd88   :  { %2533 = vsyncpa [#allocation7], 1 }
 0xd89   :  { %2535 = vsyncpa [#allocation7 + $0x1], 1 }
 0xd8a   :  { %2536 = vsyncpa [#allocation10], 1 }
 0xd8b   :  { %2538 = vsyncpa [#allocation10 + $0x1], 1 }
 0xd8c   :  { %2539 = vsyncpa [#allocation13], 1 }
 0xd8d   :  { %2540 = vsyncpa [#allocation5], 1 }
 0xd8e   :  { %2542 = vsyncpa [#allocation5 + $0x1], 1 }

</bundles_post_ra>
